<compile_context>
chip_gen: v7x
topology: tpu7x:2x2x1
jax: 0.10.0
libtpu: 0.0.40
codegen_flags: <defaults>
</compile_context>

<pallas_src>
import functools
import math

import numpy as np
import jax
import jax.numpy as jnp
from jax.experimental import pallas as pl
from jax.experimental.pallas import tpu as pltpu


# ----------------------------- VMEM / tiling config --------------------------

def _detect_vmem_limit():
    """Generation-aware scoped-VMEM limit.

    v5e/v6e have 128 MiB VMEM per TensorCore, v7x has 64 MiB.  Leave ~1/4 of the
    physical capacity as headroom for compiler-internal scratch; cap at 64 MiB.
    """
    try:
        cap = int(pltpu.get_tpu_info().vmem_capacity_bytes)
    except Exception:
        cap = 64 * 1024 * 1024
    return min((cap * 3) // 4, 64 * 1024 * 1024)


_VMEM_LIMIT = _detect_vmem_limit()
_CP = pltpu.CompilerParams(vmem_limit_bytes=_VMEM_LIMIT)

# 1024/1024/1152 bf16 tiles need ~17 MiB double-buffered -> fits every generation,
# so no TM downgrade anywhere (halving TM only doubled weight re-reads).
_TM_CAP = 1024
_TN_CAP = 1024
_TK_CAP = 1152            # 9*128


def _round_up(x, m):
    return ((x + m - 1) // m) * m


def _pick_tile(dim, cap, align):
    """Return (tile, padded_dim): full dim if it fits, else a large aligned divisor,
    else pad up to a multiple of the cap-sized tile."""
    if dim <= cap:
        return dim, dim
    t_max = (cap // align) * align
    t = t_max
    while t >= max(align, cap // 2):
        if dim % t == 0:
            return t, dim
        t -= align
    return t_max, _round_up(dim, t_max)


# ----------------------------- Pallas kernels --------------------------------

def _mm_bn_act_kernel(x_ref, w_ref, s_ref, b_ref, o_ref, acc_ref, *, act):
    """Tiled o = act((x @ w) * s + b) with f32 accumulation across the K grid axis."""
    @pl.when(pl.program_id(2) == 0)
    def _init():
        acc_ref[...] = jnp.zeros_like(acc_ref)

    acc_ref[...] += jnp.dot(x_ref[...], w_ref[...],
                            preferred_element_type=jnp.float32)

    @pl.when(pl.program_id(2) == pl.num_programs(2) - 1)
    def _finalize():
        y = acc_ref[...] * s_ref[...] + b_ref[...]
        if act == "relu":
            y = jnp.maximum(y, 0.0)
        o_ref[...] = y.astype(o_ref.dtype)


# module-level partials so pallas/jit caches hit across the 33 bottleneck blocks
_MM_KERNELS = {a: functools.partial(_mm_bn_act_kernel, act=a)
               for a in ("none", "relu")}


def _se_gate_kernel(x_ref, w1_ref, b1_ref, w2_ref, b2_ref, g_ref, acc_ref, *, inv_hw):
    """SE gate for all batch samples at once: global-average-pool (accumulated over
    the HW grid axis) -> fc1 -> ReLU -> fc2 -> sigmoid -> gate (N, C) f32."""
    @pl.when(pl.program_id(0) == 0)
    def _init():
        acc_ref[...] = jnp.zeros_like(acc_ref)

    acc_ref[...] += jnp.sum(x_ref[...].astype(jnp.float32), axis=1)     # (N, C)

    @pl.when(pl.program_id(0) == pl.num_programs(0) - 1)
    def _finalize():
        pooled = (acc_ref[...] * inv_hw).astype(jnp.bfloat16)            # (N, C)
        h = jnp.dot(pooled, w1_ref[...], preferred_element_type=jnp.float32)
        h = jnp.maximum(h + b1_ref[...], 0.0).astype(jnp.bfloat16)       # (N, mid)
        g = jnp.dot(h, w2_ref[...], preferred_element_type=jnp.float32) + b2_ref[...]
        g_ref[...] = jax.nn.sigmoid(g)                                   # (N, C) f32


def _se_scale_kernel(x_ref, r_ref, g_ref, o_ref):
    """out = relu(x * gate + residual) for one (sample, HW-tile) block (f32 math)."""
    y = x_ref[...].astype(jnp.float32) * g_ref[...] + r_ref[...].astype(jnp.float32)
    o_ref[...] = jnp.maximum(y, 0.0).astype(o_ref.dtype)


def _head_kernel(x_ref, w_ref, b_ref, o_ref):
    """AdaptiveAvgPool2d(1) + Linear fused: (N, HW, C) -> (N, num_classes)."""
    pooled = jnp.mean(x_ref[...].astype(jnp.float32), axis=1)            # (N, C)
    y = jnp.dot(pooled, w_ref[...], preferred_element_type=jnp.float32) + b_ref[...]
    o_ref[...] = y.astype(o_ref.dtype)
    # TODO(synk): num_classes < 128 produces masked lane stores; harmless at this size.


# ----------------------------- kernel wrappers --------------------------------

def _matmul_call(x2d, w, scale, bias, act, out_dtype=jnp.bfloat16):
    """Tiled fused matmul+BN+act.  x2d:(M,K) bf16, w:(K,N) bf16, scale/bias:(N,) f32."""
    m, k = x2d.shape
    _, n = w.shape
    tm, m_pad = _pick_tile(m, _TM_CAP, 16)          # 16: bf16 sublane packing
    tk, k_pad = _pick_tile(k, _TK_CAP, 128)
    tn, n_pad = _pick_tile(n, _TN_CAP, 128)
    # v7x megacore: if both parallel axes collapsed to one tile, split N so the
    # grid still has >=2 parallel tiles to shard across the two TensorCores.
    if m_pad // tm == 1 and n_pad // tn == 1 and n_pad % 256 == 0:
        tn = n_pad // 2

    if m_pad != m or k_pad != k:
        x2d = jnp.pad(x2d, ((0, m_pad - m), (0, k_pad - k)))
    if k_pad != k or n_pad != n:
        w = jnp.pad(w, ((0, k_pad - k), (0, n_pad - n)))
    if n_pad != n:
        scale = jnp.pad(scale, (0, n_pad - n))
        bias = jnp.pad(bias, (0, n_pad - n))

    grid = (m_pad // tm, n_pad // tn, k_pad // tk)
    out = pl.pallas_call(
        _MM_KERNELS[act],
        out_shape=jax.ShapeDtypeStruct((m_pad, n_pad), out_dtype),
        grid=grid,
        in_specs=[
            pl.BlockSpec((tm, tk), lambda i, j, kk: (i, kk)),
            pl.BlockSpec((tk, tn), lambda i, j, kk: (kk, j)),
            pl.BlockSpec((1, tn), lambda i, j, kk: (0, j)),
            pl.BlockSpec((1, tn), lambda i, j, kk: (0, j)),
        ],
        out_specs=pl.BlockSpec((tm, tn), lambda i, j, kk: (i, j)),
        scratch_shapes=[pltpu.VMEM((tm, tn), jnp.float32)],
        compiler_params=pltpu.CompilerParams(
            dimension_semantics=("parallel", "parallel", "arbitrary"),
            vmem_limit_bytes=_VMEM_LIMIT),
    )(x2d, w, scale.reshape(1, n_pad), bias.reshape(1, n_pad))
    if m_pad != m or n_pad != n:
        out = out[:m, :n]
    return out


def _im2col(x, k, stride, pad):
    """x: (N,H,W,C) -> (N,Ho,Wo,k*k,C) patches (tap-major, channel-minor)."""
    n, h, w, c = x.shape
    ho = (h + 2 * pad - k) // stride + 1
    wo = (w + 2 * pad - k) // stride + 1
    xp = jnp.pad(x, ((0, 0), (pad, pad), (pad, pad), (0, 0)))
    taps = []
    for di in range(k):
        for dj in range(k):
            t = xp[:, di:di + stride * ho:stride, dj:dj + stride * wo:stride, :]
            taps.append(t[:, :ho, :wo, :])
    cols = jnp.stack(taps, axis=3)
    return cols, ho, wo


@functools.partial(jax.jit, static_argnames=("k", "stride", "pad", "act"))
def conv_bn_act(x, w, bn_scale, bn_bias, *, k, stride, pad, act):
    """Dense conv (im2col + tiled matmul) + folded BatchNorm + activation (NHWC bf16).
    Used for the 7x7 stem and every 1x1 conv (incl. downsamples)."""
    n, h, ww, cin = x.shape
    if k == 1:
        xs = x[:, ::stride, ::stride, :]
        ho, wo = xs.shape[1], xs.shape[2]
        x2d = xs.reshape(n * ho * wo, cin)
    else:
        cols, ho, wo = _im2col(x, k, stride, pad)
        x2d = cols.reshape(n * ho * wo, k * k * cin)
    y = _matmul_call(x2d, w, bn_scale, bn_bias, act)
    return y.reshape(n, ho, wo, w.shape[1])


@functools.partial(jax.jit, static_argnames=("stride",))
def grouped_conv3x3_bn_relu(x, wc, bn_scale, bn_bias, *, stride):
    """Grouped 3x3 conv + folded BN + ReLU exploiting the block-diagonal structure.

    Only the nonzero 128x128 diagonal slabs of the grouped weight are stored /
    DMA'd (wc: (ctiles*9*128, 128)).  The K grid axis runs over the 9 taps with
    tk=128, and both the activation and weight index_maps depend on the
    output-channel tile j, so each output tile contracts 9*128 elements instead
    of 9*C (up to 8x fewer MACs and x/weight HBM reads than a dense lowering).
    """
    n, h, w_, c = x.shape
    ctiles = c // 128
    cols, ho, wo = _im2col(x, 3, stride, 1)            # (N,Ho,Wo,9,C), tap-major
    m = n * ho * wo
    x2d = cols.reshape(m, 9 * c)
    tm, m_pad = _pick_tile(m, _TM_CAP, 16)
    # v7x megacore: keep >=2 parallel tiles when the parallel grid would be 1x1.
    if m_pad // tm == 1 and ctiles == 1 and tm % 32 == 0:
        tm = tm // 2
    if m_pad != m:
        x2d = jnp.pad(x2d, ((0, m_pad - m), (0, 0)))

    # TODO(synk): with tk=128 per K step, pipeline_mode=pl.Buffered(3) on the x/w
    # specs could further hide K-step DMA latency; omitted for portability.
    grid = (m_pad // tm, ctiles, 9)
    out = pl.pallas_call(
        _MM_KERNELS["relu"],
        out_shape=jax.ShapeDtypeStruct((m_pad, c), jnp.bfloat16),
        grid=grid,
        in_specs=[
            pl.BlockSpec((tm, 128), lambda i, j, t: (i, t * ctiles + j)),
            pl.BlockSpec((128, 128), lambda i, j, t: (j * 9 + t, 0)),
            pl.BlockSpec((1, 128), lambda i, j, t: (0, j)),
            pl.BlockSpec((1, 128), lambda i, j, t: (0, j)),
        ],
        out_specs=pl.BlockSpec((tm, 128), lambda i, j, t: (i, j)),
        scratch_shapes=[pltpu.VMEM((tm, 128), jnp.float32)],
        compiler_params=pltpu.CompilerParams(
            dimension_semantics=("parallel", "parallel", "arbitrary"),
            vmem_limit_bytes=_VMEM_LIMIT),
    )(x2d, wc, bn_scale.reshape(1, c), bn_bias.reshape(1, c))
    if m_pad != m:
        out = out[:m]
    return out.reshape(n, ho, wo, c)


@jax.jit
def maxpool3x3_s2_p1(x):
    """PyTorch MaxPool2d(3, stride=2, padding=1) on NHWC bf16 data.
    Plain jnp.maximum chain so XLA fuses it in one pass (no (9,M,C) HBM stack)."""
    n, h, w, c = x.shape
    ho = (h - 1) // 2 + 1
    wo = (w - 1) // 2 + 1
    xp = jnp.pad(x, ((0, 0), (1, 1), (1, 1), (0, 0)),
                 constant_values=float("-inf"))
    out = None
    for di in range(3):
        for dj in range(3):
            t = xp[:, di:di + 2 * ho:2, dj:dj + 2 * wo:2, :][:, :ho, :wo, :]
            out = t if out is None else jnp.maximum(out, t)
    return out


@jax.jit
def se_gate(x, w1, b1, w2, b2):
    """SE squeeze+excite gate for all samples at once: (N,H,W,C) -> (N,1,C) f32."""
    n, h, w_, c = x.shape
    hw = h * w_
    mid = w1.shape[1]
    xf = x.reshape(n, hw, c)
    # bound the (N, thw, C) input block to ~4 MiB so it double-buffers comfortably
    cap = max(8, (min(4096, (4 << 20) // (n * c * 2)) // 8) * 8)
    thw, hw_pad = _pick_tile(hw, cap, 8)
    if hw_pad != hw:
        xf = jnp.pad(xf, ((0, 0), (0, hw_pad - hw), (0, 0)))
    gate = pl.pallas_call(
        functools.partial(_se_gate_kernel, inv_hw=1.0 / hw),
        out_shape=jax.ShapeDtypeStruct((n, c), jnp.float32),
        grid=(hw_pad // thw,),
        in_specs=[
            pl.BlockSpec((n, thw, c), lambda s: (0, s, 0)),
            pl.BlockSpec((c, mid), lambda s: (0, 0)),
            pl.BlockSpec((1, mid), lambda s: (0, 0)),
            pl.BlockSpec((mid, c), lambda s: (0, 0)),
            pl.BlockSpec((1, c), lambda s: (0, 0)),
        ],
        out_specs=pl.BlockSpec((n, c), lambda s: (0, 0)),
        scratch_shapes=[pltpu.VMEM((n, c), jnp.float32)],
        compiler_params=pltpu.CompilerParams(
            dimension_semantics=("arbitrary",),
            vmem_limit_bytes=_VMEM_LIMIT),
    )(xf, w1, b1, w2, b2)
    return gate.reshape(n, 1, c)


@jax.jit
def se_scale_add_relu(x, residual, gate):
    """Tiled, lane-dense out = relu(x * gate + residual).  x/residual: NHWC bf16."""
    n, h, w_, c = x.shape
    hw = h * w_
    xf = x.reshape(n, hw, c)
    rf = residual.reshape(n, hw, c)
    cap = max(8, (min(4096, (2 << 20) // (c * 2)) // 8) * 8)
    thw, hw_pad = _pick_tile(hw, cap, 8)
    if hw_pad != hw:
        xf = jnp.pad(xf, ((0, 0), (0, hw_pad - hw), (0, 0)))
        rf = jnp.pad(rf, ((0, 0), (0, hw_pad - hw), (0, 0)))
    out = pl.pallas_call(
        _se_scale_kernel,
        out_shape=jax.ShapeDtypeStruct((n, hw_pad, c), x.dtype),
        grid=(n, hw_pad // thw),
        in_specs=[
            pl.BlockSpec((1, thw, c), lambda i, s: (i, s, 0)),
            pl.BlockSpec((1, thw, c), lambda i, s: (i, s, 0)),
            pl.BlockSpec((1, 1, c), lambda i, s: (i, 0, 0)),
        ],
        out_specs=pl.BlockSpec((1, thw, c), lambda i, s: (i, s, 0)),
        compiler_params=pltpu.CompilerParams(
            dimension_semantics=("parallel", "parallel"),
            vmem_limit_bytes=_VMEM_LIMIT),
    )(xf, rf, gate)
    if hw_pad != hw:
        out = out[:, :hw, :]
    return out.reshape(n, h, w_, c)


@jax.jit
def head(x, fc_w, fc_b):
    """AdaptiveAvgPool2d(1) + Linear(2048, num_classes), fused."""
    n, h, w, c = x.shape
    nc = fc_w.shape[1]
    return pl.pallas_call(
        _head_kernel,
        out_shape=jax.ShapeDtypeStruct((n, nc), jnp.float32),
        compiler_params=_CP,
    )(x.reshape(n, h * w, c), fc_w, fc_b)


# ----------------------------- parameters ------------------------------------

def _conv_w(rng, fan_in, cout):
    return jnp.asarray(rng.standard_normal((fan_in, cout)) / math.sqrt(fan_in),
                       jnp.bfloat16)


def _bn(rng, c):
    gamma = 1.0 + 0.1 * rng.standard_normal(c)
    beta = 0.05 * rng.standard_normal(c)
    mean = 0.05 * rng.standard_normal(c)
    var = 1.0 + 0.1 * np.abs(rng.standard_normal(c))
    scale = gamma / np.sqrt(var + 1e-5)
    bias = beta - mean * scale
    return jnp.asarray(scale, jnp.float32), jnp.asarray(bias, jnp.float32)


def _lin(rng, fin, fout, w_dtype=jnp.float32):
    w = jnp.asarray(rng.standard_normal((fin, fout)) / math.sqrt(fin), w_dtype)
    b = jnp.asarray(0.05 * rng.standard_normal((1, fout)), jnp.float32)
    return w, b


def _grouped_compact_w(rng, g, d):
    """Grouped 3x3 conv weight stored compactly: only the nonzero 128-wide diagonal
    slabs, shape (ctiles*9*128, 128), rows ordered (channel-tile, tap, cin-within).
    Matches _im2col's tap-major / channel-minor column layout."""
    c = g * d
    ctiles = c // 128
    gp = 128 // d                                   # groups per 128-channel tile
    w = rng.standard_normal((g, 9, d, d)) / math.sqrt(9 * d)   # [group, tap, cin, cout]
    wc = np.zeros((ctiles, 9, 128, 128), np.float32)
    for gi in range(g):
        j, sub = divmod(gi, gp)
        lo = sub * d
        wc[j, :, lo:lo + d, lo:lo + d] = w[gi]
    # NOTE: porting real PyTorch (OIHW, grouped) checkpoints requires an exact
    # OIHW -> (channel-tile, tap, cin, cout) reorder here; mistakes are silent.
    return jnp.asarray(wc.reshape(ctiles * 9 * 128, 128), jnp.bfloat16)


def _make_block(rng, inplanes, planes, stride, has_downsample,
                cardinality=32, base_width=4, reduction=16):
    d = (planes * base_width) // 64          # D in SEBottleneck
    g = cardinality
    dc = d * g
    out_ch = planes * 4
    blk = {"stride": stride}
    blk["conv1_w"] = _conv_w(rng, inplanes, dc)                   # 1x1
    blk["bn1"] = _bn(rng, dc)
    blk["conv2_wc"] = _grouped_compact_w(rng, g, d)               # grouped 3x3, compact
    blk["bn2"] = _bn(rng, dc)
    blk["conv3_w"] = _conv_w(rng, dc, out_ch)                     # 1x1
    blk["bn3"] = _bn(rng, out_ch)
    mid = out_ch // reduction
    blk["se_w1"], blk["se_b1"] = _lin(rng, out_ch, mid, jnp.bfloat16)
    blk["se_w2"], blk["se_b2"] = _lin(rng, mid, out_ch, jnp.bfloat16)
    if has_downsample:
        blk["ds_w"] = _conv_w(rng, inplanes, out_ch)              # 1x1 stride s
        blk["ds_bn"] = _bn(rng, out_ch)
    return blk


def build_params(num_classes, rng):
    params = {}
    params["stem_w"] = _conv_w(rng, 7 * 7 * 3, 64)   # conv1: 7x7/2, 3 -> 64
    params["stem_bn"] = _bn(rng, 64)
    layers_cfg = [(64, 3, 1), (128, 4, 2), (256, 23, 2), (512, 3, 2)]
    inplanes = 64
    stages = []
    for planes, nblocks, stride in layers_cfg:
        blocks = []
        for b in range(nblocks):
            s = stride if b == 0 else 1
            has_ds = (b == 0) and (s != 1 or inplanes != planes * 4)
            blocks.append(_make_block(rng, inplanes, planes, s, has_ds))
            inplanes = planes * 4
        stages.append(blocks)
    params["layers"] = stages
    params["fc_w"], params["fc_b"] = _lin(rng, 512 * 4, num_classes)
    return params


# ----------------------------- forward pass ----------------------------------

def _bottleneck(x, blk):
    residual = x
    out = conv_bn_act(x, blk["conv1_w"], blk["bn1"][0], blk["bn1"][1],
                      k=1, stride=1, pad=0, act="relu")
    out = grouped_conv3x3_bn_relu(out, blk["conv2_wc"], blk["bn2"][0], blk["bn2"][1],
                                  stride=blk["stride"])
    out = conv_bn_act(out, blk["conv3_w"], blk["bn3"][0], blk["bn3"][1],
                      k=1, stride=1, pad=0, act="none")
    if "ds_w" in blk:
        residual = conv_bn_act(x, blk["ds_w"], blk["ds_bn"][0], blk["ds_bn"][1],
                               k=1, stride=blk["stride"], pad=0, act="none")
    gate = se_gate(out, blk["se_w1"], blk["se_b1"], blk["se_w2"], blk["se_b2"])
    return se_scale_add_relu(out, residual, gate)


def se_resnext101_ft_forward(x_nchw, params):
    """Equivalent of SE_ResNeXt101FT.forward; returns [logits]."""
    x = jnp.transpose(jnp.asarray(x_nchw, jnp.bfloat16), (0, 2, 3, 1))  # NCHW -> NHWC
    x = conv_bn_act(x, params["stem_w"], params["stem_bn"][0], params["stem_bn"][1],
                    k=7, stride=2, pad=3, act="relu")
    x = maxpool3x3_s2_p1(x)
    for stage in params["layers"]:
        for blk in stage:
            x = _bottleneck(x, blk)
    logits = head(x, params["fc_w"], params["fc_b"])
    return [logits]


# ----------------------------- main -------------------------------------------

if __name__ == "__main__":
    num_classes = 10
    params = build_params(num_classes, np.random.default_rng(0))

    key = jax.random.PRNGKey(0)
    x = jax.random.normal(key, (2, 3, 64, 64), dtype=jnp.float32)  # small NCHW input

    out = se_resnext101_ft_forward(x, params)
    logits = jax.block_until_ready(out[0])
    assert logits.shape == (2, num_classes)
    assert bool(jnp.all(jnp.isfinite(logits)))
    print("KERNEL_OK")
</pallas_src>

<mosaic_0001>
module attributes {stable_mosaic.version = 11 : i64} {
  func.func @_mm_bn_act_kernel(%arg0: i32, %arg1: i32, %arg2: i32, %arg3: memref<1024x147xbf16, #tpu.memory_space<vmem>>, %arg4: memref<147x64xbf16, #tpu.memory_space<vmem>>, %arg5: memref<1x64xf32, #tpu.memory_space<vmem>>, %arg6: memref<1x64xf32, #tpu.memory_space<vmem>>, %arg7: memref<1024x64xbf16, #tpu.memory_space<vmem>>, %arg8: memref<1024x64xf32, #tpu.memory_space<vmem>>) attributes {dimension_semantics = [#tpu.dimension_semantics<parallel>, #tpu.dimension_semantics<parallel>, #tpu.dimension_semantics<arbitrary>], iteration_bounds = array<i64: 2, 1, 1>, scalar_prefetch = 0 : i64, scratch_operands = 1 : i64, tpu.core_type = #tpu.core_type<tc>, window_params = [{transform_indices = @transform_0, window_bounds = array<i64: 1024, 147>}, {transform_indices = @transform_1, window_bounds = array<i64: 147, 64>}, {transform_indices = @transform_2, window_bounds = array<i64: 1, 64>}, {transform_indices = @transform_3, window_bounds = array<i64: 1, 64>}, {transform_indices = @transform_4, window_bounds = array<i64: 1024, 64>}]} {
    %c0_i32 = arith.constant 0 : i32
    %0 = arith.cmpi eq, %arg2, %c0_i32 : i32
    %1 = arith.extui %0 : i1 to i32
    %c0_i32_0 = arith.constant 0 : i32
    %2 = arith.cmpi ne, %1, %c0_i32_0 : i32
    scf.if %2 {
      %cst_10 = arith.constant 0.000000e+00 : f32
      %12 = vector.broadcast %cst_10 : f32 to vector<1024x64xf32>
      %c0_11 = arith.constant 0 : index
      %c0_12 = arith.constant 0 : index
      %13 = vector.load %arg8[%c0_11, %c0_12] : memref<1024x64xf32, #tpu.memory_space<vmem>>, vector<1024x64xf32>
      tpu.vector_store %arg8[%c0_11, %c0_12], %12 {strides = array<i32>} : memref<1024x64xf32, #tpu.memory_space<vmem>>, vector<1024x64xf32>,
    } else {
    }
    %c0 = arith.constant 0 : index
    %c0_1 = arith.constant 0 : index
    %3 = vector.load %arg8[%c0, %c0_1] : memref<1024x64xf32, #tpu.memory_space<vmem>>, vector<1024x64xf32>
    %c0_2 = arith.constant 0 : index
    %c0_3 = arith.constant 0 : index
    %4 = vector.load %arg3[%c0_2, %c0_3] : memref<1024x147xbf16, #tpu.memory_space<vmem>>, vector<1024x147xbf16>
    %c0_4 = arith.constant 0 : index
    %c0_5 = arith.constant 0 : index
    %5 = vector.load %arg4[%c0_4, %c0_5] : memref<147x64xbf16, #tpu.memory_space<vmem>>, vector<147x64xbf16>
    %cst = arith.constant dense<0.000000e+00> : vector<1024x64xf32>
    %6 = tpu.matmul %4, %5, %cst {dimension_numbers = #tpu.dot_dimension_numbers<[1], [0], [0], [1], [0, 0, 1, 1], [], []>} : vector<1024x147xbf16>, vector<147x64xbf16>, vector<1024x64xf32> -> vector<1024x64xf32>
    %7 = arith.addf %3, %6 : vector<1024x64xf32>
    %c0_6 = arith.constant 0 : index
    %c0_7 = arith.constant 0 : index
    %8 = vector.load %arg8[%c0_6, %c0_7] : memref<1024x64xf32, #tpu.memory_space<vmem>>, vector<1024x64xf32>
    tpu.vector_store %arg8[%c0_6, %c0_7], %7 {strides = array<i32>} : memref<1024x64xf32, #tpu.memory_space<vmem>>, vector<1024x64xf32>,
    %c0_i32_8 = arith.constant 0 : i32
    %9 = arith.cmpi eq, %arg2, %c0_i32_8 : i32
    %10 = arith.extui %9 : i1 to i32
    %c0_i32_9 = arith.constant 0 : i32
    %11 = arith.cmpi ne, %10, %c0_i32_9 : i32
    scf.if %11 {
      %c0_10 = arith.constant 0 : index
      %c0_11 = arith.constant 0 : index
      %12 = vector.load %arg8[%c0_10, %c0_11] : memref<1024x64xf32, #tpu.memory_space<vmem>>, vector<1024x64xf32>
      %c0_12 = arith.constant 0 : index
      %c0_13 = arith.constant 0 : index
      %13 = vector.load %arg5[%c0_12, %c0_13] : memref<1x64xf32, #tpu.memory_space<vmem>>, vector<1x64xf32>
      %14 = vector.broadcast %13 : vector<1x64xf32> to vector<1024x64xf32>
      %15 = arith.mulf %12, %14 : vector<1024x64xf32>
      %c0_14 = arith.constant 0 : index
      %c0_15 = arith.constant 0 : index
      %16 = vector.load %arg6[%c0_14, %c0_15] : memref<1x64xf32, #tpu.memory_space<vmem>>, vector<1x64xf32>
      %17 = vector.broadcast %16 : vector<1x64xf32> to vector<1024x64xf32>
      %18 = arith.addf %15, %17 : vector<1024x64xf32>
      %cst_16 = arith.constant 0.000000e+00 : f32
      %19 = vector.broadcast %cst_16 : f32 to vector<1024x64xf32>
      %20 = arith.maximumf %18, %19 : vector<1024x64xf32>
      %21 = arith.truncf %20 : vector<1024x64xf32> to vector<1024x64xbf16>
      %c0_17 = arith.constant 0 : index
      %c0_18 = arith.constant 0 : index
      %22 = vector.load %arg7[%c0_17, %c0_18] : memref<1024x64xbf16, #tpu.memory_space<vmem>>, vector<1024x64xbf16>
      tpu.vector_store %arg7[%c0_17, %c0_18], %21 {strides = array<i32>} : memref<1024x64xbf16, #tpu.memory_space<vmem>>, vector<1024x64xbf16>,
    } else {
    }
    return
  }
  func.func @transform_0(%arg0: i32, %arg1: i32, %arg2: i32) -> (i32, i32) {
    %c0_i32 = arith.constant 0 : i32
    return %arg0, %arg2 : i32, i32
  }
  func.func @transform_1(%arg0: i32, %arg1: i32, %arg2: i32) -> (i32, i32) {
    %c0_i32 = arith.constant 0 : i32
    return %arg2, %arg1 : i32, i32
  }
  func.func @transform_2(%arg0: i32, %arg1: i32, %arg2: i32) -> (i32, i32) {
    %c0_i32 = arith.constant 0 : i32
    %c0_i32_0 = arith.constant 0 : i32
    return %c0_i32, %arg1 : i32, i32
  }
  func.func @transform_3(%arg0: i32, %arg1: i32, %arg2: i32) -> (i32, i32) {
    %c0_i32 = arith.constant 0 : i32
    %c0_i32_0 = arith.constant 0 : i32
    return %c0_i32, %arg1 : i32, i32
  }
  func.func @transform_4(%arg0: i32, %arg1: i32, %arg2: i32) -> (i32, i32) {
    %c0_i32 = arith.constant 0 : i32
    return %arg0, %arg1 : i32, i32
  }
}

</mosaic_0001>

<bundles_post_ra>
// kernel: conv_bn_act.1
= control target key start
LH: loop header
LB: loop body
LE: loop exit
PB: predicated region body
PF: predicated region fallthrough
CT: control target
= control target key end

     0   :  { %9 = vsyncpa [#allocation4], 0  ;;  %s5808_s0 = inlined_call_operand.vmem [shape: bf16[2048,147], index: 0, kind: input, shape index: {}]   ;;  %s5809_s1 = inlined_call_operand.vmem [shape: bf16[147,64], index: 1, kind: input, shape index: {}]   ;;  %s5810_s2 = inlined_call_operand.vmem [shape: f32[1,64], index: 2, kind: input, shape index: {}]   ;;  %s5811_s3 = inlined_call_operand.vmem [shape: f32[1,64], index: 3, kind: input, shape index: {}]   ;;  %s5812_s4 = inlined_call_operand.hbm [shape: bf16[2048,64], index: 4, kind: output, shape index: {}]  }
   0x1   :  { %11 = vsyncpa [#allocation4 + $0x1], 0  ;;  %s4528_s15 = smov 0   ;;  %s4530_s16 = smov 0  }
   0x2   :  { %s4532_s17 = smov 0   ;;  %s4534_s18 = smov 0  }
   0x3   :  { %s4536_s19 = smov 0   ;;  %s4538_s20 = smov 0  }
   0x4 LB: > { %s3652_s21 = sadd.s32 4294967295, %s4495_s20   ;;  %s3653_s22 = sadd.s32 4294967294, %s4495_s20   ;;  %s4495_s20 = sphi %s4538_s20, %s17_s20   ;;  %s4491_s19 = sphi %s4536_s19, %s5819_s19   ;;  %s4487_s18 = sphi %s4534_s18, %s5818_s18   ;;  %s4483_s17 = sphi %s4532_s17, %s5817_s17   ;;  %s4479_s16 = sphi %s4530_s16, %s5816_s16   ;;  %s4475_s15 = sphi %s4528_s15, %s5815_s15  }
   0x5   : > { %s36_s23 = sadd.s32 1, %s4491_s19  ;;  %s153_s24 = sadd.s32 1, %s4483_s17 }
   0x6   : > { %p38_p0 = scmp.ge.s32.totalorder %s36_s23, 2  ;;  %p163_p1 = scmp.ne.s32.totalorder %s4483_s17, %s4479_s16 }
   0x7   : > { %p164_p2 = scmp.eq.s32.totalorder %s3652_s21, 1  ;;  %p169_p3 = scmp.ne.s32.totalorder %s4479_s16, %s4475_s15 }
   0x8   : > { %s5821_s23 = smov (%p38_p0, %s36_s23), 0  ;;  %p170_p5 = scmp.eq.s32.totalorder %s3653_s22, 1 }
   0x9   : > { %p4568_p4 = por %p164_p2, %p163_p1  ;;  %s148_s26 = ssub.s32 %s4491_s19, %s5821_s23 }
   0xa   : > { %p3659_p6 = scmp.ge.s32.totalorder %s4495_s20, 1  ;;  %p151_p7 = scmp.eq.s32.totalorder %s148_s26, 0 }
   0xb   : > { %p4575_p8 = por %p170_p5, %p169_p3  ;;  %p227_p9 = scmp.lt.s32.totalorder %s4495_s20, 3 }
   0xc   : > { %s4581_s28 = scalar_select %p151_p7, %s4483_s17, %s153_s24  }
   0xd   : > { %p228_p10 = pnand %p3659_p6, %p227_p9 }
   0xe   : > { %v4211_v0 = vld [vmem:[%s5809_s1] sm:$0xff] (!%p228_p10)   ;;  %v4497_v1 = vmov (!%p228_p10), 0   ;;  %v4212_v2 = vld [vmem:[%s5809_s1 + $0x8] sm:$0xff] (!%p228_p10)   ;;  %v4213_v3 = vld [vmem:[%s5809_s1 + $0x10] sm:$0xff] (!%p228_p10)   ;;  %s3661_s9 = sshll.u32 (!%p228_p10), %s4487_s18, 7  ;;  %vm1342_vm0 = vcmask (!%p228_p10), 154624  }
   0xf   : > { %231 = sbr.rel (%p228_p10) target bundleno = 552 (0x228), region = 36  ;;  %1542 = vmatprep.subr.bf16.mxu0 (!%p228_p10), %v4497_v1  ;;  %4131 = vmatprep.subr.bf16.mxu1 (!%p228_p10), %v4497_v1  ;;  %p274_p11 = scmp.lt.s32.totalorder (!%p228_p10), %s3661_s9, 255  ;;  %v4214_v4 = vld [vmem:[%s5809_s1 + $0x18] sm:$0xff] (!%p228_p10)   ;;  %v4215_v5 = vld [vmem:[%s5809_s1 + $0x20] sm:$0xff] (!%p228_p10)   ;;  %v4216_v8 = vld [vmem:[%s5809_s1 + $0x28] sm:$0xff] (!%p228_p10)   ;;  %vm1535_vm1 = vcmask (!%p228_p10), 1040384  }
  0x10   : > { %1543 = vmatpush1.bf16.msra.mxu0 (!%p228_p10), %v4211_v0  ;;  %4141 = vmatpush1.bf16.msra.mxu1 (!%p228_p10), %v4211_v0  ;;  %v4217_v9 = vld [vmem:[%s5809_s1 + $0x30] sm:$0xff] (!%p228_p10)   ;;  %v4218_v10 = vld [vmem:[%s5809_s1 + $0x38] sm:$0xff] (!%p228_p10)   ;;  %vm1536_vm2 = vcmask (!%p228_p10), 1041408   ;;  %v4498_v11 = vmov (!%p228_p10), 65535   ;;  %v4219_v13 = vld [vmem:[%s5809_s1 + $0x40] sm:$0xff] (!%p228_p10)   ;;  %vm305_vm3 = vcmask (!%p228_p10), 523264  }
  0x11   : > { %1544 = vmatprep.subr.bf16.mxu0 (!%p228_p10), %v4497_v1  ;;  %4132 = vmatprep.subr.bf16.mxu1 (!%p228_p10), %v4497_v1  ;;  %v1537_v12 = vsel (!%p228_p10), %vm1535_vm1, 4294967295, %v4498_v11  ;;  %v4220_v14 = vld [vmem:[%s5809_s1 + $0x48] ss:$0 sps:$4 sm:$0x33] (!%p228_p10)   ;;  %v4499_v59 = vmov (!%p228_p10), 0.0   ;;  %vm3385_vm4 = vcmask (!%p228_p10), 519168  }
  0x12   : > { %v1538_v15 = vsel (!%p228_p10), %vm1536_vm2, %v1537_v12, 0  ;;  %306 = vst.msk [vmem:[#allocation2] sm:$0xff] (!%p228_p10), %vm305_vm3, %v4499_v59  ;;  %307 = vst.msk [vmem:[#allocation2 + $0x8] sm:$0xff] (!%p228_p10), %vm305_vm3, %v4499_v59  ;;  %s4130_s11 = sshll.u32 (!%p228_p10), %s4487_s18, 13 }
  0x13   : > { %v1540_v16 = vand.u32 (!%p228_p10), %v4220_v14, %v1538_v15  ;;  %308 = vst.msk [vmem:[#allocation2 + $0x10] sm:$0xff] (!%p228_p10), %vm305_vm3, %v4499_v59  ;;  %309 = vst.msk [vmem:[#allocation2 + $0x18] sm:$0xff] (!%p228_p10), %vm305_vm3, %v4499_v59  ;;  %s5750_s24 = scalar_lea.hbm (!%p228_p10), %s5812_s4, %s4130_s11 }
  0x14   : > { %1545 = vmatpush1.bf16.msra.mxu0 (!%p228_p10), %v4212_v2  ;;  %4142 = vmatpush1.bf16.msra.mxu1 (!%p228_p10), %v4212_v2  ;;  %310 = vst.msk [vmem:[#allocation2 + $0x20] sm:$0xff] (!%p228_p10), %vm305_vm3, %v4499_v59  ;;  %311 = vst.msk [vmem:[#allocation2 + $0x28] sm:$0xff] (!%p228_p10), %vm305_vm3, %v4499_v59 }
  0x15   : > { %1546 = vmatprep.subr.bf16.mxu0 (!%p228_p10), %v4497_v1  ;;  %4133 = vmatprep.subr.bf16.mxu1 (!%p228_p10), %v4497_v1  ;;  %312 = vst.msk [vmem:[#allocation2 + $0x30] sm:$0xff] (!%p228_p10), %vm305_vm3, %v4499_v59  ;;  %313 = vst.msk [vmem:[#allocation2 + $0x38] sm:$0xff] (!%p228_p10), %vm305_vm3, %v4499_v59 }
  0x16   : > { %s5823_s9 = smov (!%p274_p11, %s3661_s9), 255  ;;  %314 = vst.msk [vmem:[#allocation2 + $0x40] sm:$0xff] %vm305_vm3, %v4499_v59  ;;  %315 = vst.msk [vmem:[#allocation2 + $0x48] sm:$0xff] %vm305_vm3, %v4499_v59 }
  0x17   : > { %s4001_s12 = sshll.u32 %s5823_s9, 3  ;;  %316 = vst.msk [vmem:[#allocation2 + $0x50] sm:$0xff] %vm305_vm3, %v4499_v59  ;;  %317 = vst.msk [vmem:[#allocation2 + $0x58] sm:$0xff] %vm305_vm3, %v4499_v59 }
  0x18   : > { %1547 = vmatpush1.bf16.msra.mxu0 %v4213_v3  ;;  %4143 = vmatpush1.bf16.msra.mxu1 %v4213_v3  ;;  %s4599_s21 = scalar_lea.vmem %s5808_s0, %s4001_s12  ;;  %318 = vst.msk [vmem:[#allocation2 + $0x60] sm:$0xff] %vm305_vm3, %v4499_v59  ;;  %319 = vst.msk [vmem:[#allocation2 + $0x68] sm:$0xff] %vm305_vm3, %v4499_v59  ;;  %s269_s12 = sand.u32 1, %s4479_s16  }
  0x19   : > { %1548 = vmatprep.subr.bf16.mxu0 %v4497_v1  ;;  %4134 = vmatprep.subr.bf16.mxu1 %v4497_v1  ;;  %v4223_v6 = vld [vmem:[%s4599_s21 + $0x4] ss:$8 sps:$4 sm:$0xff]   ;;  %v4221_v17 = vld [vmem:[%s4599_s21] ss:$8 sps:$4 sm:$0xff]   ;;  %v4227_v19 = vld [vmem:[%s4599_s21 + $0x14] ss:$8 sps:$4 sm:$0xff]  }
  0x1a   : > { %v4226_v7 = vld [vmem:[%s4599_s21 + $0x204] ss:$8 sps:$4 sm:$0xff]   ;;  %3802 = vmatprep.mubr.msk.bf16.mxu0 %vm1342_vm0, %v4223_v6  ;;  %v4224_v18 = vld [vmem:[%s4599_s21 + $0x200] ss:$8 sps:$4 sm:$0xff]   ;;  %v4229_v20 = vld [vmem:[%s4599_s21 + $0x214] ss:$8 sps:$4 sm:$0xff]  }
  0x1b   : > { %3834 = vmatprep.mubr.msk.bf16.mxu1 %vm1342_vm0, %v4226_v7  ;;  %v4231_v21 = vld [vmem:[%s4599_s21 + $0x10] ss:$8 sps:$4 sm:$0xff]   ;;  %v4233_v23 = vld [vmem:[%s4599_s21 + $0x24] ss:$8 sps:$4 sm:$0xff]   ;;  %v4237_v25 = vld [vmem:[%s4599_s21 + $0x20] ss:$8 sps:$4 sm:$0xff]  }
  0x1c   : > { %1549 = vmatpush1.bf16.msra.mxu0 %v4214_v4  ;;  %4144 = vmatpush1.bf16.msra.mxu1 %v4214_v4  ;;  %v4232_v22 = vld [vmem:[%s4599_s21 + $0x210] ss:$8 sps:$4 sm:$0xff]   ;;  %v4235_v24 = vld [vmem:[%s4599_s21 + $0x224] ss:$8 sps:$4 sm:$0xff]   ;;  %v4238_v26 = vld [vmem:[%s4599_s21 + $0x220] ss:$8 sps:$4 sm:$0xff]  }
  0x1d   : > { %1550 = vmatprep.subr.bf16.mxu0 %v4497_v1  ;;  %4135 = vmatprep.subr.bf16.mxu1 %v4497_v1  ;;  %v4239_v27 = vld [vmem:[%s4599_s21 + $0x34] ss:$8 sps:$4 sm:$0xff]   ;;  %v4243_v29 = vld [vmem:[%s4599_s21 + $0x30] ss:$8 sps:$4 sm:$0xff]   ;;  %v4245_v31 = vld [vmem:[%s4599_s21 + $0x44] ss:$8 sps:$4 sm:$0xff]  }
  0x1e   : > { %v4241_v28 = vld [vmem:[%s4599_s21 + $0x234] ss:$8 sps:$4 sm:$0xff]   ;;  %v4244_v30 = vld [vmem:[%s4599_s21 + $0x230] ss:$8 sps:$4 sm:$0xff]   ;;  %v4247_v32 = vld [vmem:[%s4599_s21 + $0x244] ss:$8 sps:$4 sm:$0xff]  }
  0x1f   : > { %v4249_v33 = vld [vmem:[%s4599_s21 + $0x40] ss:$8 sps:$4 sm:$0xff]   ;;  %v4251_v35 = vld [vmem:[%s4599_s21 + $0x54] ss:$8 sps:$4 sm:$0xff]   ;;  %v4255_v37 = vld [vmem:[%s4599_s21 + $0x50] ss:$8 sps:$4 sm:$0xff]  }
  0x20   : > { %1551 = vmatpush1.bf16.msra.mxu0 %v4215_v5  ;;  %4145 = vmatpush1.bf16.msra.mxu1 %v4215_v5  ;;  %v4250_v34 = vld [vmem:[%s4599_s21 + $0x240] ss:$8 sps:$4 sm:$0xff]   ;;  %v4253_v36 = vld [vmem:[%s4599_s21 + $0x254] ss:$8 sps:$4 sm:$0xff]   ;;  %v4256_v38 = vld [vmem:[%s4599_s21 + $0x250] ss:$8 sps:$4 sm:$0xff]  }
  0x21   : > { %1552 = vmatprep.subr.bf16.mxu0 %v4497_v1  ;;  %4136 = vmatprep.subr.bf16.mxu1 %v4497_v1  ;;  %v4257_v39 = vld [vmem:[%s4599_s21 + $0x64] ss:$8 sps:$4 sm:$0xff]   ;;  %v4261_v41 = vld [vmem:[%s4599_s21 + $0x60] ss:$8 sps:$4 sm:$0xff]   ;;  %v4263_v43 = vld [vmem:[%s4599_s21 + $0x74] ss:$8 sps:$4 sm:$0xff]  }
  0x22   : > { %v4259_v40 = vld [vmem:[%s4599_s21 + $0x264] ss:$8 sps:$4 sm:$0xff]   ;;  %v4262_v42 = vld [vmem:[%s4599_s21 + $0x260] ss:$8 sps:$4 sm:$0xff]   ;;  %v4265_v44 = vld [vmem:[%s4599_s21 + $0x274] ss:$8 sps:$4 sm:$0xff]  }
  0x23   : > { %v4267_v45 = vld [vmem:[%s4599_s21 + $0x70] ss:$8 sps:$4 sm:$0xff]   ;;  %v4269_v47 = vld [vmem:[%s4599_s21 + $0x84] ss:$8 sps:$4 sm:$0xff]   ;;  %v4273_v49 = vld [vmem:[%s4599_s21 + $0x80] ss:$8 sps:$4 sm:$0xff]  }
  0x24   : > { %1553 = vmatpush1.bf16.msra.mxu0 %v4216_v8  ;;  %4146 = vmatpush1.bf16.msra.mxu1 %v4216_v8  ;;  %v4268_v46 = vld [vmem:[%s4599_s21 + $0x270] ss:$8 sps:$4 sm:$0xff]   ;;  %v4271_v48 = vld [vmem:[%s4599_s21 + $0x284] ss:$8 sps:$4 sm:$0xff]   ;;  %v4274_v50 = vld [vmem:[%s4599_s21 + $0x280] ss:$8 sps:$4 sm:$0xff]  }
  0x25   : > { %1554 = vmatprep.subr.bf16.mxu0 %v4497_v1  ;;  %4137 = vmatprep.subr.bf16.mxu1 %v4497_v1  ;;  %v4275_v51 = vld [vmem:[%s4599_s21 + $0x94] ss:$8 sps:$4 sm:$0xff]   ;;  %v4279_v53 = vld [vmem:[%s4599_s21 + $0x90] ss:$8 sps:$4 sm:$0xff]   ;;  %v4281_v55 = vld [vmem:[%s4599_s21 + $0xa4] ss:$8 sps:$4 sm:$0xff]  }
  0x26   : > { %v4277_v52 = vld [vmem:[%s4599_s21 + $0x294] ss:$8 sps:$4 sm:$0xff]   ;;  %v4280_v54 = vld [vmem:[%s4599_s21 + $0x290] ss:$8 sps:$4 sm:$0xff]   ;;  %v4283_v56 = vld [vmem:[%s4599_s21 + $0x2a4] ss:$8 sps:$4 sm:$0xff]  }
  0x27   : > { %v4684_v57 = vld [vmem:[%s4599_s21 + $0xa0] ss:$8 sps:$4 sm:$0xff]   ;;  %320 = vst.msk [vmem:[#allocation2 + $0x70] sm:$0xff] %vm305_vm3, %v4499_v59  ;;  %321 = vst.msk [vmem:[#allocation2 + $0x78] sm:$0xff] %vm305_vm3, %v4499_v59  ;;  %v4287_v60 = vld [vmem:[%s4599_s21 + $0xb4] ss:$8 sps:$4 sm:$0xff]  }
  0x28   : > { %1555 = vmatpush1.bf16.msra.mxu0 %v4217_v9  ;;  %4147 = vmatpush1.bf16.msra.mxu1 %v4217_v9  ;;  %v4687_v58 = vld [vmem:[%s4599_s21 + $0x2a0] ss:$8 sps:$4 sm:$0xff]   ;;  %322 = vst.msk [vmem:[#allocation2 + $0x80] sm:$0xff] %vm305_vm3, %v4499_v59  ;;  %323 = vst.msk [vmem:[#allocation2 + $0x88] sm:$0xff] %vm305_vm3, %v4499_v59  ;;  %v4289_v61 = vld [vmem:[%s4599_s21 + $0x2b4] ss:$8 sps:$4 sm:$0xff]  }
  0x29   : > { %1556 = vmatprep.subr.bf16.mxu0 %v4497_v1  ;;  %4138 = vmatprep.subr.bf16.mxu1 %v4497_v1  ;;  %324 = vst.msk [vmem:[#allocation2 + $0x90] sm:$0xff] %vm305_vm3, %v4499_v59  ;;  %325 = vst.msk [vmem:[#allocation2 + $0x98] sm:$0xff] %vm305_vm3, %v4499_v59  ;;  %v4291_v62 = vld [vmem:[%s4599_s21 + $0xb0] ss:$8 sps:$4 sm:$0xff]   ;;  %v4293_v0 = vld [vmem:[%s4599_s21 + $0xc4] ss:$8 sps:$4 sm:$0xff]  }
  0x2a   : > { %326 = vst.msk [vmem:[#allocation2 + $0xa0] sm:$0xff] %vm305_vm3, %v4499_v59  ;;  %327 = vst.msk [vmem:[#allocation2 + $0xa8] sm:$0xff] %vm305_vm3, %v4499_v59  ;;  %v4292_v63 = vld [vmem:[%s4599_s21 + $0x2b0] ss:$8 sps:$4 sm:$0xff]   ;;  %v4297_v2 = vld [vmem:[%s4599_s21 + $0xc0] ss:$8 sps:$4 sm:$0xff]  }
  0x2b   : > { %328 = vst.msk [vmem:[#allocation2 + $0xb0] sm:$0xff] %vm305_vm3, %v4499_v59  ;;  %329 = vst.msk [vmem:[#allocation2 + $0xb8] sm:$0xff] %vm305_vm3, %v4499_v59  ;;  %v4298_v3 = vld [vmem:[%s4599_s21 + $0x2c0] ss:$8 sps:$4 sm:$0xff]   ;;  %v4299_v4 = vld [vmem:[%s4599_s21 + $0xd4] ss:$8 sps:$4 sm:$0xff]  }
  0x2c   : > { %1557 = vmatpush1.bf16.msra.mxu0 %v4218_v10  ;;  %4148 = vmatpush1.bf16.msra.mxu1 %v4218_v10  ;;  %330 = vst.msk [vmem:[#allocation2 + $0xc0] sm:$0xff] %vm305_vm3, %v4499_v59  ;;  %331 = vst.msk [vmem:[#allocation2 + $0xc8] sm:$0xff] %vm305_vm3, %v4499_v59  ;;  %v4301_v5 = vld [vmem:[%s4599_s21 + $0x2d4] ss:$8 sps:$4 sm:$0xff]   ;;  %v4303_v6 = vld [vmem:[%s4599_s21 + $0xd0] ss:$8 sps:$4 sm:$0xff]  }
  0x2d   : > { %1558 = vmatprep.subr.bf16.mxu0 %v4497_v1  ;;  %4139 = vmatprep.subr.bf16.mxu1 %v4497_v1  ;;  %332 = vst.msk [vmem:[#allocation2 + $0xd0] sm:$0xff] %vm305_vm3, %v4499_v59  ;;  %333 = vst.msk [vmem:[#allocation2 + $0xd8] sm:$0xff] %vm305_vm3, %v4499_v59  ;;  %v4304_v7 = vld [vmem:[%s4599_s21 + $0x2d0] ss:$8 sps:$4 sm:$0xff]   ;;  %v4305_v8 = vld [vmem:[%s4599_s21 + $0xe4] ss:$8 sps:$4 sm:$0xff]  }
  0x2e   : > { %334 = vst.msk [vmem:[#allocation2 + $0xe0] sm:$0xff] %vm305_vm3, %v4499_v59  ;;  %335 = vst.msk [vmem:[#allocation2 + $0xe8] sm:$0xff] %vm305_vm3, %v4499_v59  ;;  %v4307_v9 = vld [vmem:[%s4599_s21 + $0x2e4] ss:$8 sps:$4 sm:$0xff]   ;;  %v4309_v10 = vld [vmem:[%s4599_s21 + $0xe0] ss:$8 sps:$4 sm:$0xff]  }
  0x2f   : > { %336 = vst.msk [vmem:[#allocation2 + $0xf0] sm:$0xff] %vm305_vm3, %v4499_v59  ;;  %337 = vst.msk [vmem:[#allocation2 + $0xf8] sm:$0xff] %vm305_vm3, %v4499_v59  ;;  %v4310_v11 = vld [vmem:[%s4599_s21 + $0x2e0] ss:$8 sps:$4 sm:$0xff]   ;;  %v4311_v12 = vld [vmem:[%s4599_s21 + $0xf4] ss:$8 sps:$4 sm:$0xff]  }
  0x30   : > { %1559 = vmatpush1.bf16.msra.mxu0 %v4219_v13  ;;  %4149 = vmatpush1.bf16.msra.mxu1 %v4219_v13  ;;  %338 = vst.msk [vmem:[#allocation2 + $0x100] sm:$0xff] %vm305_vm3, %v4499_v59  ;;  %339 = vst.msk [vmem:[#allocation2 + $0x108] sm:$0xff] %vm305_vm3, %v4499_v59  ;;  %v4313_v13 = vld [vmem:[%s4599_s21 + $0x2f4] ss:$8 sps:$4 sm:$0xff]   ;;  %v4315_v14 = vld [vmem:[%s4599_s21 + $0xf0] ss:$8 sps:$4 sm:$0xff]  }
  0x31   : > { %1560 = vmatprep.subr.bf16.mxu0 %v4497_v1  ;;  %4140 = vmatprep.subr.bf16.mxu1 %v4497_v1  ;;  %340 = vst.msk [vmem:[#allocation2 + $0x110] sm:$0xff] %vm305_vm3, %v4499_v59  ;;  %341 = vst.msk [vmem:[#allocation2 + $0x118] sm:$0xff] %vm305_vm3, %v4499_v59  ;;  %v4295_v1 = vld [vmem:[%s4599_s21 + $0x2c4] ss:$8 sps:$4 sm:$0xff]   ;;  %v4316_v15 = vld [vmem:[%s4599_s21 + $0x2f0] ss:$8 sps:$4 sm:$0xff]  }
  0x32   : > { %342 = vst.msk [vmem:[#allocation2 + $0x120] sm:$0xff] %vm305_vm3, %v4499_v59  ;;  %343 = vst.msk [vmem:[#allocation2 + $0x128] sm:$0xff] %vm305_vm3, %v4499_v59  ;;  %s5078_s26 = sshll.u32 %s269_s12, 9  ;;  %s5762_s18 = scalar_lea.sflag [#allocation4], %s269_s12 }
  0x33   : > { %344 = vst.msk [vmem:[#allocation2 + $0x130] sm:$0xff] %vm305_vm3, %v4499_v59  ;;  %345 = vst.msk [vmem:[#allocation2 + $0x138] sm:$0xff] %vm305_vm3, %v4499_v59  ;;  %s5094_s29 = scalar_lea.vmem [#allocation3], %s5078_s26 }
  0x34   : > { %1561 = vmatpush1.bf16.msra.mxu0 %v1540_v16  ;;  %4150 = vmatpush1.bf16.msra.mxu1 %v1540_v16  ;;  %346 = vst.msk [vmem:[#allocation2 + $0x140] sm:$0xff] %vm305_vm3, %v4499_v59  ;;  %347 = vst.msk [vmem:[#allocation2 + $0x148] sm:$0xff] %vm305_vm3, %v4499_v59  ;;  %v4317_v16 = vld [vmem:[%s4599_s21 + $0x104] ss:$8 sps:$4 sm:$0xff]   ;;  %s3529_s13 = sshll.u32 %s5094_s29, 4  ;;  %s5752_s13 = int_to_ptr.vmem [resolvable:$true] %s3529_s13 }
  0x35   : > { %348 = vst.msk [vmem:[#allocation2 + $0x150] sm:$0xff] %vm305_vm3, %v4499_v59  ;;  %349 = vst.msk [vmem:[#allocation2 + $0x158] sm:$0xff] %vm305_vm3, %v4499_v59  ;;  %s4417_s26 = scalar_lea.vmem %s5752_s13, 8192 }
  0x36   : > { %350 = vst.msk [vmem:[#allocation2 + $0x160] sm:$0xff] %vm305_vm3, %v4499_v59  ;;  %351 = vst.msk [vmem:[#allocation2 + $0x168] sm:$0xff] %vm305_vm3, %v4499_v59  ;;  %p4418_p12 = scmp.ne.s32.totalorder %s5752_s13, %s4417_s26 }
  0x37   : > { %1575 = vmatmul.mubr.bf16.vlgmr.msra.gmra.mrb[0].mxu0 %v4221_v17  ;;  %1831 = vmatmul.mubr.bf16.vlgmr.msra.gmra.mrb[0].mxu1 %v4224_v18  ;;  %352 = vst.msk [vmem:[#allocation2 + $0x170] sm:$0xff] %vm305_vm3, %v4499_v59  ;;  %353 = vst.msk [vmem:[#allocation2 + $0x178] sm:$0xff] %vm305_vm3, %v4499_v59  ;;  %v4319_v17 = vld [vmem:[%s4599_s21 + $0x304] ss:$8 sps:$4 sm:$0xff]   ;;  %v4321_v18 = vld [vmem:[%s4599_s21 + $0x100] ss:$8 sps:$4 sm:$0xff]  }
  0x38   : > { %3803 = vmatprep.mubr.msk.bf16.mxu0 %vm1342_vm0, %v4227_v19  ;;  %3835 = vmatprep.mubr.msk.bf16.mxu1 %vm1342_vm0, %v4229_v20  ;;  %354 = vst.msk [vmem:[#allocation2 + $0x180] sm:$0xff] %vm305_vm3, %v4499_v59  ;;  %355 = vst.msk [vmem:[#allocation2 + $0x188] sm:$0xff] %vm305_vm3, %v4499_v59  ;;  %v4322_v19 = vld [vmem:[%s4599_s21 + $0x300] ss:$8 sps:$4 sm:$0xff]   ;;  %v4323_v20 = vld [vmem:[%s4599_s21 + $0x114] ss:$8 sps:$4 sm:$0xff]   ;;  %p4419_p13 = pnand %p4418_p12, %p4568_p4 }
  0x39   : > { %356 = vst.msk [vmem:[#allocation2 + $0x190] sm:$0xff] %vm305_vm3, %v4499_v59  ;;  %357 = vst.msk [vmem:[#allocation2 + $0x198] sm:$0xff] %vm305_vm3, %v4499_v59 }
  0x3a   : > { %358 = vst.msk [vmem:[#allocation2 + $0x1a0] sm:$0xff] %vm305_vm3, %v4499_v59  ;;  %359 = vst.msk [vmem:[#allocation2 + $0x1a8] sm:$0xff] %vm305_vm3, %v4499_v59  ;;  %p4420_p0 = pneg %p4419_p13 }
  0x3b   : > { %360 = vst.msk [vmem:[#allocation2 + $0x1b0] sm:$0xff] %vm305_vm3, %v4499_v59  ;;  %361 = vst.msk [vmem:[#allocation2 + $0x1b8] sm:$0xff] %vm305_vm3, %v4499_v59 }
  0x3c   : > { %362 = vst.msk [vmem:[#allocation2 + $0x1c0] sm:$0xff] %vm305_vm3, %v4499_v59  ;;  %363 = vst.msk [vmem:[#allocation2 + $0x1c8] sm:$0xff] %vm305_vm3, %v4499_v59 }
  0x3d   : > { %364 = vst.msk [vmem:[#allocation2 + $0x1d0] sm:$0xff] %vm305_vm3, %v4499_v59  ;;  %365 = vst.msk [vmem:[#allocation2 + $0x1d8] sm:$0xff] %vm305_vm3, %v4499_v59 }
  0x3e   : > { %366 = vst.msk [vmem:[#allocation2 + $0x1e0] sm:$0xff] %vm305_vm3, %v4499_v59  ;;  %367 = vst.msk [vmem:[#allocation2 + $0x1e8] sm:$0xff] %vm305_vm3, %v4499_v59 }
  0x3f   : > { %1583 = vmatmul.mubr.bf16.gmra.mrb[4].mxu0 %v4231_v21  ;;  %1839 = vmatmul.mubr.bf16.gmra.mrb[4].mxu1 %v4232_v22  ;;  %368 = vst.msk [vmem:[#allocation2 + $0x1f0] sm:$0xff] %vm305_vm3, %v4499_v59  ;;  %369 = vst.msk [vmem:[#allocation2 + $0x1f8] sm:$0xff] %vm305_vm3, %v4499_v59  ;;  %v4325_v21 = vld [vmem:[%s4599_s21 + $0x314] ss:$8 sps:$4 sm:$0xff]   ;;  %v4327_v22 = vld [vmem:[%s4599_s21 + $0x110] ss:$8 sps:$4 sm:$0xff]  }
  0x40   : > { %3804 = vmatprep.mubr.msk.bf16.mxu0 %vm1342_vm0, %v4233_v23  ;;  %3836 = vmatprep.mubr.msk.bf16.mxu1 %vm1342_vm0, %v4235_v24  ;;  %370 = vst.msk [vmem:[#allocation2 + $0x200] sm:$0xff] %vm305_vm3, %v4499_v59  ;;  %371 = vst.msk [vmem:[#allocation2 + $0x208] sm:$0xff] %vm305_vm3, %v4499_v59  ;;  %v4328_v23 = vld [vmem:[%s4599_s21 + $0x310] ss:$8 sps:$4 sm:$0xff]   ;;  %v4329_v24 = vld [vmem:[%s4599_s21 + $0x124] ss:$8 sps:$4 sm:$0xff]  }
  0x41   : > { %372 = vst.msk [vmem:[#allocation2 + $0x210] sm:$0xff] %vm305_vm3, %v4499_v59  ;;  %373 = vst.msk [vmem:[#allocation2 + $0x218] sm:$0xff] %vm305_vm3, %v4499_v59 }
  0x42   : > { %374 = vst.msk [vmem:[#allocation2 + $0x220] sm:$0xff] %vm305_vm3, %v4499_v59  ;;  %375 = vst.msk [vmem:[#allocation2 + $0x228] sm:$0xff] %vm305_vm3, %v4499_v59 }
  0x43   : > { %376 = vst.msk [vmem:[#allocation2 + $0x230] sm:$0xff] %vm305_vm3, %v4499_v59  ;;  %377 = vst.msk [vmem:[#allocation2 + $0x238] sm:$0xff] %vm305_vm3, %v4499_v59 }
  0x44   : > { %378 = vst.msk [vmem:[#allocation2 + $0x240] sm:$0xff] %vm305_vm3, %v4499_v59  ;;  %379 = vst.msk [vmem:[#allocation2 + $0x248] sm:$0xff] %vm305_vm3, %v4499_v59 }
  0x45   : > { %380 = vst.msk [vmem:[#allocation2 + $0x250] sm:$0xff] %vm305_vm3, %v4499_v59  ;;  %381 = vst.msk [vmem:[#allocation2 + $0x258] sm:$0xff] %vm305_vm3, %v4499_v59 }
  0x46   : > { %382 = vst.msk [vmem:[#allocation2 + $0x260] sm:$0xff] %vm305_vm3, %v4499_v59  ;;  %383 = vst.msk [vmem:[#allocation2 + $0x268] sm:$0xff] %vm305_vm3, %v4499_v59 }
  0x47   : > { %1591 = vmatmul.mubr.bf16.gmra.mrb[8].mxu0 %v4237_v25  ;;  %1847 = vmatmul.mubr.bf16.gmra.mrb[8].mxu1 %v4238_v26  ;;  %384 = vst.msk [vmem:[#allocation2 + $0x270] sm:$0xff] %vm305_vm3, %v4499_v59  ;;  %385 = vst.msk [vmem:[#allocation2 + $0x278] sm:$0xff] %vm305_vm3, %v4499_v59  ;;  %v4331_v25 = vld [vmem:[%s4599_s21 + $0x324] ss:$8 sps:$4 sm:$0xff]   ;;  %v4333_v26 = vld [vmem:[%s4599_s21 + $0x120] ss:$8 sps:$4 sm:$0xff]  }
  0x48   : > { %3805 = vmatprep.mubr.msk.bf16.mxu0 %vm1342_vm0, %v4239_v27  ;;  %3837 = vmatprep.mubr.msk.bf16.mxu1 %vm1342_vm0, %v4241_v28  ;;  %386 = vst.msk [vmem:[#allocation2 + $0x280] sm:$0xff] %vm305_vm3, %v4499_v59  ;;  %387 = vst.msk [vmem:[#allocation2 + $0x288] sm:$0xff] %vm305_vm3, %v4499_v59  ;;  %v4334_v27 = vld [vmem:[%s4599_s21 + $0x320] ss:$8 sps:$4 sm:$0xff]   ;;  %v4335_v28 = vld [vmem:[%s4599_s21 + $0x134] ss:$8 sps:$4 sm:$0xff]  }
  0x49   : > { %388 = vst.msk [vmem:[#allocation2 + $0x290] sm:$0xff] %vm305_vm3, %v4499_v59  ;;  %389 = vst.msk [vmem:[#allocation2 + $0x298] sm:$0xff] %vm305_vm3, %v4499_v59 }
  0x4a   : > { %390 = vst.msk [vmem:[#allocation2 + $0x2a0] sm:$0xff] %vm305_vm3, %v4499_v59  ;;  %391 = vst.msk [vmem:[#allocation2 + $0x2a8] sm:$0xff] %vm305_vm3, %v4499_v59 }
  0x4b   : > { %392 = vst.msk [vmem:[#allocation2 + $0x2b0] sm:$0xff] %vm305_vm3, %v4499_v59  ;;  %393 = vst.msk [vmem:[#allocation2 + $0x2b8] sm:$0xff] %vm305_vm3, %v4499_v59 }
  0x4c   : > { %394 = vst.msk [vmem:[#allocation2 + $0x2c0] sm:$0xff] %vm305_vm3, %v4499_v59  ;;  %395 = vst.msk [vmem:[#allocation2 + $0x2c8] sm:$0xff] %vm305_vm3, %v4499_v59 }
  0x4d   : > { %396 = vst.msk [vmem:[#allocation2 + $0x2d0] sm:$0xff] %vm305_vm3, %v4499_v59  ;;  %397 = vst.msk [vmem:[#allocation2 + $0x2d8] sm:$0xff] %vm305_vm3, %v4499_v59 }
  0x4e   : > { %398 = vst.msk [vmem:[#allocation2 + $0x2e0] sm:$0xff] %vm305_vm3, %v4499_v59  ;;  %399 = vst.msk [vmem:[#allocation2 + $0x2e8] sm:$0xff] %vm305_vm3, %v4499_v59 }
  0x4f   : > { %1599 = vmatmul.mubr.bf16.gmra.mrb[12].mxu0 %v4243_v29  ;;  %1855 = vmatmul.mubr.bf16.gmra.mrb[12].mxu1 %v4244_v30  ;;  %400 = vst.msk [vmem:[#allocation2 + $0x2f0] sm:$0xff] %vm305_vm3, %v4499_v59  ;;  %401 = vst.msk [vmem:[#allocation2 + $0x2f8] sm:$0xff] %vm305_vm3, %v4499_v59  ;;  %v4337_v29 = vld [vmem:[%s4599_s21 + $0x334] ss:$8 sps:$4 sm:$0xff]   ;;  %v4339_v30 = vld [vmem:[%s4599_s21 + $0x130] ss:$8 sps:$4 sm:$0xff]  }
  0x50   : > { %3806 = vmatprep.mubr.msk.bf16.mxu0 %vm1342_vm0, %v4245_v31  ;;  %3838 = vmatprep.mubr.msk.bf16.mxu1 %vm1342_vm0, %v4247_v32  ;;  %402 = vst.msk [vmem:[#allocation2 + $0x300] sm:$0xff] %vm305_vm3, %v4499_v59  ;;  %403 = vst.msk [vmem:[#allocation2 + $0x308] sm:$0xff] %vm305_vm3, %v4499_v59  ;;  %v4340_v31 = vld [vmem:[%s4599_s21 + $0x330] ss:$8 sps:$4 sm:$0xff]   ;;  %v4341_v32 = vld [vmem:[%s4599_s21 + $0x144] ss:$8 sps:$4 sm:$0xff]  }
  0x51   : > { %404 = vst.msk [vmem:[#allocation2 + $0x310] sm:$0xff] %vm305_vm3, %v4499_v59  ;;  %405 = vst.msk [vmem:[#allocation2 + $0x318] sm:$0xff] %vm305_vm3, %v4499_v59 }
  0x52   : > { %406 = vst.msk [vmem:[#allocation2 + $0x320] sm:$0xff] %vm305_vm3, %v4499_v59  ;;  %407 = vst.msk [vmem:[#allocation2 + $0x328] sm:$0xff] %vm305_vm3, %v4499_v59 }
  0x53   : > { %408 = vst.msk [vmem:[#allocation2 + $0x330] sm:$0xff] %vm305_vm3, %v4499_v59  ;;  %409 = vst.msk [vmem:[#allocation2 + $0x338] sm:$0xff] %vm305_vm3, %v4499_v59 }
  0x54   : > { %410 = vst.msk [vmem:[#allocation2 + $0x340] sm:$0xff] %vm305_vm3, %v4499_v59  ;;  %411 = vst.msk [vmem:[#allocation2 + $0x348] sm:$0xff] %vm305_vm3, %v4499_v59 }
  0x55   : > { %412 = vst.msk [vmem:[#allocation2 + $0x350] sm:$0xff] %vm305_vm3, %v4499_v59  ;;  %413 = vst.msk [vmem:[#allocation2 + $0x358] sm:$0xff] %vm305_vm3, %v4499_v59 }
  0x56   : > { %414 = vst.msk [vmem:[#allocation2 + $0x360] sm:$0xff] %vm305_vm3, %v4499_v59  ;;  %415 = vst.msk [vmem:[#allocation2 + $0x368] sm:$0xff] %vm305_vm3, %v4499_v59 }
  0x57   : > { %1607 = vmatmul.mubr.bf16.gmra.mrb[16].mxu0 %v4249_v33  ;;  %1863 = vmatmul.mubr.bf16.gmra.mrb[16].mxu1 %v4250_v34  ;;  %416 = vst.msk [vmem:[#allocation2 + $0x370] sm:$0xff] %vm305_vm3, %v4499_v59  ;;  %417 = vst.msk [vmem:[#allocation2 + $0x378] sm:$0xff] %vm305_vm3, %v4499_v59  ;;  %v4343_v33 = vld [vmem:[%s4599_s21 + $0x344] ss:$8 sps:$4 sm:$0xff]   ;;  %v4345_v34 = vld [vmem:[%s4599_s21 + $0x140] ss:$8 sps:$4 sm:$0xff]  }
  0x58   : > { %3807 = vmatprep.mubr.msk.bf16.mxu0 %vm1342_vm0, %v4251_v35  ;;  %3839 = vmatprep.mubr.msk.bf16.mxu1 %vm1342_vm0, %v4253_v36  ;;  %418 = vst.msk [vmem:[#allocation2 + $0x380] sm:$0xff] %vm305_vm3, %v4499_v59  ;;  %419 = vst.msk [vmem:[#allocation2 + $0x388] sm:$0xff] %vm305_vm3, %v4499_v59  ;;  %v4346_v35 = vld [vmem:[%s4599_s21 + $0x340] ss:$8 sps:$4 sm:$0xff]   ;;  %v4347_v36 = vld [vmem:[%s4599_s21 + $0x154] ss:$8 sps:$4 sm:$0xff]  }
  0x59   : > { %420 = vst.msk [vmem:[#allocation2 + $0x390] sm:$0xff] %vm305_vm3, %v4499_v59  ;;  %421 = vst.msk [vmem:[#allocation2 + $0x398] sm:$0xff] %vm305_vm3, %v4499_v59 }
  0x5a   : > { %422 = vst.msk [vmem:[#allocation2 + $0x3a0] sm:$0xff] %vm305_vm3, %v4499_v59  ;;  %423 = vst.msk [vmem:[#allocation2 + $0x3a8] sm:$0xff] %vm305_vm3, %v4499_v59 }
  0x5b   : > { %424 = vst.msk [vmem:[#allocation2 + $0x3b0] sm:$0xff] %vm305_vm3, %v4499_v59  ;;  %425 = vst.msk [vmem:[#allocation2 + $0x3b8] sm:$0xff] %vm305_vm3, %v4499_v59 }
  0x5c   : > { %426 = vst.msk [vmem:[#allocation2 + $0x3c0] sm:$0xff] %vm305_vm3, %v4499_v59  ;;  %427 = vst.msk [vmem:[#allocation2 + $0x3c8] sm:$0xff] %vm305_vm3, %v4499_v59 }
  0x5d   : > { %428 = vst.msk [vmem:[#allocation2 + $0x3d0] sm:$0xff] %vm305_vm3, %v4499_v59  ;;  %429 = vst.msk [vmem:[#allocation2 + $0x3d8] sm:$0xff] %vm305_vm3, %v4499_v59 }
  0x5e   : > { %430 = vst.msk [vmem:[#allocation2 + $0x3e0] sm:$0xff] %vm305_vm3, %v4499_v59  ;;  %431 = vst.msk [vmem:[#allocation2 + $0x3e8] sm:$0xff] %vm305_vm3, %v4499_v59 }
  0x5f   : > { %1615 = vmatmul.mubr.bf16.gmra.mrb[20].mxu0 %v4255_v37  ;;  %1871 = vmatmul.mubr.bf16.gmra.mrb[20].mxu1 %v4256_v38  ;;  %432 = vst.msk [vmem:[#allocation2 + $0x3f0] sm:$0xff] %vm305_vm3, %v4499_v59  ;;  %433 = vst.msk [vmem:[#allocation2 + $0x3f8] sm:$0xff] %vm305_vm3, %v4499_v59  ;;  %v4349_v37 = vld [vmem:[%s4599_s21 + $0x354] ss:$8 sps:$4 sm:$0xff]   ;;  %v4351_v38 = vld [vmem:[%s4599_s21 + $0x150] ss:$8 sps:$4 sm:$0xff]  }
  0x60   : > { %3808 = vmatprep.mubr.msk.bf16.mxu0 %vm1342_vm0, %v4257_v39  ;;  %3840 = vmatprep.mubr.msk.bf16.mxu1 %vm1342_vm0, %v4259_v40  ;;  %v4352_v39 = vld [vmem:[%s4599_s21 + $0x350] ss:$8 sps:$4 sm:$0xff]   ;;  %v4353_v40 = vld [vmem:[%s4599_s21 + $0x164] ss:$8 sps:$4 sm:$0xff]   ;;  %v4382_v59 = vld [vmem:[%s4599_s21 + $0x3a0] ss:$8 sps:$4 sm:$0xff]  }
  0x67   : > { %1623 = vmatmul.mubr.bf16.gmra.mrb[24].mxu0 %v4261_v41  ;;  %1879 = vmatmul.mubr.bf16.gmra.mrb[24].mxu1 %v4262_v42  ;;  %v4355_v41 = vld [vmem:[%s4599_s21 + $0x364] ss:$8 sps:$4 sm:$0xff]   ;;  %v4357_v42 = vld [vmem:[%s4599_s21 + $0x160] ss:$8 sps:$4 sm:$0xff]  }
  0x68   : > { %3809 = vmatprep.mubr.msk.bf16.mxu0 %vm1342_vm0, %v4263_v43  ;;  %3841 = vmatprep.mubr.msk.bf16.mxu1 %vm1342_vm0, %v4265_v44  ;;  %v4358_v43 = vld [vmem:[%s4599_s21 + $0x360] ss:$8 sps:$4 sm:$0xff]   ;;  %v4359_v44 = vld [vmem:[%s4599_s21 + $0x174] ss:$8 sps:$4 sm:$0xff]  }
  0x6f   : > { %1631 = vmatmul.mubr.bf16.gmra.mrb[28].mxu0 %v4267_v45  ;;  %1887 = vmatmul.mubr.bf16.gmra.mrb[28].mxu1 %v4268_v46  ;;  %v4361_v45 = vld [vmem:[%s4599_s21 + $0x374] ss:$8 sps:$4 sm:$0xff]   ;;  %v4363_v46 = vld [vmem:[%s4599_s21 + $0x170] ss:$8 sps:$4 sm:$0xff]  }
  0x70   : > { %3810 = vmatprep.mubr.msk.bf16.mxu0 %vm1342_vm0, %v4269_v47  ;;  %3842 = vmatprep.mubr.msk.bf16.mxu1 %vm1342_vm0, %v4271_v48  ;;  %v4364_v47 = vld [vmem:[%s4599_s21 + $0x370] ss:$8 sps:$4 sm:$0xff]   ;;  %v4365_v48 = vld [vmem:[%s4599_s21 + $0x184] ss:$8 sps:$4 sm:$0xff]  }
  0x77   : > { %1639 = vmatmul.mubr.bf16.gmra.mrb[32].mxu0 %v4273_v49  ;;  %1895 = vmatmul.mubr.bf16.gmra.mrb[32].mxu1 %v4274_v50  ;;  %v4367_v49 = vld [vmem:[%s4599_s21 + $0x384] ss:$8 sps:$4 sm:$0xff]   ;;  %v4369_v50 = vld [vmem:[%s4599_s21 + $0x180] ss:$8 sps:$4 sm:$0xff]  }
  0x78   : > { %3811 = vmatprep.mubr.msk.bf16.mxu0 %vm1342_vm0, %v4275_v51  ;;  %3843 = vmatprep.mubr.msk.bf16.mxu1 %vm1342_vm0, %v4277_v52  ;;  %v4370_v51 = vld [vmem:[%s4599_s21 + $0x380] ss:$8 sps:$4 sm:$0xff]   ;;  %v4371_v52 = vld [vmem:[%s4599_s21 + $0x194] ss:$8 sps:$4 sm:$0xff]  }
  0x7f   : > { %1647 = vmatmul.mubr.bf16.gmra.mrb[36].mxu0 %v4279_v53  ;;  %1903 = vmatmul.mubr.bf16.gmra.mrb[36].mxu1 %v4280_v54  ;;  %v4373_v53 = vld [vmem:[%s4599_s21 + $0x394] ss:$8 sps:$4 sm:$0xff]   ;;  %v4375_v54 = vld [vmem:[%s4599_s21 + $0x190] ss:$8 sps:$4 sm:$0xff]  }
  0x80   : > { %3812 = vmatprep.mubr.msk.bf16.mxu0 %vm1342_vm0, %v4281_v55  ;;  %3844 = vmatprep.mubr.msk.bf16.mxu1 %vm1342_vm0, %v4283_v56  ;;  %v4376_v55 = vld [vmem:[%s4599_s21 + $0x390] ss:$8 sps:$4 sm:$0xff]   ;;  %v4377_v56 = vld [vmem:[%s4599_s21 + $0x1a4] ss:$8 sps:$4 sm:$0xff]  }
  0x87   : > { %1655 = vmatmul.mubr.bf16.gmra.mrb[40].mxu0 %v4684_v57  ;;  %1911 = vmatmul.mubr.bf16.gmra.mrb[40].mxu1 %v4687_v58  ;;  %v4379_v57 = vld [vmem:[%s4599_s21 + $0x3a4] ss:$8 sps:$4 sm:$0xff]   ;;  %v4381_v58 = vld [vmem:[%s4599_s21 + $0x1a0] ss:$8 sps:$4 sm:$0xff]  }
  0x88   : > { %3813 = vmatprep.mubr.msk.bf16.mxu0 %vm1342_vm0, %v4287_v60  ;;  %3845 = vmatprep.mubr.msk.bf16.mxu1 %vm1342_vm0, %v4289_v61  ;;  %v4383_v60 = vld [vmem:[%s4599_s21 + $0x1b4] ss:$8 sps:$4 sm:$0xff]  }
  0x89   : > { %v4385_v61 = vld [vmem:[%s4599_s21 + $0x3b4] ss:$8 sps:$4 sm:$0xff]  }
  0x8f   : > { %1663 = vmatmul.mubr.bf16.gmra.mrb[44].mxu0 %v4291_v62  ;;  %1919 = vmatmul.mubr.bf16.gmra.mrb[44].mxu1 %v4292_v63  ;;  %v434_v62 = vld [vmem:[#allocation2] sm:$0xff] }
  0x90   : > { %3814 = vmatprep.mubr.msk.bf16.mxu0 %vm1342_vm0, %v4293_v0  ;;  %3846 = vmatprep.mubr.msk.bf16.mxu1 %vm1342_vm0, %v4295_v1  ;;  %v498_v63 = vld [vmem:[#allocation2 + $0x200] sm:$0xff] }
  0x97   : > { %1671 = vmatmul.mubr.bf16.gmra.mrb[48].mxu0 %v4297_v2  ;;  %1927 = vmatmul.mubr.bf16.gmra.mrb[48].mxu1 %v4298_v3  ;;  %v435_v2 = vld [vmem:[#allocation2 + $0x8] sm:$0xff] }
  0x98   : > { %3815 = vmatprep.mubr.msk.bf16.mxu0 %vm1342_vm0, %v4299_v4  ;;  %3847 = vmatprep.mubr.msk.bf16.mxu1 %vm1342_vm0, %v4301_v5  ;;  %v499_v3 = vld [vmem:[#allocation2 + $0x208] sm:$0xff] }
  0x9f   : > { %1679 = vmatmul.mubr.bf16.gmra.mrb[52].mxu0 %v4303_v6  ;;  %1935 = vmatmul.mubr.bf16.gmra.mrb[52].mxu1 %v4304_v7 }
  0xa0   : > { %3816 = vmatprep.mubr.msk.bf16.mxu0 %vm1342_vm0, %v4305_v8  ;;  %3848 = vmatprep.mubr.msk.bf16.mxu1 %vm1342_vm0, %v4307_v9  ;;  %v4387_v8 = vld [vmem:[%s4599_s21 + $0x1b0] ss:$8 sps:$4 sm:$0xff]  }
  0xa1   : > { %v4388_v9 = vld [vmem:[%s4599_s21 + $0x3b0] ss:$8 sps:$4 sm:$0xff]  }
  0xa7   : > { %1687 = vmatmul.mubr.bf16.gmra.mrb[56].mxu0 %v4309_v10  ;;  %1943 = vmatmul.mubr.bf16.gmra.mrb[56].mxu1 %v4310_v11 }
  0xa8   : > { %3817 = vmatprep.mubr.msk.bf16.mxu0 %vm1342_vm0, %v4311_v12  ;;  %3849 = vmatprep.mubr.msk.bf16.mxu1 %vm1342_vm0, %v4313_v13  ;;  %v4389_v12 = vld [vmem:[%s4599_s21 + $0x1c4] ss:$8 sps:$4 sm:$0xff]  }
  0xa9   : > { %v4391_v13 = vld [vmem:[%s4599_s21 + $0x3c4] ss:$8 sps:$4 sm:$0xff]  }
  0xaf   : > { %1695 = vmatmul.mubr.bf16.gmra.mrb[60].mxu0 %v4315_v14  ;;  %1951 = vmatmul.mubr.bf16.gmra.mrb[60].mxu1 %v4316_v15 }
  0xb0   : > { %3818 = vmatprep.mubr.msk.bf16.mxu0 %vm1342_vm0, %v4317_v16  ;;  %3850 = vmatprep.mubr.msk.bf16.mxu1 %vm1342_vm0, %v4319_v17 }
  0xb7   : > { %1703 = vmatmul.mubr.bf16.gmra.mrb[64].mxu0 %v4321_v18  ;;  %1959 = vmatmul.mubr.bf16.gmra.mrb[64].mxu1 %v4322_v19  ;;  %v436_v18 = vld [vmem:[#allocation2 + $0x10] sm:$0xff] }
  0xb8   : > { %3819 = vmatprep.mubr.msk.bf16.mxu0 %vm1342_vm0, %v4323_v20  ;;  %3851 = vmatprep.mubr.msk.bf16.mxu1 %vm1342_vm0, %v4325_v21  ;;  %v500_v19 = vld [vmem:[#allocation2 + $0x210] sm:$0xff]  ;;  %v5061_v20 = vld [vmem:[%s5810_s2] ss:$0 sm:$0xff] }
  0xb9   : > { %v5066_v21 = vld [vmem:[%s5811_s3] ss:$0 sm:$0xff] }
  0xbf   : > { %1711 = vmatmul.mubr.bf16.gmra.mrb[68].mxu0 %v4327_v22  ;;  %1967 = vmatmul.mubr.bf16.gmra.mrb[68].mxu1 %v4328_v23 }
  0xc0   : > { %3820 = vmatprep.mubr.msk.bf16.mxu0 %vm1342_vm0, %v4329_v24  ;;  %3852 = vmatprep.mubr.msk.bf16.mxu1 %vm1342_vm0, %v4331_v25  ;;  %v437_v24 = vld [vmem:[#allocation2 + $0x18] sm:$0xff] }
  0xc1   : > { %v501_v25 = vld [vmem:[#allocation2 + $0x218] sm:$0xff] }
  0xc7   : > { %1719 = vmatmul.mubr.bf16.gmra.mrb[72].mxu0 %v4333_v26  ;;  %1975 = vmatmul.mubr.bf16.gmra.mrb[72].mxu1 %v4334_v27 }
  0xc8   : > { %3821 = vmatprep.mubr.msk.bf16.mxu0 %vm1342_vm0, %v4335_v28  ;;  %3853 = vmatprep.mubr.msk.bf16.mxu1 %vm1342_vm0, %v4337_v29 }
  0xcf   : > { %1727 = vmatmul.mubr.bf16.gmra.mrb[76].mxu0 %v4339_v30  ;;  %1983 = vmatmul.mubr.bf16.gmra.mrb[76].mxu1 %v4340_v31  ;;  %v4393_v30 = vld [vmem:[%s4599_s21 + $0x1c0] ss:$8 sps:$4 sm:$0xff]  }
  0xd0   : > { %3822 = vmatprep.mubr.msk.bf16.mxu0 %vm1342_vm0, %v4341_v32  ;;  %3854 = vmatprep.mubr.msk.bf16.mxu1 %vm1342_vm0, %v4343_v33  ;;  %v4394_v31 = vld [vmem:[%s4599_s21 + $0x3c0] ss:$8 sps:$4 sm:$0xff]  }
  0xd7   : > { %1735 = vmatmul.mubr.bf16.gmra.mrb[80].mxu0 %v4345_v34  ;;  %1991 = vmatmul.mubr.bf16.gmra.mrb[80].mxu1 %v4346_v35 }
  0xd8   : > { %3823 = vmatprep.mubr.msk.bf16.mxu0 %vm1342_vm0, %v4347_v36  ;;  %3855 = vmatprep.mubr.msk.bf16.mxu1 %vm1342_vm0, %v4349_v37  ;;  %v4395_v36 = vld [vmem:[%s4599_s21 + $0x1d4] ss:$8 sps:$4 sm:$0xff]  }
  0xdf   : > { %1743 = vmatmul.mubr.bf16.gmra.mrb[84].mxu0 %v4351_v38  ;;  %1999 = vmatmul.mubr.bf16.gmra.mrb[84].mxu1 %v4352_v39 }
  0xe0   : > { %3824 = vmatprep.mubr.msk.bf16.mxu0 %vm1342_vm0, %v4353_v40  ;;  %3856 = vmatprep.mubr.msk.bf16.mxu1 %vm1342_vm0, %v4355_v41 }
  0xe7   : > { %1751 = vmatmul.mubr.bf16.gmra.mrb[88].mxu0 %v4357_v42  ;;  %2007 = vmatmul.mubr.bf16.gmra.mrb[88].mxu1 %v4358_v43  ;;  %v4397_v43 = vld [vmem:[%s4599_s21 + $0x3d4] ss:$8 sps:$4 sm:$0xff]  }
  0xe8   : > { %3825 = vmatprep.mubr.msk.bf16.mxu0 %vm1342_vm0, %v4359_v44  ;;  %3857 = vmatprep.mubr.msk.bf16.mxu1 %vm1342_vm0, %v4361_v45 }
  0xef   : > { %1759 = vmatmul.mubr.bf16.gmra.mrb[92].mxu0 %v4363_v46  ;;  %2015 = vmatmul.mubr.bf16.gmra.mrb[92].mxu1 %v4364_v47 }
  0xf0   : > { %3826 = vmatprep.mubr.msk.bf16.mxu0 %vm1342_vm0, %v4365_v48  ;;  %3858 = vmatprep.mubr.msk.bf16.mxu1 %vm1342_vm0, %v4367_v49 }
  0xf7   : > { %1767 = vmatmul.mubr.bf16.gmra.mrb[96].mxu0 %v4369_v50  ;;  %2023 = vmatmul.mubr.bf16.gmra.mrb[96].mxu1 %v4370_v51 }
  0xf8   : > { %3827 = vmatprep.mubr.msk.bf16.mxu0 %vm1342_vm0, %v4371_v52  ;;  %3859 = vmatprep.mubr.msk.bf16.mxu1 %vm1342_vm0, %v4373_v53 }
  0xff   : > { %1775 = vmatmul.mubr.bf16.gmra.mrb[100].mxu0 %v4375_v54  ;;  %2031 = vmatmul.mubr.bf16.gmra.mrb[100].mxu1 %v4376_v55  ;;  %v438_v54 = vld [vmem:[#allocation2 + $0x20] sm:$0xff] }
 0x100   : > { %3828 = vmatprep.mubr.msk.bf16.mxu0 %vm1342_vm0, %v4377_v56  ;;  %3860 = vmatprep.mubr.msk.bf16.mxu1 %vm1342_vm0, %v4379_v57  ;;  %v502_v55 = vld [vmem:[#allocation2 + $0x220] sm:$0xff] }
 0x107   : > { %1783 = vmatmul.mubr.bf16.gmra.mrb[104].mxu0 %v4381_v58  ;;  %2039 = vmatmul.mubr.bf16.gmra.mrb[104].mxu1 %v4382_v59  ;;  %v439_v58 = vld [vmem:[#allocation2 + $0x28] sm:$0xff] }
 0x108   : > { %3829 = vmatprep.mubr.msk.bf16.mxu0 %vm1342_vm0, %v4383_v60  ;;  %3861 = vmatprep.mubr.msk.bf16.mxu1 %vm1342_vm0, %v4385_v61  ;;  %v503_v59 = vld [vmem:[#allocation2 + $0x228] sm:$0xff]  ;;  %v4399_v60 = vld [vmem:[%s4599_s21 + $0x1d0] ss:$8 sps:$4 sm:$0xff]  }
 0x10a   : > { %v1576_v0 = vpop.f32.mrb[0].mxu0  ;;  %v1832_v1 = vpop.f32.mrb[0].mxu1 }
 0x10b   : > { %v2087_v4 = vadd.f32 %v1576_v0, %v434_v62  ;;  %v2151_v5 = vadd.f32 %v1832_v1, %v498_v63  ;;  %v1578_v6 = vpop.f32.mrb[1].mxu0  ;;  %v1834_v7 = vpop.f32.mrb[1].mxu1 }
 0x10c   : > { %v1579_v10 = vpop.f32.mrb[2].mxu0  ;;  %v1835_v11 = vpop.f32.mrb[2].mxu1 }
 0x10d   : > { %2216 = vst.msk [vmem:[#allocation2] sm:$0xff] %vm305_vm3, %v2087_v4  ;;  %2280 = vst.msk [vmem:[#allocation2 + $0x200] sm:$0xff] %vm305_vm3, %v2151_v5  ;;  %v2088_v14 = vadd.f32 %v1579_v10, %v435_v2  ;;  %v2152_v15 = vadd.f32 %v1835_v11, %v499_v3  ;;  %v1581_v16 = vpop.f32.mrb[3].mxu0  ;;  %v1837_v17 = vpop.f32.mrb[3].mxu1  ;;  %v4400_v3 = vld [vmem:[%s4599_s21 + $0x3d0] ss:$8 sps:$4 sm:$0xff]  }
 0x10e   : > { %v4401_v10 = vld [vmem:[%s4599_s21 + $0x1e4] ss:$8 sps:$4 sm:$0xff]  }
 0x10f   : > { %2217 = vst.msk [vmem:[#allocation2 + $0x8] sm:$0xff] %vm305_vm3, %v2088_v14  ;;  %2281 = vst.msk [vmem:[#allocation2 + $0x208] sm:$0xff] %vm305_vm3, %v2152_v15  ;;  %1791 = vmatmul.mubr.bf16.gmra.mrb[108].mxu0 %v4387_v8  ;;  %2047 = vmatmul.mubr.bf16.gmra.mrb[108].mxu1 %v4388_v9  ;;  %v4403_v17 = vld [vmem:[%s4599_s21 + $0x3e4] ss:$8 sps:$4 sm:$0xff]  }
 0x110   : > { %3830 = vmatprep.mubr.msk.bf16.mxu0 %vm1342_vm0, %v4389_v12  ;;  %3862 = vmatprep.mubr.msk.bf16.mxu1 %vm1342_vm0, %v4391_v13 }
 0x112   : > { %v1584_v22 = vpop.f32.mrb[4].mxu0  ;;  %v1840_v23 = vpop.f32.mrb[4].mxu1 }
 0x113   : > { %v2089_v26 = vadd.f32 %v1584_v22, %v436_v18  ;;  %v2153_v27 = vadd.f32 %v1840_v23, %v500_v19  ;;  %v1586_v28 = vpop.f32.mrb[5].mxu0  ;;  %v1842_v29 = vpop.f32.mrb[5].mxu1 }
 0x114   : > { %v2347_v32 = vld [vmem:[#allocation2] sm:$0xff]  ;;  %v1587_v34 = vpop.f32.mrb[6].mxu0  ;;  %v1843_v35 = vpop.f32.mrb[6].mxu1 }
 0x115   : > { %v2411_v33 = vld [vmem:[#allocation2 + $0x200] sm:$0xff]  ;;  %v2482_v37 = vmul.f32 %v5061_v20, %v2347_v32  ;;  %2218 = vst.msk [vmem:[#allocation2 + $0x10] sm:$0xff] %vm305_vm3, %v2089_v26  ;;  %2282 = vst.msk [vmem:[#allocation2 + $0x210] sm:$0xff] %vm305_vm3, %v2153_v27  ;;  %v2090_v39 = vadd.f32 %v1587_v34, %v437_v24  ;;  %v2154_v40 = vadd.f32 %v1843_v35, %v501_v25  ;;  %v1589_v41 = vpop.f32.mrb[7].mxu0  ;;  %v1845_v42 = vpop.f32.mrb[7].mxu1  ;;  %v440_v32 = vld [vmem:[#allocation2 + $0x30] sm:$0xff] }
 0x116   : > { %v2546_v38 = vmul.f32 %v5061_v20, %v2411_v33  ;;  %v2348_v44 = vld [vmem:[#allocation2 + $0x8] sm:$0xff]  ;;  %v504_v33 = vld [vmem:[#allocation2 + $0x230] sm:$0xff] }
 0x117   : > { %v2412_v45 = vld [vmem:[#allocation2 + $0x208] sm:$0xff]  ;;  %v2617_v46 = vadd.f32 %v5066_v21, %v2482_v37  ;;  %v2483_v48 = vmul.f32 %v5061_v20, %v2348_v44  ;;  %2219 = vst.msk [vmem:[#allocation2 + $0x18] sm:$0xff] %vm305_vm3, %v2090_v39  ;;  %2283 = vst.msk [vmem:[#allocation2 + $0x218] sm:$0xff] %vm305_vm3, %v2154_v40  ;;  %1799 = vmatmul.mubr.bf16.gmra.mrb[112].mxu0 %v4393_v30  ;;  %2055 = vmatmul.mubr.bf16.gmra.mrb[112].mxu1 %v4394_v31  ;;  %v505_v37 = vld [vmem:[#allocation2 + $0x238] sm:$0xff] }
 0x118   : > { %v2681_v47 = vadd.f32 %v5066_v21, %v2546_v38  ;;  %v2547_v49 = vmul.f32 %v5061_v20, %v2412_v45  ;;  %3831 = vmatprep.mubr.msk.bf16.mxu0 %vm1342_vm0, %v4395_v36  ;;  %3863 = vmatprep.mubr.msk.bf16.mxu1 %vm1342_vm0, %v4397_v43  ;;  %v441_v36 = vld [vmem:[#allocation2 + $0x38] sm:$0xff]  ;;  %v4405_v44 = vld [vmem:[%s4599_s21 + $0x1e0] ss:$8 sps:$4 sm:$0xff]  }
 0x119   : > { %v2745_v50 = vmax.f32 %v2617_v46, 0.0  ;;  %v2618_v52 = vadd.f32 %v5066_v21, %v2483_v48 }
 0x11a   : > { %v2809_v51 = vmax.f32 %v2681_v47, 0.0  ;;  %v2682_v53 = vadd.f32 %v5066_v21, %v2547_v49  ;;  %v1592_v56 = vpop.f32.mrb[8].mxu0  ;;  %v1848_v57 = vpop.f32.mrb[8].mxu1  ;;  %v4406_v49 = vld [vmem:[%s4599_s21 + $0x3e0] ss:$8 sps:$4 sm:$0xff]  }
 0x11b   : > { %v4002_v61 = vpack.c.bf16 %v2745_v50, %v2745_v50  ;;  %v2746_v63 = vmax.f32 %v2618_v52, 0.0  ;;  %v1594_v1 = vpop.f32.mrb[9].mxu0  ;;  %v1850_v2 = vpop.f32.mrb[9].mxu1  ;;  %v2091_v6 = vadd.f32 %v1592_v56, %v438_v54  ;;  %v2155_v7 = vadd.f32 %v1848_v57, %v502_v55  ;;  %v4407_v50 = vld [vmem:[%s4599_s21 + $0x1f4] ss:$8 sps:$4 sm:$0xff]  }
 0x11c   : > { %v4066_v62 = vpack.c.bf16 %v2809_v51, %v2809_v51  ;;  %v2810_v0 = vmax.f32 %v2682_v53, 0.0  ;;  %v2349_v4 = vld [vmem:[#allocation2 + $0x10] sm:$0xff]  ;;  %v1595_v8 = vpop.f32.mrb[10].mxu0  ;;  %v1851_v9 = vpop.f32.mrb[10].mxu1 }
 0x11d   : > { %v2413_v5 = vld [vmem:[#allocation2 + $0x210] sm:$0xff]  ;;  %3386 = vst.msk [vmem:[%s5094_s29] sm:$0xf] %vm3385_vm4, %v4002_v61  ;;  %v4003_v11 = vpack.c.bf16 %v2746_v63, %v2746_v63  ;;  %v2484_v13 = vmul.f32 %v5061_v20, %v2349_v4  ;;  %v1597_v15 = vpop.f32.mrb[11].mxu0  ;;  %v1853_v16 = vpop.f32.mrb[11].mxu1  ;;  %v2092_v22 = vadd.f32 %v1595_v8, %v439_v58  ;;  %v2156_v23 = vadd.f32 %v1851_v9, %v503_v59  ;;  %v442_v4 = vld [vmem:[#allocation2 + $0x40] sm:$0xff] }
 0x11e   : > { %3450 = vst.msk [vmem:[%s5094_s29 + $0x100] sm:$0xf] %vm3385_vm4, %v4066_v62  ;;  %v4067_v12 = vpack.c.bf16 %v2810_v0, %v2810_v0  ;;  %v2548_v14 = vmul.f32 %v5061_v20, %v2413_v5  ;;  %v2350_v18 = vld [vmem:[#allocation2 + $0x18] sm:$0xff]  ;;  %v506_v5 = vld [vmem:[#allocation2 + $0x240] sm:$0xff] }
 0x11f   : > { %v2414_v19 = vld [vmem:[#allocation2 + $0x218] sm:$0xff]  ;;  %2220 = vst.msk [vmem:[#allocation2 + $0x20] sm:$0xff] %vm305_vm3, %v2091_v6  ;;  %2284 = vst.msk [vmem:[#allocation2 + $0x220] sm:$0xff] %vm305_vm3, %v2155_v7  ;;  %v2619_v24 = vadd.f32 %v5066_v21, %v2484_v13  ;;  %v2485_v26 = vmul.f32 %v5061_v20, %v2350_v18  ;;  %1807 = vmatmul.mubr.bf16.gmra.mrb[116].mxu0 %v4399_v60  ;;  %2063 = vmatmul.mubr.bf16.gmra.mrb[116].mxu1 %v4400_v3  ;;  %v507_v13 = vld [vmem:[#allocation2 + $0x248] sm:$0xff] }
 0x120   : > { %3387 = vst.msk [vmem:[%s5094_s29 + $0x4] sm:$0xf] %vm3385_vm4, %v4003_v11  ;;  %3451 = vst.msk [vmem:[%s5094_s29 + $0x104] sm:$0xf] %vm3385_vm4, %v4067_v12  ;;  %v2683_v25 = vadd.f32 %v5066_v21, %v2548_v14  ;;  %v2549_v27 = vmul.f32 %v5061_v20, %v2414_v19  ;;  %3832 = vmatprep.mubr.msk.bf16.mxu0 %vm1342_vm0, %v4401_v10  ;;  %3864 = vmatprep.mubr.msk.bf16.mxu1 %vm1342_vm0, %v4403_v17  ;;  %v4409_v59 = vld [vmem:[%s4599_s21 + $0x3f4] ss:$8 sps:$4 sm:$0xff]  }
 0x121   : > { %2221 = vst.msk [vmem:[#allocation2 + $0x28] sm:$0xff] %vm305_vm3, %v2092_v22  ;;  %2285 = vst.msk [vmem:[#allocation2 + $0x228] sm:$0xff] %vm305_vm3, %v2156_v23  ;;  %v2747_v28 = vmax.f32 %v2619_v24, 0.0  ;;  %v2620_v30 = vadd.f32 %v5066_v21, %v2485_v26  ;;  %v443_v12 = vld [vmem:[#allocation2 + $0x48] sm:$0xff]  ;;  %v4411_v18 = vld [vmem:[%s4599_s21 + $0x1f0] ss:$8 sps:$4 sm:$0xff]  }
 0x122   : > { %v2811_v29 = vmax.f32 %v2683_v25, 0.0  ;;  %v2684_v31 = vadd.f32 %v5066_v21, %v2549_v27  ;;  %v1600_v34 = vpop.f32.mrb[12].mxu0  ;;  %v1856_v35 = vpop.f32.mrb[12].mxu1  ;;  %v4412_v27 = vld [vmem:[%s4599_s21 + $0x3f0] ss:$8 sps:$4 sm:$0xff]   ;;  %s4500_s21 = smov [#allocation3]  }
 0x123   : > { %v4004_v38 = vpack.c.bf16 %v2747_v28, %v2747_v28  ;;  %v2748_v40 = vmax.f32 %v2620_v30, 0.0  ;;  %v1602_v42 = vpop.f32.mrb[13].mxu0  ;;  %v1858_v43 = vpop.f32.mrb[13].mxu1  ;;  %v2093_v45 = vadd.f32 %v1600_v34, %v440_v32  ;;  %v2157_v46 = vadd.f32 %v1856_v35, %v504_v33  ;;  %s4421_s30 = sshll.u32 %s4500_s21, 4  ;;  %s4422_s30 = int_to_ptr.vmem [resolvable:$false] %s4421_s30 }
 0x124   : > { %v4068_v39 = vpack.c.bf16 %v2811_v29, %v2811_v29  ;;  %v2812_v41 = vmax.f32 %v2684_v31, 0.0  ;;  %v1603_v47 = vpop.f32.mrb[14].mxu0  ;;  %v1859_v48 = vpop.f32.mrb[14].mxu1  ;;  %s4423_s5 = scalar_lea.vmem %s4422_s30, 16384  ;;  %p4424_p1 = scmp.lt.s32.totalorder %s5752_s13, %s4422_s30 }
 0x125   : > { %3388 = vst.msk [vmem:[%s5094_s29 + $0x8] sm:$0xf] %vm3385_vm4, %v4004_v38  ;;  %v4005_v51 = vpack.c.bf16 %v2748_v40, %v2748_v40  ;;  %v2094_v55 = vadd.f32 %v1603_v47, %v441_v36  ;;  %v2158_v56 = vadd.f32 %v1859_v48, %v505_v37  ;;  %v1605_v57 = vpop.f32.mrb[15].mxu0  ;;  %v1861_v58 = vpop.f32.mrb[15].mxu1  ;;  %p4425_p2 = scmp.lt.s32.totalorder %s4423_s5, %s4417_s26 }
 0x126   : > { %3452 = vst.msk [vmem:[%s5094_s29 + $0x108] sm:$0xf] %vm3385_vm4, %v4068_v39  ;;  %v4069_v52 = vpack.c.bf16 %v2812_v41, %v2812_v41  ;;  %v2351_v53 = vld [vmem:[#allocation2 + $0x20] sm:$0xff]  ;;  %v445_v58 = vld [vmem:[#allocation2 + $0x58] sm:$0xff] }
 0x127   : > { %v2415_v54 = vld [vmem:[#allocation2 + $0x220] sm:$0xff]  ;;  %v2486_v60 = vmul.f32 %v5061_v20, %v2351_v53  ;;  %2222 = vst.msk [vmem:[#allocation2 + $0x30] sm:$0xff] %vm305_vm3, %v2093_v45  ;;  %2286 = vst.msk [vmem:[#allocation2 + $0x230] sm:$0xff] %vm305_vm3, %v2157_v46  ;;  %1815 = vmatmul.mubr.bf16.gmra.mrb[120].mxu0 %v4405_v44  ;;  %2071 = vmatmul.mubr.bf16.gmra.mrb[120].mxu1 %v4406_v49  ;;  %v444_v44 = vld [vmem:[#allocation2 + $0x50] sm:$0xff]  ;;  %p4426_p3 = por %p4425_p2, %p4424_p1 }
 0x128   : > { %v2550_v61 = vmul.f32 %v5061_v20, %v2415_v54  ;;  %3389 = vst.msk [vmem:[%s5094_s29 + $0xc] sm:$0xf] %vm3385_vm4, %v4005_v51  ;;  %3453 = vst.msk [vmem:[%s5094_s29 + $0x10c] sm:$0xf] %vm3385_vm4, %v4069_v52  ;;  %v2352_v62 = vld [vmem:[#allocation2 + $0x28] sm:$0xff]  ;;  %3833 = vmatprep.mubr.msk.bf16.mxu0 %vm1342_vm0, %v4407_v50  ;;  %3865 = vmatprep.mubr.msk.bf16.mxu1 %vm1342_vm0, %v4409_v59  ;;  %v508_v45 = vld [vmem:[#allocation2 + $0x250] sm:$0xff] }
 0x129   : > { %v2416_v63 = vld [vmem:[#allocation2 + $0x228] sm:$0xff]  ;;  %2223 = vst.msk [vmem:[#allocation2 + $0x38] sm:$0xff] %vm305_vm3, %v2094_v55  ;;  %2287 = vst.msk [vmem:[#allocation2 + $0x238] sm:$0xff] %vm305_vm3, %v2158_v56  ;;  %v2621_v0 = vadd.f32 %v5066_v21, %v2486_v60  ;;  %v2487_v2 = vmul.f32 %v5061_v20, %v2352_v62  ;;  %v509_v59 = vld [vmem:[#allocation2 + $0x258] sm:$0xff]  ;;  %p4427_p5 = pnand %p4426_p3, %p4420_p0 }
 0x12a   : > { %v2685_v1 = vadd.f32 %v5066_v21, %v2550_v61  ;;  %v2551_v3 = vmul.f32 %v5061_v20, %v2416_v63  ;;  %v1608_v10 = vpop.f32.mrb[16].mxu0  ;;  %v1864_v11 = vpop.f32.mrb[16].mxu1 }
 0x12b   : > { %v2749_v6 = vmax.f32 %v2621_v0, 0.0  ;;  %v2622_v8 = vadd.f32 %v5066_v21, %v2487_v2  ;;  %v2095_v14 = vadd.f32 %v1608_v10, %v442_v4  ;;  %v2159_v15 = vadd.f32 %v1864_v11, %v506_v5  ;;  %v1610_v16 = vpop.f32.mrb[17].mxu0  ;;  %v1866_v17 = vpop.f32.mrb[17].mxu1 }
 0x12c   : > { %v2813_v7 = vmax.f32 %v2685_v1, 0.0  ;;  %v2686_v9 = vadd.f32 %v5066_v21, %v2551_v3  ;;  %v1611_v25 = vpop.f32.mrb[18].mxu0  ;;  %v1867_v26 = vpop.f32.mrb[18].mxu1 }
 0x12d   : > { %v4006_v19 = vpack.c.bf16 %v2749_v6, %v2749_v6  ;;  %v2750_v23 = vmax.f32 %v2622_v8, 0.0  ;;  %2224 = vst.msk [vmem:[#allocation2 + $0x40] sm:$0xff] %vm305_vm3, %v2095_v14  ;;  %2288 = vst.msk [vmem:[#allocation2 + $0x240] sm:$0xff] %vm305_vm3, %v2159_v15  ;;  %v2096_v30 = vadd.f32 %v1611_v25, %v443_v12  ;;  %v2160_v31 = vadd.f32 %v1867_v26, %v507_v13  ;;  %v1613_v32 = vpop.f32.mrb[19].mxu0  ;;  %v1869_v33 = vpop.f32.mrb[19].mxu1 }
 0x12e   : > { %v4070_v22 = vpack.c.bf16 %v2813_v7, %v2813_v7  ;;  %v2814_v24 = vmax.f32 %v2686_v9, 0.0  ;;  %v2353_v28 = vld [vmem:[#allocation2 + $0x30] sm:$0xff]  ;;  %v447_v32 = vld [vmem:[#allocation2 + $0x68] sm:$0xff] }
 0x12f   : > { %v2417_v29 = vld [vmem:[#allocation2 + $0x230] sm:$0xff]  ;;  %3390 = vst.msk [vmem:[%s5094_s29 + $0x10] sm:$0xf] %vm3385_vm4, %v4006_v19  ;;  %v4007_v34 = vpack.c.bf16 %v2750_v23, %v2750_v23  ;;  %v2488_v36 = vmul.f32 %v5061_v20, %v2353_v28  ;;  %1823 = vmatmul.mubr.bf16.gmra.mrb[124].mxu0 %v4411_v18  ;;  %2079 = vmatmul.mubr.bf16.gmra.mrb[124].mxu1 %v4412_v27  ;;  %v510_v23 = vld [vmem:[#allocation2 + $0x260] sm:$0xff]  ;;  %v511_v33 = vld [vmem:[#allocation2 + $0x268] sm:$0xff] }
 0x130   : > { %3454 = vst.msk [vmem:[%s5094_s29 + $0x110] sm:$0xf] %vm3385_vm4, %v4070_v22  ;;  %v4071_v35 = vpack.c.bf16 %v2814_v24, %v2814_v24  ;;  %v2552_v37 = vmul.f32 %v5061_v20, %v2417_v29  ;;  %v2354_v38 = vld [vmem:[#allocation2 + $0x38] sm:$0xff]  ;;  %v446_v22 = vld [vmem:[#allocation2 + $0x60] sm:$0xff] }
 0x131   : > { %v2418_v39 = vld [vmem:[#allocation2 + $0x238] sm:$0xff]  ;;  %v2489_v40 = vmul.f32 %v5061_v20, %v2354_v38  ;;  %2225 = vst.msk [vmem:[#allocation2 + $0x48] sm:$0xff] %vm305_vm3, %v2096_v30  ;;  %2289 = vst.msk [vmem:[#allocation2 + $0x248] sm:$0xff] %vm305_vm3, %v2160_v31  ;;  %v2623_v42 = vadd.f32 %v5066_v21, %v2488_v36 }
 0x132   : > { %v2553_v41 = vmul.f32 %v5061_v20, %v2418_v39  ;;  %3391 = vst.msk [vmem:[%s5094_s29 + $0x14] sm:$0xf] %vm3385_vm4, %v4007_v34  ;;  %3455 = vst.msk [vmem:[%s5094_s29 + $0x114] sm:$0xf] %vm3385_vm4, %v4071_v35  ;;  %v2687_v43 = vadd.f32 %v5066_v21, %v2552_v37  ;;  %v1616_v50 = vpop.f32.mrb[20].mxu0  ;;  %v1872_v51 = vpop.f32.mrb[20].mxu1 }
 0x133   : > { %v2624_v46 = vadd.f32 %v5066_v21, %v2489_v40  ;;  %v2751_v48 = vmax.f32 %v2623_v42, 0.0  ;;  %v2097_v54 = vadd.f32 %v1616_v50, %v444_v44  ;;  %v2161_v55 = vadd.f32 %v1872_v51, %v508_v45  ;;  %v1618_v56 = vpop.f32.mrb[21].mxu0  ;;  %v1874_v57 = vpop.f32.mrb[21].mxu1 }
 0x134   : > { %v2688_v47 = vadd.f32 %v5066_v21, %v2553_v41  ;;  %v2815_v49 = vmax.f32 %v2687_v43, 0.0  ;;  %v2355_v62 = vld [vmem:[#allocation2 + $0x40] sm:$0xff]  ;;  %v1619_v0 = vpop.f32.mrb[22].mxu0  ;;  %v1875_v1 = vpop.f32.mrb[22].mxu1 }
 0x135   : > { %v2752_v52 = vmax.f32 %v2624_v46, 0.0  ;;  %v4008_v60 = vpack.c.bf16 %v2751_v48, %v2751_v48  ;;  %v2419_v63 = vld [vmem:[#allocation2 + $0x240] sm:$0xff]  ;;  %v2490_v4 = vmul.f32 %v5061_v20, %v2355_v62  ;;  %2226 = vst.msk [vmem:[#allocation2 + $0x50] sm:$0xff] %vm305_vm3, %v2097_v54  ;;  %2290 = vst.msk [vmem:[#allocation2 + $0x250] sm:$0xff] %vm305_vm3, %v2161_v55  ;;  %v1621_v6 = vpop.f32.mrb[23].mxu0  ;;  %v1877_v7 = vpop.f32.mrb[23].mxu1  ;;  %v2098_v10 = vadd.f32 %v1619_v0, %v445_v58 }
 0x136   : > { %v2816_v53 = vmax.f32 %v2688_v47, 0.0  ;;  %v4072_v61 = vpack.c.bf16 %v2815_v49, %v2815_v49  ;;  %v2554_v5 = vmul.f32 %v5061_v20, %v2419_v63  ;;  %v2162_v11 = vadd.f32 %v1875_v1, %v509_v59  ;;  %v448_v54 = vld [vmem:[#allocation2 + $0x70] sm:$0xff]  ;;  %v449_v62 = vld [vmem:[#allocation2 + $0x78] sm:$0xff] }
 0x137   : > { %v4009_v2 = vpack.c.bf16 %v2752_v52, %v2752_v52  ;;  %3392 = vst.msk [vmem:[%s5094_s29 + $0x18] sm:$0xf] %vm3385_vm4, %v4008_v60  ;;  %v2625_v12 = vadd.f32 %v5066_v21, %v2490_v4  ;;  %v512_v55 = vld [vmem:[#allocation2 + $0x270] sm:$0xff]  ;;  %v513_v63 = vld [vmem:[#allocation2 + $0x278] sm:$0xff] }
 0x138   : > { %v4073_v3 = vpack.c.bf16 %v2816_v53, %v2816_v53  ;;  %3456 = vst.msk [vmem:[%s5094_s29 + $0x118] sm:$0xf] %vm3385_vm4, %v4072_v61  ;;  %v2356_v8 = vld [vmem:[#allocation2 + $0x48] sm:$0xff]  ;;  %v2689_v13 = vadd.f32 %v5066_v21, %v2554_v5 }
 0x139   : > { %v2420_v9 = vld [vmem:[#allocation2 + $0x248] sm:$0xff]  ;;  %3393 = vst.msk [vmem:[%s5094_s29 + $0x1c] sm:$0xf] %vm3385_vm4, %v4009_v2  ;;  %v2491_v14 = vmul.f32 %v5061_v20, %v2356_v8  ;;  %v2753_v16 = vmax.f32 %v2625_v12, 0.0 }
 0x13a   : > { %3457 = vst.msk [vmem:[%s5094_s29 + $0x11c] sm:$0xf] %vm3385_vm4, %v4073_v3  ;;  %v2555_v15 = vmul.f32 %v5061_v20, %v2420_v9  ;;  %v2817_v17 = vmax.f32 %v2689_v13, 0.0  ;;  %v1624_v24 = vpop.f32.mrb[24].mxu0  ;;  %v1880_v25 = vpop.f32.mrb[24].mxu1 }
 0x13b   : > { %2227 = vst.msk [vmem:[#allocation2 + $0x58] sm:$0xff] %vm305_vm3, %v2098_v10  ;;  %2291 = vst.msk [vmem:[#allocation2 + $0x258] sm:$0xff] %vm305_vm3, %v2162_v11  ;;  %v2626_v18 = vadd.f32 %v5066_v21, %v2491_v14  ;;  %v4010_v26 = vpack.c.bf16 %v2753_v16, %v2753_v16  ;;  %v1626_v30 = vpop.f32.mrb[25].mxu0  ;;  %v1882_v31 = vpop.f32.mrb[25].mxu1  ;;  %v2099_v36 = vadd.f32 %v1624_v24, %v446_v22 }
 0x13c   : > { %v2690_v19 = vadd.f32 %v5066_v21, %v2555_v15  ;;  %v4074_v27 = vpack.c.bf16 %v2817_v17, %v2817_v17  ;;  %v2357_v34 = vld [vmem:[#allocation2 + $0x50] sm:$0xff]  ;;  %v2163_v37 = vadd.f32 %v1880_v25, %v510_v23  ;;  %v1627_v38 = vpop.f32.mrb[26].mxu0  ;;  %v1883_v39 = vpop.f32.mrb[26].mxu1 }
 0x13d   : > { %v2754_v28 = vmax.f32 %v2626_v18, 0.0  ;;  %v2421_v35 = vld [vmem:[#allocation2 + $0x250] sm:$0xff]  ;;  %3394 = vst.msk [vmem:[%s5094_s29 + $0x20] sm:$0xf] %vm3385_vm4, %v4010_v26  ;;  %v2492_v42 = vmul.f32 %v5061_v20, %v2357_v34  ;;  %v1629_v44 = vpop.f32.mrb[27].mxu0  ;;  %v1885_v45 = vpop.f32.mrb[27].mxu1  ;;  %v2100_v46 = vadd.f32 %v1627_v38, %v447_v32  ;;  %v2164_v47 = vadd.f32 %v1883_v39, %v511_v33 }
 0x13e   : > { %v2818_v29 = vmax.f32 %v2690_v19, 0.0  ;;  %3458 = vst.msk [vmem:[%s5094_s29 + $0x120] sm:$0xf] %vm3385_vm4, %v4074_v27  ;;  %v2556_v43 = vmul.f32 %v5061_v20, %v2421_v35 }
 0x13f   : > { %v4011_v40 = vpack.c.bf16 %v2754_v28, %v2754_v28  ;;  %2228 = vst.msk [vmem:[#allocation2 + $0x60] sm:$0xff] %vm305_vm3, %v2099_v36  ;;  %2292 = vst.msk [vmem:[#allocation2 + $0x260] sm:$0xff] %vm305_vm3, %v2163_v37  ;;  %v2627_v48 = vadd.f32 %v5066_v21, %v2492_v42  ;;  %v450_v28 = vld [vmem:[#allocation2 + $0x80] sm:$0xff]  ;;  %v451_v36 = vld [vmem:[#allocation2 + $0x88] sm:$0xff] }
 0x140   : > { %v4075_v41 = vpack.c.bf16 %v2818_v29, %v2818_v29  ;;  %v2691_v49 = vadd.f32 %v5066_v21, %v2556_v43  ;;  %2229 = vst.msk [vmem:[#allocation2 + $0x68] sm:$0xff] %vm305_vm3, %v2100_v46  ;;  %2293 = vst.msk [vmem:[#allocation2 + $0x268] sm:$0xff] %vm305_vm3, %v2164_v47  ;;  %v514_v29 = vld [vmem:[#allocation2 + $0x280] sm:$0xff]  ;;  %v515_v37 = vld [vmem:[#allocation2 + $0x288] sm:$0xff] }
 0x141   : > { %3395 = vst.msk [vmem:[%s5094_s29 + $0x24] sm:$0xf] %vm3385_vm4, %v4011_v40  ;;  %v2755_v56 = vmax.f32 %v2627_v48, 0.0 }
 0x142   : > { %3459 = vst.msk [vmem:[%s5094_s29 + $0x124] sm:$0xf] %vm3385_vm4, %v4075_v41  ;;  %v2358_v50 = vld [vmem:[#allocation2 + $0x58] sm:$0xff]  ;;  %v2819_v57 = vmax.f32 %v2691_v49, 0.0  ;;  %v1632_v60 = vpop.f32.mrb[28].mxu0  ;;  %v1888_v61 = vpop.f32.mrb[28].mxu1 }
 0x143   : > { %v2422_v51 = vld [vmem:[#allocation2 + $0x258] sm:$0xff]  ;;  %v2493_v52 = vmul.f32 %v5061_v20, %v2358_v50  ;;  %v4012_v0 = vpack.c.bf16 %v2755_v56, %v2755_v56  ;;  %v2101_v2 = vadd.f32 %v1632_v60, %v448_v54  ;;  %v2165_v3 = vadd.f32 %v1888_v61, %v512_v55  ;;  %v1634_v4 = vpop.f32.mrb[29].mxu0  ;;  %v1890_v5 = vpop.f32.mrb[29].mxu1 }
 0x144   : > { %v2557_v53 = vmul.f32 %v5061_v20, %v2422_v51  ;;  %v4076_v1 = vpack.c.bf16 %v2819_v57, %v2819_v57  ;;  %v1635_v8 = vpop.f32.mrb[30].mxu0  ;;  %v1891_v9 = vpop.f32.mrb[30].mxu1  ;;  %v452_v4 = vld [vmem:[#allocation2 + $0x90] sm:$0xff] }
 0x145   : > { %v2628_v58 = vadd.f32 %v5066_v21, %v2493_v52  ;;  %3396 = vst.msk [vmem:[%s5094_s29 + $0x28] sm:$0xf] %vm3385_vm4, %v4012_v0  ;;  %v2102_v12 = vadd.f32 %v1635_v8, %v449_v62  ;;  %v2166_v13 = vadd.f32 %v1891_v9, %v513_v63  ;;  %v1637_v14 = vpop.f32.mrb[31].mxu0  ;;  %v1893_v15 = vpop.f32.mrb[31].mxu1  ;;  %v516_v5 = vld [vmem:[#allocation2 + $0x290] sm:$0xff] }
 0x146   : > { %v2692_v59 = vadd.f32 %v5066_v21, %v2557_v53  ;;  %3460 = vst.msk [vmem:[%s5094_s29 + $0x128] sm:$0xf] %vm3385_vm4, %v4076_v1  ;;  %v2359_v10 = vld [vmem:[#allocation2 + $0x60] sm:$0xff]  ;;  %v453_v14 = vld [vmem:[#allocation2 + $0x98] sm:$0xff] }
 0x147   : > { %v2756_v6 = vmax.f32 %v2628_v58, 0.0  ;;  %v2423_v11 = vld [vmem:[#allocation2 + $0x260] sm:$0xff]  ;;  %2230 = vst.msk [vmem:[#allocation2 + $0x70] sm:$0xff] %vm305_vm3, %v2101_v2  ;;  %2294 = vst.msk [vmem:[#allocation2 + $0x270] sm:$0xff] %vm305_vm3, %v2165_v3  ;;  %v2494_v18 = vmul.f32 %v5061_v20, %v2359_v10  ;;  %v2360_v22 = vld [vmem:[#allocation2 + $0x68] sm:$0xff] }
 0x148   : > { %v2820_v7 = vmax.f32 %v2692_v59, 0.0  ;;  %v2558_v19 = vmul.f32 %v5061_v20, %v2423_v11  ;;  %v2424_v23 = vld [vmem:[#allocation2 + $0x268] sm:$0xff]  ;;  %2231 = vst.msk [vmem:[#allocation2 + $0x78] sm:$0xff] %vm305_vm3, %v2102_v12  ;;  %2295 = vst.msk [vmem:[#allocation2 + $0x278] sm:$0xff] %vm305_vm3, %v2166_v13  ;;  %v2495_v26 = vmul.f32 %v5061_v20, %v2360_v22  ;;  %v517_v15 = vld [vmem:[#allocation2 + $0x298] sm:$0xff] }
 0x149   : > { %v4013_v16 = vpack.c.bf16 %v2756_v6, %v2756_v6  ;;  %v2629_v24 = vadd.f32 %v5066_v21, %v2494_v18  ;;  %v2559_v27 = vmul.f32 %v5061_v20, %v2424_v23 }
 0x14a   : > { %v4077_v17 = vpack.c.bf16 %v2820_v7, %v2820_v7  ;;  %v2693_v25 = vadd.f32 %v5066_v21, %v2558_v19  ;;  %v2630_v32 = vadd.f32 %v5066_v21, %v2495_v26  ;;  %v1640_v34 = vpop.f32.mrb[32].mxu0  ;;  %v1896_v35 = vpop.f32.mrb[32].mxu1 }
 0x14b   : > { %3397 = vst.msk [vmem:[%s5094_s29 + $0x2c] sm:$0xf] %vm3385_vm4, %v4013_v16  ;;  %v2757_v30 = vmax.f32 %v2629_v24, 0.0  ;;  %v2694_v33 = vadd.f32 %v5066_v21, %v2559_v27  ;;  %v2103_v38 = vadd.f32 %v1640_v34, %v450_v28  ;;  %v2167_v39 = vadd.f32 %v1896_v35, %v514_v29  ;;  %v1642_v40 = vpop.f32.mrb[33].mxu0  ;;  %v1898_v41 = vpop.f32.mrb[33].mxu1 }
 0x14c   : > { %3461 = vst.msk [vmem:[%s5094_s29 + $0x12c] sm:$0xf] %vm3385_vm4, %v4077_v17  ;;  %v2821_v31 = vmax.f32 %v2693_v25, 0.0  ;;  %v2758_v44 = vmax.f32 %v2630_v32, 0.0  ;;  %v1643_v48 = vpop.f32.mrb[34].mxu0  ;;  %v1899_v49 = vpop.f32.mrb[34].mxu1 }
 0x14d   : > { %v4014_v42 = vpack.c.bf16 %v2757_v30, %v2757_v30  ;;  %v2822_v45 = vmax.f32 %v2694_v33, 0.0  ;;  %2232 = vst.msk [vmem:[#allocation2 + $0x80] sm:$0xff] %vm305_vm3, %v2103_v38  ;;  %2296 = vst.msk [vmem:[#allocation2 + $0x280] sm:$0xff] %vm305_vm3, %v2167_v39  ;;  %v2104_v52 = vadd.f32 %v1643_v48, %v451_v36  ;;  %v2168_v53 = vadd.f32 %v1899_v49, %v515_v37  ;;  %v1645_v54 = vpop.f32.mrb[35].mxu0  ;;  %v1901_v55 = vpop.f32.mrb[35].mxu1 }
 0x14e   : > { %v4078_v43 = vpack.c.bf16 %v2821_v31, %v2821_v31  ;;  %v2361_v46 = vld [vmem:[#allocation2 + $0x70] sm:$0xff]  ;;  %v4015_v56 = vpack.c.bf16 %v2758_v44, %v2758_v44 }
 0x14f   : > { %v2425_v47 = vld [vmem:[#allocation2 + $0x270] sm:$0xff]  ;;  %v2496_v50 = vmul.f32 %v5061_v20, %v2361_v46  ;;  %3398 = vst.msk [vmem:[%s5094_s29 + $0x30] sm:$0xf] %vm3385_vm4, %v4014_v42  ;;  %v4079_v57 = vpack.c.bf16 %v2822_v45, %v2822_v45  ;;  %v2362_v58 = vld [vmem:[#allocation2 + $0x78] sm:$0xff]  ;;  %v454_v42 = vld [vmem:[#allocation2 + $0xa0] sm:$0xff] }
 0x150   : > { %v2560_v51 = vmul.f32 %v5061_v20, %v2425_v47  ;;  %3462 = vst.msk [vmem:[%s5094_s29 + $0x130] sm:$0xf] %vm3385_vm4, %v4078_v43  ;;  %v2426_v59 = vld [vmem:[#allocation2 + $0x278] sm:$0xff]  ;;  %v2497_v62 = vmul.f32 %v5061_v20, %v2362_v58  ;;  %3399 = vst.msk [vmem:[%s5094_s29 + $0x34] sm:$0xf] %vm3385_vm4, %v4015_v56  ;;  %v518_v43 = vld [vmem:[#allocation2 + $0x2a0] sm:$0xff] }
 0x151   : > { %v2631_v60 = vadd.f32 %v5066_v21, %v2496_v50  ;;  %v2561_v63 = vmul.f32 %v5061_v20, %v2426_v59  ;;  %2233 = vst.msk [vmem:[#allocation2 + $0x88] sm:$0xff] %vm305_vm3, %v2104_v52  ;;  %2297 = vst.msk [vmem:[#allocation2 + $0x288] sm:$0xff] %vm305_vm3, %v2168_v53  ;;  %v455_v46 = vld [vmem:[#allocation2 + $0xa8] sm:$0xff] }
 0x152   : > { %v2695_v61 = vadd.f32 %v5066_v21, %v2560_v51  ;;  %3463 = vst.msk [vmem:[%s5094_s29 + $0x134] sm:$0xf] %vm3385_vm4, %v4079_v57  ;;  %v2632_v2 = vadd.f32 %v5066_v21, %v2497_v62  ;;  %v1648_v6 = vpop.f32.mrb[36].mxu0  ;;  %v1904_v7 = vpop.f32.mrb[36].mxu1  ;;  %v519_v47 = vld [vmem:[#allocation2 + $0x2a8] sm:$0xff] }
 0x153   : > { %v2759_v0 = vmax.f32 %v2631_v60, 0.0  ;;  %v2696_v3 = vadd.f32 %v5066_v21, %v2561_v63  ;;  %v1650_v12 = vpop.f32.mrb[37].mxu0  ;;  %v1906_v13 = vpop.f32.mrb[37].mxu1  ;;  %v2105_v18 = vadd.f32 %v1648_v6, %v452_v4  ;;  %v2169_v19 = vadd.f32 %v1904_v7, %v516_v5 }
 0x154   : > { %v2823_v1 = vmax.f32 %v2695_v61, 0.0  ;;  %v2760_v10 = vmax.f32 %v2632_v2, 0.0  ;;  %v2363_v16 = vld [vmem:[#allocation2 + $0x80] sm:$0xff]  ;;  %v1651_v22 = vpop.f32.mrb[38].mxu0  ;;  %v1907_v23 = vpop.f32.mrb[38].mxu1 }
 0x155   : > { %v4016_v8 = vpack.c.bf16 %v2759_v0, %v2759_v0  ;;  %v2824_v11 = vmax.f32 %v2696_v3, 0.0  ;;  %v2427_v17 = vld [vmem:[#allocation2 + $0x280] sm:$0xff]  ;;  %v2498_v26 = vmul.f32 %v5061_v20, %v2363_v16  ;;  %v1653_v28 = vpop.f32.mrb[39].mxu0  ;;  %v1909_v29 = vpop.f32.mrb[39].mxu1  ;;  %2234 = vst.msk [vmem:[#allocation2 + $0x90] sm:$0xff] %vm305_vm3, %v2105_v18  ;;  %2298 = vst.msk [vmem:[#allocation2 + $0x290] sm:$0xff] %vm305_vm3, %v2169_v19  ;;  %v2106_v32 = vadd.f32 %v1651_v22, %v453_v14 }
 0x156   : > { %v4080_v9 = vpack.c.bf16 %v2823_v1, %v2823_v1  ;;  %v4017_v24 = vpack.c.bf16 %v2760_v10, %v2760_v10  ;;  %v2562_v27 = vmul.f32 %v5061_v20, %v2427_v17  ;;  %v2170_v33 = vadd.f32 %v1907_v23, %v517_v15  ;;  %v456_v10 = vld [vmem:[#allocation2 + $0xb0] sm:$0xff]  ;;  %v457_v18 = vld [vmem:[#allocation2 + $0xb8] sm:$0xff] }
 0x157   : > { %3400 = vst.msk [vmem:[%s5094_s29 + $0x38] sm:$0xf] %vm3385_vm4, %v4016_v8  ;;  %v4081_v25 = vpack.c.bf16 %v2824_v11, %v2824_v11  ;;  %v2633_v34 = vadd.f32 %v5066_v21, %v2498_v26  ;;  %v520_v11 = vld [vmem:[#allocation2 + $0x2b0] sm:$0xff]  ;;  %v521_v19 = vld [vmem:[#allocation2 + $0x2b8] sm:$0xff] }
 0x158   : > { %3464 = vst.msk [vmem:[%s5094_s29 + $0x138] sm:$0xf] %vm3385_vm4, %v4080_v9  ;;  %v2364_v30 = vld [vmem:[#allocation2 + $0x88] sm:$0xff]  ;;  %3401 = vst.msk [vmem:[%s5094_s29 + $0x3c] sm:$0xf] %vm3385_vm4, %v4017_v24  ;;  %v2697_v35 = vadd.f32 %v5066_v21, %v2562_v27 }
 0x159   : > { %v2428_v31 = vld [vmem:[#allocation2 + $0x288] sm:$0xff]  ;;  %3465 = vst.msk [vmem:[%s5094_s29 + $0x13c] sm:$0xf] %vm3385_vm4, %v4081_v25  ;;  %v2499_v36 = vmul.f32 %v5061_v20, %v2364_v30  ;;  %v2761_v38 = vmax.f32 %v2633_v34, 0.0 }
 0x15a   : > { %v2563_v37 = vmul.f32 %v5061_v20, %v2428_v31  ;;  %2235 = vst.msk [vmem:[#allocation2 + $0x98] sm:$0xff] %vm305_vm3, %v2106_v32  ;;  %2299 = vst.msk [vmem:[#allocation2 + $0x298] sm:$0xff] %vm305_vm3, %v2170_v33  ;;  %v2825_v39 = vmax.f32 %v2697_v35, 0.0  ;;  %v1656_v44 = vpop.f32.mrb[40].mxu0  ;;  %v1912_v45 = vpop.f32.mrb[40].mxu1 }
 0x15b   : > { %v2634_v40 = vadd.f32 %v5066_v21, %v2499_v36  ;;  %v4018_v48 = vpack.c.bf16 %v2761_v38, %v2761_v38  ;;  %v1658_v52 = vpop.f32.mrb[41].mxu0  ;;  %v1914_v53 = vpop.f32.mrb[41].mxu1  ;;  %v2107_v54 = vadd.f32 %v1656_v44, %v454_v42  ;;  %v2171_v55 = vadd.f32 %v1912_v45, %v518_v43 }
 0x15c   : > { %v2698_v41 = vadd.f32 %v5066_v21, %v2563_v37  ;;  %v4082_v49 = vpack.c.bf16 %v2825_v39, %v2825_v39  ;;  %v1659_v56 = vpop.f32.mrb[42].mxu0  ;;  %v1915_v57 = vpop.f32.mrb[42].mxu1  ;;  %v2365_v60 = vld [vmem:[#allocation2 + $0x90] sm:$0xff] }
 0x15d   : > { %v2762_v50 = vmax.f32 %v2634_v40, 0.0  ;;  %3402 = vst.msk [vmem:[%s5094_s29 + $0x40] sm:$0xf] %vm3385_vm4, %v4018_v48  ;;  %v2429_v61 = vld [vmem:[#allocation2 + $0x290] sm:$0xff]  ;;  %v2108_v62 = vadd.f32 %v1659_v56, %v455_v46  ;;  %v2172_v63 = vadd.f32 %v1915_v57, %v519_v47  ;;  %v1661_v0 = vpop.f32.mrb[43].mxu0  ;;  %v1917_v1 = vpop.f32.mrb[43].mxu1  ;;  %v2500_v2 = vmul.f32 %v5061_v20, %v2365_v60 }
 0x15e   : > { %v2826_v51 = vmax.f32 %v2698_v41, 0.0  ;;  %3466 = vst.msk [vmem:[%s5094_s29 + $0x140] sm:$0xf] %vm3385_vm4, %v4082_v49  ;;  %v2564_v3 = vmul.f32 %v5061_v20, %v2429_v61  ;;  %v458_v48 = vld [vmem:[#allocation2 + $0xc0] sm:$0xff]  ;;  %v459_v61 = vld [vmem:[#allocation2 + $0xc8] sm:$0xff] }
 0x15f   : > { %v4019_v58 = vpack.c.bf16 %v2762_v50, %v2762_v50  ;;  %2236 = vst.msk [vmem:[#allocation2 + $0xa0] sm:$0xff] %vm305_vm3, %v2107_v54  ;;  %2300 = vst.msk [vmem:[#allocation2 + $0x2a0] sm:$0xff] %vm305_vm3, %v2171_v55  ;;  %v2635_v6 = vadd.f32 %v5066_v21, %v2500_v2  ;;  %v522_v49 = vld [vmem:[#allocation2 + $0x2c0] sm:$0xff] }
 0x160   : > { %v4083_v59 = vpack.c.bf16 %v2826_v51, %v2826_v51  ;;  %2237 = vst.msk [vmem:[#allocation2 + $0xa8] sm:$0xff] %vm305_vm3, %v2108_v62  ;;  %2301 = vst.msk [vmem:[#allocation2 + $0x2a8] sm:$0xff] %vm305_vm3, %v2172_v63  ;;  %v2699_v7 = vadd.f32 %v5066_v21, %v2564_v3  ;;  %v523_v62 = vld [vmem:[#allocation2 + $0x2c8] sm:$0xff] }
 0x161   : > { %3403 = vst.msk [vmem:[%s5094_s29 + $0x44] sm:$0xf] %vm3385_vm4, %v4019_v58  ;;  %v2366_v4 = vld [vmem:[#allocation2 + $0x98] sm:$0xff]  ;;  %v2763_v12 = vmax.f32 %v2635_v6, 0.0  ;;  %v5310_v6 = vld [vmem:[%s5810_s2] ss:$0 sm:$0xff] }
 0x162   : > { %3467 = vst.msk [vmem:[%s5094_s29 + $0x144] sm:$0xf] %vm3385_vm4, %v4083_v59  ;;  %v2430_v5 = vld [vmem:[#allocation2 + $0x298] sm:$0xff]  ;;  %v2501_v8 = vmul.f32 %v5061_v20, %v2366_v4  ;;  %v2827_v13 = vmax.f32 %v2699_v7, 0.0  ;;  %v1664_v16 = vpop.f32.mrb[44].mxu0  ;;  %v1920_v17 = vpop.f32.mrb[44].mxu1 }
 0x163   : > { %v2565_v9 = vmul.f32 %v5061_v20, %v2430_v5  ;;  %v2109_v22 = vadd.f32 %v1664_v16, %v456_v10  ;;  %v2173_v23 = vadd.f32 %v1920_v17, %v520_v11  ;;  %v1666_v24 = vpop.f32.mrb[45].mxu0  ;;  %v1922_v25 = vpop.f32.mrb[45].mxu1  ;;  %v4020_v26 = vpack.c.bf16 %v2763_v12, %v2763_v12 }
 0x164   : > { %v2636_v14 = vadd.f32 %v5066_v21, %v2501_v8  ;;  %v4084_v27 = vpack.c.bf16 %v2827_v13, %v2827_v13  ;;  %v1667_v30 = vpop.f32.mrb[46].mxu0  ;;  %v1923_v31 = vpop.f32.mrb[46].mxu1 }
 0x165   : > { %v2700_v15 = vadd.f32 %v5066_v21, %v2565_v9  ;;  %2238 = vst.msk [vmem:[#allocation2 + $0xb0] sm:$0xff] %vm305_vm3, %v2109_v22  ;;  %2302 = vst.msk [vmem:[#allocation2 + $0x2b0] sm:$0xff] %vm305_vm3, %v2173_v23  ;;  %v2110_v34 = vadd.f32 %v1667_v30, %v457_v18  ;;  %v2174_v35 = vadd.f32 %v1923_v31, %v521_v19  ;;  %v1669_v36 = vpop.f32.mrb[47].mxu0  ;;  %v1925_v37 = vpop.f32.mrb[47].mxu1 }
 0x166   : > { %v2764_v28 = vmax.f32 %v2636_v14, 0.0  ;;  %v2367_v32 = vld [vmem:[#allocation2 + $0xa0] sm:$0xff]  ;;  %3404 = vst.msk [vmem:[%s5094_s29 + $0x48] sm:$0xf] %vm3385_vm4, %v4020_v26  ;;  %3468 = vst.msk [vmem:[%s5094_s29 + $0x148] sm:$0xf] %vm3385_vm4, %v4084_v27 }
 0x167   : > { %v2828_v29 = vmax.f32 %v2700_v15, 0.0  ;;  %v2431_v33 = vld [vmem:[#allocation2 + $0x2a0] sm:$0xff]  ;;  %v2502_v40 = vmul.f32 %v5061_v20, %v2367_v32  ;;  %v2368_v42 = vld [vmem:[#allocation2 + $0xa8] sm:$0xff]  ;;  %2239 = vst.msk [vmem:[#allocation2 + $0xb8] sm:$0xff] %vm305_vm3, %v2110_v34  ;;  %2303 = vst.msk [vmem:[#allocation2 + $0x2b8] sm:$0xff] %vm305_vm3, %v2174_v35 }
 0x168   : > { %v4021_v38 = vpack.c.bf16 %v2764_v28, %v2764_v28  ;;  %v2566_v41 = vmul.f32 %v5061_v20, %v2431_v33  ;;  %v2432_v43 = vld [vmem:[#allocation2 + $0x2a8] sm:$0xff]  ;;  %v2503_v44 = vmul.f32 %v5061_v20, %v2368_v42  ;;  %v5327_v15 = vld [vmem:[%s5811_s3] ss:$0 sm:$0xff]  ;;  %v460_v26 = vld [vmem:[#allocation2 + $0xd0] sm:$0xff] }
 0x169   : > { %v4085_v39 = vpack.c.bf16 %v2828_v29, %v2828_v29  ;;  %v2567_v45 = vmul.f32 %v5061_v20, %v2432_v43  ;;  %v2637_v46 = vadd.f32 %v5066_v21, %v2502_v40  ;;  %v524_v27 = vld [vmem:[#allocation2 + $0x2d0] sm:$0xff]  ;;  %v461_v36 = vld [vmem:[#allocation2 + $0xd8] sm:$0xff] }
 0x16a   : > { %3405 = vst.msk [vmem:[%s5094_s29 + $0x4c] sm:$0xf] %vm3385_vm4, %v4021_v38  ;;  %v2701_v47 = vadd.f32 %v5066_v21, %v2566_v41  ;;  %v2638_v50 = vadd.f32 %v5066_v21, %v2503_v44  ;;  %v1672_v53 = vpop.f32.mrb[48].mxu0  ;;  %v1928_v54 = vpop.f32.mrb[48].mxu1  ;;  %v525_v37 = vld [vmem:[#allocation2 + $0x2d8] sm:$0xff] }
 0x16b   : > { %3469 = vst.msk [vmem:[%s5094_s29 + $0x14c] sm:$0xf] %vm3385_vm4, %v4085_v39  ;;  %v2702_v51 = vadd.f32 %v5066_v21, %v2567_v45  ;;  %v2765_v52 = vmax.f32 %v2637_v46, 0.0  ;;  %v2111_v57 = vadd.f32 %v1672_v53, %v458_v48  ;;  %v2175_v58 = vadd.f32 %v1928_v54, %v522_v49  ;;  %v1674_v59 = vpop.f32.mrb[49].mxu0  ;;  %v1930_v60 = vpop.f32.mrb[49].mxu1 }
 0x16c   : > { %v2829_v20 = vmax.f32 %v2701_v47, 0.0  ;;  %v2766_v55 = vmax.f32 %v2638_v50, 0.0  ;;  %v2369_v1 = vld [vmem:[#allocation2 + $0xb0] sm:$0xff]  ;;  %v1675_v3 = vpop.f32.mrb[50].mxu0  ;;  %v1931_v21 = vpop.f32.mrb[50].mxu1 }
 0x16d   : > { %v2830_v56 = vmax.f32 %v2702_v51, 0.0  ;;  %v4022_v63 = vpack.c.bf16 %v2765_v52, %v2765_v52  ;;  %v2433_v2 = vld [vmem:[#allocation2 + $0x2b0] sm:$0xff]  ;;  %v2504_v7 = vmul.f32 %v5310_v6, %v2369_v1  ;;  %2240 = vst.msk [vmem:[#allocation2 + $0xc0] sm:$0xff] %vm305_vm3, %v2111_v57  ;;  %2304 = vst.msk [vmem:[#allocation2 + $0x2c0] sm:$0xff] %vm305_vm3, %v2175_v58  ;;  %v1677_v9 = vpop.f32.mrb[51].mxu0  ;;  %v1933_v10 = vpop.f32.mrb[51].mxu1  ;;  %v2112_v13 = vadd.f32 %v1675_v3, %v459_v61 }
 0x16e   : > { %v4086_v0 = vpack.c.bf16 %v2829_v20, %v2829_v20  ;;  %v4023_v4 = vpack.c.bf16 %v2766_v55, %v2766_v55  ;;  %v2568_v8 = vmul.f32 %v5310_v6, %v2433_v2  ;;  %v2370_v11 = vld [vmem:[#allocation2 + $0xb8] sm:$0xff]  ;;  %v2176_v14 = vadd.f32 %v1931_v21, %v523_v62  ;;  %v462_v57 = vld [vmem:[#allocation2 + $0xe0] sm:$0xff]  ;;  %v463_v1 = vld [vmem:[#allocation2 + $0xe8] sm:$0xff] }
 0x16f   : > { %v4087_v5 = vpack.c.bf16 %v2830_v56, %v2830_v56  ;;  %3406 = vst.msk [vmem:[%s5094_s29 + $0x50] sm:$0xf] %vm3385_vm4, %v4022_v63  ;;  %v2434_v12 = vld [vmem:[#allocation2 + $0x2b8] sm:$0xff]  ;;  %v2639_v16 = vadd.f32 %v5327_v15, %v2504_v7  ;;  %v2505_v18 = vmul.f32 %v5310_v6, %v2370_v11  ;;  %v526_v58 = vld [vmem:[#allocation2 + $0x2e0] sm:$0xff]  ;;  %v527_v2 = vld [vmem:[#allocation2 + $0x2e8] sm:$0xff] }
 0x170   : > { %3470 = vst.msk [vmem:[%s5094_s29 + $0x150] sm:$0xf] %vm3385_vm4, %v4086_v0  ;;  %3407 = vst.msk [vmem:[%s5094_s29 + $0x54] sm:$0xf] %vm3385_vm4, %v4023_v4  ;;  %v2703_v17 = vadd.f32 %v5327_v15, %v2568_v8  ;;  %v2569_v19 = vmul.f32 %v5310_v6, %v2434_v12 }
 0x171   : > { %3471 = vst.msk [vmem:[%s5094_s29 + $0x154] sm:$0xf] %vm3385_vm4, %v4087_v5  ;;  %v2767_v22 = vmax.f32 %v2639_v16, 0.0  ;;  %v2640_v24 = vadd.f32 %v5327_v15, %v2505_v18 }
 0x172   : > { %2241 = vst.msk [vmem:[#allocation2 + $0xc8] sm:$0xff] %vm305_vm3, %v2112_v13  ;;  %2305 = vst.msk [vmem:[#allocation2 + $0x2c8] sm:$0xff] %vm305_vm3, %v2176_v14  ;;  %v2831_v23 = vmax.f32 %v2703_v17, 0.0  ;;  %v2704_v25 = vadd.f32 %v5327_v15, %v2569_v19  ;;  %v1680_v28 = vpop.f32.mrb[52].mxu0  ;;  %v1936_v29 = vpop.f32.mrb[52].mxu1 }
 0x173   : > { %v4024_v30 = vpack.c.bf16 %v2767_v22, %v2767_v22  ;;  %v2768_v32 = vmax.f32 %v2640_v24, 0.0  ;;  %v1682_v34 = vpop.f32.mrb[53].mxu0  ;;  %v1938_v35 = vpop.f32.mrb[53].mxu1  ;;  %v2113_v40 = vadd.f32 %v1680_v28, %v460_v26  ;;  %v2177_v41 = vadd.f32 %v1936_v29, %v524_v27 }
 0x174   : > { %v4088_v31 = vpack.c.bf16 %v2831_v23, %v2831_v23  ;;  %v2832_v33 = vmax.f32 %v2704_v25, 0.0  ;;  %v2371_v38 = vld [vmem:[#allocation2 + $0xc0] sm:$0xff]  ;;  %v1683_v42 = vpop.f32.mrb[54].mxu0  ;;  %v1939_v43 = vpop.f32.mrb[54].mxu1 }
 0x175   : > { %v2435_v39 = vld [vmem:[#allocation2 + $0x2c0] sm:$0xff]  ;;  %3408 = vst.msk [vmem:[%s5094_s29 + $0x58] sm:$0xf] %vm3385_vm4, %v4024_v30  ;;  %v4025_v44 = vpack.c.bf16 %v2768_v32, %v2768_v32  ;;  %v2506_v46 = vmul.f32 %v5310_v6, %v2371_v38  ;;  %v1685_v48 = vpop.f32.mrb[55].mxu0  ;;  %v1941_v49 = vpop.f32.mrb[55].mxu1  ;;  %v2114_v50 = vadd.f32 %v1683_v42, %v461_v36  ;;  %v2178_v51 = vadd.f32 %v1939_v43, %v525_v37  ;;  %v464_v32 = vld [vmem:[#allocation2 + $0xf0] sm:$0xff] }
 0x176   : > { %3472 = vst.msk [vmem:[%s5094_s29 + $0x158] sm:$0xf] %vm3385_vm4, %v4088_v31  ;;  %v4089_v45 = vpack.c.bf16 %v2832_v33, %v2832_v33  ;;  %v2570_v47 = vmul.f32 %v5310_v6, %v2435_v39  ;;  %v528_v33 = vld [vmem:[#allocation2 + $0x2f0] sm:$0xff] }
 0x177   : > { %2242 = vst.msk [vmem:[#allocation2 + $0xd0] sm:$0xff] %vm305_vm3, %v2113_v40  ;;  %2306 = vst.msk [vmem:[#allocation2 + $0x2d0] sm:$0xff] %vm305_vm3, %v2177_v41  ;;  %v2641_v52 = vadd.f32 %v5327_v15, %v2506_v46  ;;  %v465_v40 = vld [vmem:[#allocation2 + $0xf8] sm:$0xff] }
 0x178   : > { %3409 = vst.msk [vmem:[%s5094_s29 + $0x5c] sm:$0xf] %vm3385_vm4, %v4025_v44  ;;  %3473 = vst.msk [vmem:[%s5094_s29 + $0x15c] sm:$0xf] %vm3385_vm4, %v4089_v45  ;;  %v2705_v20 = vadd.f32 %v5327_v15, %v2570_v47  ;;  %v529_v41 = vld [vmem:[#allocation2 + $0x2f8] sm:$0xff] }
 0x179   : > { %v2372_v53 = vld [vmem:[#allocation2 + $0xc8] sm:$0xff]  ;;  %2243 = vst.msk [vmem:[#allocation2 + $0xd8] sm:$0xff] %vm305_vm3, %v2114_v50  ;;  %2307 = vst.msk [vmem:[#allocation2 + $0x2d8] sm:$0xff] %vm305_vm3, %v2178_v51  ;;  %v2769_v59 = vmax.f32 %v2641_v52, 0.0 }
 0x17a   : > { %v2436_v54 = vld [vmem:[#allocation2 + $0x2c8] sm:$0xff]  ;;  %v2507_v55 = vmul.f32 %v5310_v6, %v2372_v53  ;;  %v2833_v60 = vmax.f32 %v2705_v20, 0.0  ;;  %v1688_v63 = vpop.f32.mrb[56].mxu0  ;;  %v1944_v0 = vpop.f32.mrb[56].mxu1 }
 0x17b   : > { %v2571_v56 = vmul.f32 %v5310_v6, %v2436_v54  ;;  %v4026_v3 = vpack.c.bf16 %v2769_v59, %v2769_v59  ;;  %v2115_v4 = vadd.f32 %v1688_v63, %v462_v57  ;;  %v2179_v5 = vadd.f32 %v1944_v0, %v526_v58  ;;  %v1690_v7 = vpop.f32.mrb[57].mxu0  ;;  %v1946_v8 = vpop.f32.mrb[57].mxu1 }
 0x17c   : > { %v2642_v61 = vadd.f32 %v5327_v15, %v2507_v55  ;;  %v4090_v21 = vpack.c.bf16 %v2833_v60, %v2833_v60  ;;  %v1691_v11 = vpop.f32.mrb[58].mxu0  ;;  %v1947_v12 = vpop.f32.mrb[58].mxu1  ;;  %v466_v7 = vld [vmem:[#allocation2 + $0x100] sm:$0xff] }
 0x17d   : > { %v2706_v62 = vadd.f32 %v5327_v15, %v2571_v56  ;;  %3410 = vst.msk [vmem:[%s5094_s29 + $0x60] sm:$0xf] %vm3385_vm4, %v4026_v3  ;;  %v2116_v16 = vadd.f32 %v1691_v11, %v463_v1  ;;  %v2180_v17 = vadd.f32 %v1947_v12, %v527_v2  ;;  %v1693_v18 = vpop.f32.mrb[59].mxu0  ;;  %v1949_v19 = vpop.f32.mrb[59].mxu1  ;;  %v530_v8 = vld [vmem:[#allocation2 + $0x300] sm:$0xff] }
 0x17e   : > { %v2770_v9 = vmax.f32 %v2642_v61, 0.0  ;;  %3474 = vst.msk [vmem:[%s5094_s29 + $0x160] sm:$0xf] %vm3385_vm4, %v4090_v21  ;;  %v2373_v13 = vld [vmem:[#allocation2 + $0xd0] sm:$0xff]  ;;  %v467_v18 = vld [vmem:[#allocation2 + $0x108] sm:$0xff] }
 0x17f   : > { %v2834_v10 = vmax.f32 %v2706_v62, 0.0  ;;  %v2437_v14 = vld [vmem:[#allocation2 + $0x2d0] sm:$0xff]  ;;  %2244 = vst.msk [vmem:[#allocation2 + $0xe0] sm:$0xff] %vm305_vm3, %v2115_v4  ;;  %2308 = vst.msk [vmem:[#allocation2 + $0x2e0] sm:$0xff] %vm305_vm3, %v2179_v5  ;;  %v2508_v24 = vmul.f32 %v5310_v6, %v2373_v13  ;;  %v531_v19 = vld [vmem:[#allocation2 + $0x308] sm:$0xff] }
 0x180   : > { %v4027_v22 = vpack.c.bf16 %v2770_v9, %v2770_v9  ;;  %v2572_v25 = vmul.f32 %v5310_v6, %v2437_v14  ;;  %v2374_v26 = vld [vmem:[#allocation2 + $0xd8] sm:$0xff]  ;;  %2245 = vst.msk [vmem:[#allocation2 + $0xe8] sm:$0xff] %vm305_vm3, %v2116_v16  ;;  %2309 = vst.msk [vmem:[#allocation2 + $0x2e8] sm:$0xff] %vm305_vm3, %v2180_v17 }
 0x181   : > { %v4091_v23 = vpack.c.bf16 %v2834_v10, %v2834_v10  ;;  %v2438_v27 = vld [vmem:[#allocation2 + $0x2d8] sm:$0xff]  ;;  %v2643_v28 = vadd.f32 %v5327_v15, %v2508_v24  ;;  %v2509_v30 = vmul.f32 %v5310_v6, %v2374_v26 }
 0x182   : > { %3411 = vst.msk [vmem:[%s5094_s29 + $0x64] sm:$0xf] %vm3385_vm4, %v4027_v22  ;;  %v2707_v29 = vadd.f32 %v5327_v15, %v2572_v25  ;;  %v2573_v31 = vmul.f32 %v5310_v6, %v2438_v27  ;;  %v1696_v38 = vpop.f32.mrb[60].mxu0  ;;  %v1952_v39 = vpop.f32.mrb[60].mxu1 }
 0x183   : > { %3475 = vst.msk [vmem:[%s5094_s29 + $0x164] sm:$0xf] %vm3385_vm4, %v4091_v23  ;;  %v2771_v34 = vmax.f32 %v2643_v28, 0.0  ;;  %v2644_v36 = vadd.f32 %v5327_v15, %v2509_v30  ;;  %v2117_v42 = vadd.f32 %v1696_v38, %v464_v32  ;;  %v2181_v43 = vadd.f32 %v1952_v39, %v528_v33  ;;  %v1698_v44 = vpop.f32.mrb[61].mxu0  ;;  %v1954_v45 = vpop.f32.mrb[61].mxu1 }
 0x184   : > { %v2835_v35 = vmax.f32 %v2707_v29, 0.0  ;;  %v2708_v37 = vadd.f32 %v5327_v15, %v2573_v31  ;;  %v1699_v52 = vpop.f32.mrb[62].mxu0  ;;  %v1955_v20 = vpop.f32.mrb[62].mxu1 }
 0x185   : > { %v4028_v46 = vpack.c.bf16 %v2771_v34, %v2771_v34  ;;  %v2772_v48 = vmax.f32 %v2644_v36, 0.0  ;;  %2246 = vst.msk [vmem:[#allocation2 + $0xf0] sm:$0xff] %vm305_vm3, %v2117_v42  ;;  %2310 = vst.msk [vmem:[#allocation2 + $0x2f0] sm:$0xff] %vm305_vm3, %v2181_v43  ;;  %v2118_v55 = vadd.f32 %v1699_v52, %v465_v40  ;;  %v2182_v56 = vadd.f32 %v1955_v20, %v529_v41  ;;  %v1701_v57 = vpop.f32.mrb[63].mxu0  ;;  %v1957_v58 = vpop.f32.mrb[63].mxu1 }
 0x186   : > { %v4092_v47 = vpack.c.bf16 %v2835_v35, %v2835_v35  ;;  %v2836_v49 = vmax.f32 %v2708_v37, 0.0  ;;  %v2375_v50 = vld [vmem:[#allocation2 + $0xe0] sm:$0xff] }
 0x187   : > { %v2439_v51 = vld [vmem:[#allocation2 + $0x2e0] sm:$0xff]  ;;  %v2510_v53 = vmul.f32 %v5310_v6, %v2375_v50  ;;  %3412 = vst.msk [vmem:[%s5094_s29 + $0x68] sm:$0xf] %vm3385_vm4, %v4028_v46  ;;  %v4029_v59 = vpack.c.bf16 %v2772_v48, %v2772_v48  ;;  %v2376_v61 = vld [vmem:[#allocation2 + $0xe8] sm:$0xff]  ;;  %v468_v46 = vld [vmem:[#allocation2 + $0x110] sm:$0xff] }
 0x188   : > { %v2574_v54 = vmul.f32 %v5310_v6, %v2439_v51  ;;  %3476 = vst.msk [vmem:[%s5094_s29 + $0x168] sm:$0xf] %vm3385_vm4, %v4092_v47  ;;  %v4093_v60 = vpack.c.bf16 %v2836_v49, %v2836_v49  ;;  %v2440_v62 = vld [vmem:[#allocation2 + $0x2e8] sm:$0xff]  ;;  %v2511_v1 = vmul.f32 %v5310_v6, %v2376_v61  ;;  %v532_v47 = vld [vmem:[#allocation2 + $0x310] sm:$0xff]  ;;  %v469_v50 = vld [vmem:[#allocation2 + $0x118] sm:$0xff] }
 0x189   : > { %v2645_v63 = vadd.f32 %v5327_v15, %v2510_v53  ;;  %v2575_v2 = vmul.f32 %v5310_v6, %v2440_v62  ;;  %2247 = vst.msk [vmem:[#allocation2 + $0xf8] sm:$0xff] %vm305_vm3, %v2118_v55  ;;  %2311 = vst.msk [vmem:[#allocation2 + $0x2f8] sm:$0xff] %vm305_vm3, %v2182_v56  ;;  %v533_v51 = vld [vmem:[#allocation2 + $0x318] sm:$0xff] }
 0x18a   : > { %v2709_v0 = vadd.f32 %v5327_v15, %v2574_v54  ;;  %3413 = vst.msk [vmem:[%s5094_s29 + $0x6c] sm:$0xf] %vm3385_vm4, %v4029_v59  ;;  %3477 = vst.msk [vmem:[%s5094_s29 + $0x16c] sm:$0xf] %vm3385_vm4, %v4093_v60  ;;  %v2646_v4 = vadd.f32 %v5327_v15, %v2511_v1  ;;  %v1704_v9 = vpop.f32.mrb[64].mxu0  ;;  %v1960_v10 = vpop.f32.mrb[64].mxu1 }
 0x18b   : > { %v2773_v3 = vmax.f32 %v2645_v63, 0.0  ;;  %v2710_v5 = vadd.f32 %v5327_v15, %v2575_v2  ;;  %v1706_v16 = vpop.f32.mrb[65].mxu0  ;;  %v1962_v17 = vpop.f32.mrb[65].mxu1  ;;  %v2119_v24 = vadd.f32 %v1704_v9, %v466_v7  ;;  %v2183_v25 = vadd.f32 %v1960_v10, %v530_v8 }
 0x18c   : > { %v2837_v21 = vmax.f32 %v2709_v0, 0.0  ;;  %v2774_v13 = vmax.f32 %v2646_v4, 0.0  ;;  %v2377_v22 = vld [vmem:[#allocation2 + $0xf0] sm:$0xff]  ;;  %v1707_v26 = vpop.f32.mrb[66].mxu0  ;;  %v1963_v27 = vpop.f32.mrb[66].mxu1 }
 0x18d   : > { %v4030_v11 = vpack.c.bf16 %v2773_v3, %v2773_v3  ;;  %v2838_v14 = vmax.f32 %v2710_v5, 0.0  ;;  %v2441_v23 = vld [vmem:[#allocation2 + $0x2f0] sm:$0xff]  ;;  %v2512_v30 = vmul.f32 %v5310_v6, %v2377_v22  ;;  %v1709_v32 = vpop.f32.mrb[67].mxu0  ;;  %v1965_v33 = vpop.f32.mrb[67].mxu1  ;;  %2248 = vst.msk [vmem:[#allocation2 + $0x100] sm:$0xff] %vm305_vm3, %v2119_v24  ;;  %2312 = vst.msk [vmem:[#allocation2 + $0x300] sm:$0xff] %vm305_vm3, %v2183_v25  ;;  %v2120_v36 = vadd.f32 %v1707_v26, %v467_v18 }
 0x18e   : > { %v4094_v12 = vpack.c.bf16 %v2837_v21, %v2837_v21  ;;  %v4031_v28 = vpack.c.bf16 %v2774_v13, %v2774_v13  ;;  %v2576_v31 = vmul.f32 %v5310_v6, %v2441_v23  ;;  %v2184_v37 = vadd.f32 %v1963_v27, %v531_v19  ;;  %v470_v13 = vld [vmem:[#allocation2 + $0x120] sm:$0xff]  ;;  %v471_v24 = vld [vmem:[#allocation2 + $0x128] sm:$0xff] }
 0x18f   : > { %3414 = vst.msk [vmem:[%s5094_s29 + $0x70] sm:$0xf] %vm3385_vm4, %v4030_v11  ;;  %v4095_v29 = vpack.c.bf16 %v2838_v14, %v2838_v14  ;;  %v2647_v38 = vadd.f32 %v5327_v15, %v2512_v30  ;;  %v534_v14 = vld [vmem:[#allocation2 + $0x320] sm:$0xff]  ;;  %v535_v25 = vld [vmem:[#allocation2 + $0x328] sm:$0xff] }
 0x190   : > { %3478 = vst.msk [vmem:[%s5094_s29 + $0x170] sm:$0xf] %vm3385_vm4, %v4094_v12  ;;  %v2378_v34 = vld [vmem:[#allocation2 + $0xf8] sm:$0xff]  ;;  %3415 = vst.msk [vmem:[%s5094_s29 + $0x74] sm:$0xf] %vm3385_vm4, %v4031_v28  ;;  %v2711_v39 = vadd.f32 %v5327_v15, %v2576_v31 }
 0x191   : > { %v2442_v35 = vld [vmem:[#allocation2 + $0x2f8] sm:$0xff]  ;;  %3479 = vst.msk [vmem:[%s5094_s29 + $0x174] sm:$0xf] %vm3385_vm4, %v4095_v29  ;;  %v2513_v40 = vmul.f32 %v5310_v6, %v2378_v34  ;;  %v2775_v42 = vmax.f32 %v2647_v38, 0.0 }
 0x192   : > { %v2577_v41 = vmul.f32 %v5310_v6, %v2442_v35  ;;  %2249 = vst.msk [vmem:[#allocation2 + $0x108] sm:$0xff] %vm305_vm3, %v2120_v36  ;;  %2313 = vst.msk [vmem:[#allocation2 + $0x308] sm:$0xff] %vm305_vm3, %v2184_v37  ;;  %v2839_v43 = vmax.f32 %v2711_v39, 0.0  ;;  %v1712_v48 = vpop.f32.mrb[68].mxu0  ;;  %v1968_v49 = vpop.f32.mrb[68].mxu1 }
 0x193   : > { %v2648_v44 = vadd.f32 %v5327_v15, %v2513_v40  ;;  %v4032_v52 = vpack.c.bf16 %v2775_v42, %v2775_v42  ;;  %v1714_v55 = vpop.f32.mrb[69].mxu0  ;;  %v1970_v56 = vpop.f32.mrb[69].mxu1  ;;  %v2121_v57 = vadd.f32 %v1712_v48, %v468_v46  ;;  %v2185_v58 = vadd.f32 %v1968_v49, %v532_v47 }
 0x194   : > { %v2712_v45 = vadd.f32 %v5327_v15, %v2577_v41  ;;  %v4096_v20 = vpack.c.bf16 %v2839_v43, %v2839_v43  ;;  %v1715_v59 = vpop.f32.mrb[70].mxu0  ;;  %v1971_v60 = vpop.f32.mrb[70].mxu1  ;;  %v2379_v63 = vld [vmem:[#allocation2 + $0x100] sm:$0xff] }
 0x195   : > { %v2776_v53 = vmax.f32 %v2648_v44, 0.0  ;;  %3416 = vst.msk [vmem:[%s5094_s29 + $0x78] sm:$0xf] %vm3385_vm4, %v4032_v52  ;;  %v2443_v0 = vld [vmem:[#allocation2 + $0x300] sm:$0xff]  ;;  %v2122_v1 = vadd.f32 %v1715_v59, %v469_v50  ;;  %v2186_v2 = vadd.f32 %v1971_v60, %v533_v51  ;;  %v1717_v3 = vpop.f32.mrb[71].mxu0  ;;  %v1973_v21 = vpop.f32.mrb[71].mxu1  ;;  %v2514_v4 = vmul.f32 %v5310_v6, %v2379_v63 }
 0x196   : > { %v2840_v54 = vmax.f32 %v2712_v45, 0.0  ;;  %3480 = vst.msk [vmem:[%s5094_s29 + $0x178] sm:$0xf] %vm3385_vm4, %v4096_v20  ;;  %v2578_v5 = vmul.f32 %v5310_v6, %v2443_v0  ;;  %v472_v52 = vld [vmem:[#allocation2 + $0x130] sm:$0xff] }
 0x197   : > { %v4033_v61 = vpack.c.bf16 %v2776_v53, %v2776_v53  ;;  %2250 = vst.msk [vmem:[#allocation2 + $0x110] sm:$0xff] %vm305_vm3, %v2121_v57  ;;  %2314 = vst.msk [vmem:[#allocation2 + $0x310] sm:$0xff] %vm305_vm3, %v2185_v58  ;;  %v2649_v9 = vadd.f32 %v5327_v15, %v2514_v4  ;;  %v536_v20 = vld [vmem:[#allocation2 + $0x330] sm:$0xff] }
 0x198   : > { %v4097_v62 = vpack.c.bf16 %v2840_v54, %v2840_v54  ;;  %2251 = vst.msk [vmem:[#allocation2 + $0x118] sm:$0xff] %vm305_vm3, %v2122_v1  ;;  %2315 = vst.msk [vmem:[#allocation2 + $0x318] sm:$0xff] %vm305_vm3, %v2186_v2  ;;  %v2713_v10 = vadd.f32 %v5327_v15, %v2578_v5  ;;  %v473_v1 = vld [vmem:[#allocation2 + $0x138] sm:$0xff] }
 0x199   : > { %3417 = vst.msk [vmem:[%s5094_s29 + $0x7c] sm:$0xf] %vm3385_vm4, %v4033_v61  ;;  %v2380_v7 = vld [vmem:[#allocation2 + $0x108] sm:$0xff]  ;;  %v2777_v16 = vmax.f32 %v2649_v9, 0.0  ;;  %v537_v2 = vld [vmem:[#allocation2 + $0x338] sm:$0xff] }
 0x19a   : > { %3481 = vst.msk [vmem:[%s5094_s29 + $0x17c] sm:$0xf] %vm3385_vm4, %v4097_v62  ;;  %v2444_v8 = vld [vmem:[#allocation2 + $0x308] sm:$0xff]  ;;  %v2515_v11 = vmul.f32 %v5310_v6, %v2380_v7  ;;  %v2841_v17 = vmax.f32 %v2713_v10, 0.0  ;;  %v1720_v22 = vpop.f32.mrb[72].mxu0  ;;  %v1976_v23 = vpop.f32.mrb[72].mxu1 }
 0x19b   : > { %v2579_v12 = vmul.f32 %v5310_v6, %v2444_v8  ;;  %v2123_v26 = vadd.f32 %v1720_v22, %v470_v13  ;;  %v2187_v27 = vadd.f32 %v1976_v23, %v534_v14  ;;  %v1722_v28 = vpop.f32.mrb[73].mxu0  ;;  %v1978_v29 = vpop.f32.mrb[73].mxu1  ;;  %v4034_v30 = vpack.c.bf16 %v2777_v16, %v2777_v16 }
 0x19c   : > { %v2650_v18 = vadd.f32 %v5327_v15, %v2515_v11  ;;  %v4098_v31 = vpack.c.bf16 %v2841_v17, %v2841_v17  ;;  %v1723_v34 = vpop.f32.mrb[74].mxu0  ;;  %v1979_v35 = vpop.f32.mrb[74].mxu1 }
 0x19d   : > { %v2714_v19 = vadd.f32 %v5327_v15, %v2579_v12  ;;  %2252 = vst.msk [vmem:[#allocation2 + $0x120] sm:$0xff] %vm305_vm3, %v2123_v26  ;;  %2316 = vst.msk [vmem:[#allocation2 + $0x320] sm:$0xff] %vm305_vm3, %v2187_v27  ;;  %v2124_v38 = vadd.f32 %v1723_v34, %v471_v24  ;;  %v2188_v39 = vadd.f32 %v1979_v35, %v535_v25  ;;  %v1725_v40 = vpop.f32.mrb[75].mxu0  ;;  %v1981_v41 = vpop.f32.mrb[75].mxu1 }
 0x19e   : > { %v2778_v32 = vmax.f32 %v2650_v18, 0.0  ;;  %v2381_v36 = vld [vmem:[#allocation2 + $0x110] sm:$0xff]  ;;  %3418 = vst.msk [vmem:[%s5094_s29 + $0x80] sm:$0xf] %vm3385_vm4, %v4034_v30  ;;  %3482 = vst.msk [vmem:[%s5094_s29 + $0x180] sm:$0xf] %vm3385_vm4, %v4098_v31 }
 0x19f   : > { %v2842_v33 = vmax.f32 %v2714_v19, 0.0  ;;  %v2445_v37 = vld [vmem:[#allocation2 + $0x310] sm:$0xff]  ;;  %v2516_v44 = vmul.f32 %v5310_v6, %v2381_v36  ;;  %v2382_v46 = vld [vmem:[#allocation2 + $0x118] sm:$0xff]  ;;  %2253 = vst.msk [vmem:[#allocation2 + $0x128] sm:$0xff] %vm305_vm3, %v2124_v38  ;;  %2317 = vst.msk [vmem:[#allocation2 + $0x328] sm:$0xff] %vm305_vm3, %v2188_v39 }
 0x1a0   : > { %v4035_v42 = vpack.c.bf16 %v2778_v32, %v2778_v32  ;;  %v2580_v45 = vmul.f32 %v5310_v6, %v2445_v37  ;;  %v2446_v47 = vld [vmem:[#allocation2 + $0x318] sm:$0xff]  ;;  %v2517_v48 = vmul.f32 %v5310_v6, %v2382_v46  ;;  %v474_v30 = vld [vmem:[#allocation2 + $0x140] sm:$0xff]  ;;  %v475_v40 = vld [vmem:[#allocation2 + $0x148] sm:$0xff] }
 0x1a1   : > { %v4099_v43 = vpack.c.bf16 %v2842_v33, %v2842_v33  ;;  %v2581_v49 = vmul.f32 %v5310_v6, %v2446_v47  ;;  %v2651_v50 = vadd.f32 %v5327_v15, %v2516_v44  ;;  %v538_v31 = vld [vmem:[#allocation2 + $0x340] sm:$0xff]  ;;  %v539_v41 = vld [vmem:[#allocation2 + $0x348] sm:$0xff] }
 0x1a2   : > { %3419 = vst.msk [vmem:[%s5094_s29 + $0x84] sm:$0xf] %vm3385_vm4, %v4035_v42  ;;  %v2715_v51 = vadd.f32 %v5327_v15, %v2580_v45  ;;  %v2652_v53 = vadd.f32 %v5327_v15, %v2517_v48  ;;  %v1728_v57 = vpop.f32.mrb[76].mxu0  ;;  %v1984_v58 = vpop.f32.mrb[76].mxu1 }
 0x1a3   : > { %3483 = vst.msk [vmem:[%s5094_s29 + $0x184] sm:$0xf] %vm3385_vm4, %v4099_v43  ;;  %v2716_v54 = vadd.f32 %v5327_v15, %v2581_v49  ;;  %v2779_v55 = vmax.f32 %v2651_v50, 0.0  ;;  %v2125_v61 = vadd.f32 %v1728_v57, %v472_v52  ;;  %v2189_v62 = vadd.f32 %v1984_v58, %v536_v20  ;;  %v1730_v63 = vpop.f32.mrb[77].mxu0  ;;  %v1986_v0 = vpop.f32.mrb[77].mxu1 }
 0x1a4   : > { %v2843_v56 = vmax.f32 %v2715_v51, 0.0  ;;  %v2780_v59 = vmax.f32 %v2652_v53, 0.0  ;;  %v2383_v4 = vld [vmem:[#allocation2 + $0x120] sm:$0xff]  ;;  %v1731_v7 = vpop.f32.mrb[78].mxu0  ;;  %v1987_v8 = vpop.f32.mrb[78].mxu1 }
 0x1a5   : > { %v2844_v60 = vmax.f32 %v2716_v54, 0.0  ;;  %v4036_v3 = vpack.c.bf16 %v2779_v55, %v2779_v55  ;;  %v2447_v5 = vld [vmem:[#allocation2 + $0x320] sm:$0xff]  ;;  %v2518_v11 = vmul.f32 %v5310_v6, %v2383_v4  ;;  %2254 = vst.msk [vmem:[#allocation2 + $0x130] sm:$0xff] %vm305_vm3, %v2125_v61  ;;  %2318 = vst.msk [vmem:[#allocation2 + $0x330] sm:$0xff] %vm305_vm3, %v2189_v62  ;;  %v1733_v13 = vpop.f32.mrb[79].mxu0  ;;  %v1989_v14 = vpop.f32.mrb[79].mxu1  ;;  %v2126_v18 = vadd.f32 %v1731_v7, %v473_v1 }
 0x1a6   : > { %v4100_v21 = vpack.c.bf16 %v2843_v56, %v2843_v56  ;;  %v4037_v9 = vpack.c.bf16 %v2780_v59, %v2780_v59  ;;  %v2582_v12 = vmul.f32 %v5310_v6, %v2447_v5  ;;  %v2384_v16 = vld [vmem:[#allocation2 + $0x128] sm:$0xff]  ;;  %v2190_v19 = vadd.f32 %v1987_v8, %v537_v2  ;;  %v476_v61 = vld [vmem:[#allocation2 + $0x150] sm:$0xff]  ;;  %v477_v4 = vld [vmem:[#allocation2 + $0x158] sm:$0xff] }
 0x1a7   : > { %v4101_v10 = vpack.c.bf16 %v2844_v60, %v2844_v60  ;;  %3420 = vst.msk [vmem:[%s5094_s29 + $0x88] sm:$0xf] %vm3385_vm4, %v4036_v3  ;;  %v2448_v17 = vld [vmem:[#allocation2 + $0x328] sm:$0xff]  ;;  %v2653_v22 = vadd.f32 %v5327_v15, %v2518_v11  ;;  %v2519_v24 = vmul.f32 %v5310_v6, %v2384_v16  ;;  %v540_v62 = vld [vmem:[#allocation2 + $0x350] sm:$0xff]  ;;  %v541_v5 = vld [vmem:[#allocation2 + $0x358] sm:$0xff] }
 0x1a8   : > { %3484 = vst.msk [vmem:[%s5094_s29 + $0x188] sm:$0xf] %vm3385_vm4, %v4100_v21  ;;  %3421 = vst.msk [vmem:[%s5094_s29 + $0x8c] sm:$0xf] %vm3385_vm4, %v4037_v9  ;;  %v2717_v23 = vadd.f32 %v5327_v15, %v2582_v12  ;;  %v2583_v25 = vmul.f32 %v5310_v6, %v2448_v17 }
 0x1a9   : > { %3485 = vst.msk [vmem:[%s5094_s29 + $0x18c] sm:$0xf] %vm3385_vm4, %v4101_v10  ;;  %v2781_v26 = vmax.f32 %v2653_v22, 0.0  ;;  %v2654_v28 = vadd.f32 %v5327_v15, %v2519_v24 }
 0x1aa   : > { %2255 = vst.msk [vmem:[#allocation2 + $0x138] sm:$0xff] %vm305_vm3, %v2126_v18  ;;  %2319 = vst.msk [vmem:[#allocation2 + $0x338] sm:$0xff] %vm305_vm3, %v2190_v19  ;;  %v2845_v27 = vmax.f32 %v2717_v23, 0.0  ;;  %v2718_v29 = vadd.f32 %v5327_v15, %v2583_v25  ;;  %v1736_v32 = vpop.f32.mrb[80].mxu0  ;;  %v1992_v33 = vpop.f32.mrb[80].mxu1 }
 0x1ab   : > { %v4038_v34 = vpack.c.bf16 %v2781_v26, %v2781_v26  ;;  %v2782_v36 = vmax.f32 %v2654_v28, 0.0  ;;  %v1738_v38 = vpop.f32.mrb[81].mxu0  ;;  %v1994_v39 = vpop.f32.mrb[81].mxu1  ;;  %v2127_v44 = vadd.f32 %v1736_v32, %v474_v30  ;;  %v2191_v45 = vadd.f32 %v1992_v33, %v538_v31 }
 0x1ac   : > { %v4102_v35 = vpack.c.bf16 %v2845_v27, %v2845_v27  ;;  %v2846_v37 = vmax.f32 %v2718_v29, 0.0  ;;  %v2385_v42 = vld [vmem:[#allocation2 + $0x130] sm:$0xff]  ;;  %v1739_v46 = vpop.f32.mrb[82].mxu0  ;;  %v1995_v47 = vpop.f32.mrb[82].mxu1 }
 0x1ad   : > { %v2449_v43 = vld [vmem:[#allocation2 + $0x330] sm:$0xff]  ;;  %3422 = vst.msk [vmem:[%s5094_s29 + $0x90] sm:$0xf] %vm3385_vm4, %v4038_v34  ;;  %v4039_v48 = vpack.c.bf16 %v2782_v36, %v2782_v36  ;;  %v2520_v50 = vmul.f32 %v5310_v6, %v2385_v42  ;;  %v1741_v52 = vpop.f32.mrb[83].mxu0  ;;  %v1997_v20 = vpop.f32.mrb[83].mxu1  ;;  %v2128_v53 = vadd.f32 %v1739_v46, %v475_v40  ;;  %v2192_v54 = vadd.f32 %v1995_v47, %v539_v41  ;;  %v478_v36 = vld [vmem:[#allocation2 + $0x160] sm:$0xff] }
 0x1ae   : > { %3486 = vst.msk [vmem:[%s5094_s29 + $0x190] sm:$0xf] %vm3385_vm4, %v4102_v35  ;;  %v4103_v49 = vpack.c.bf16 %v2846_v37, %v2846_v37  ;;  %v2584_v51 = vmul.f32 %v5310_v6, %v2449_v43  ;;  %v542_v37 = vld [vmem:[#allocation2 + $0x360] sm:$0xff] }
 0x1af   : > { %2256 = vst.msk [vmem:[#allocation2 + $0x140] sm:$0xff] %vm305_vm3, %v2127_v44  ;;  %2320 = vst.msk [vmem:[#allocation2 + $0x340] sm:$0xff] %vm305_vm3, %v2191_v45  ;;  %v2655_v55 = vadd.f32 %v5327_v15, %v2520_v50  ;;  %v479_v44 = vld [vmem:[#allocation2 + $0x168] sm:$0xff] }
 0x1b0   : > { %3423 = vst.msk [vmem:[%s5094_s29 + $0x94] sm:$0xf] %vm3385_vm4, %v4039_v48  ;;  %3487 = vst.msk [vmem:[%s5094_s29 + $0x194] sm:$0xf] %vm3385_vm4, %v4103_v49  ;;  %v2719_v56 = vadd.f32 %v5327_v15, %v2584_v51  ;;  %v543_v45 = vld [vmem:[#allocation2 + $0x368] sm:$0xff] }
 0x1b1   : > { %v2386_v57 = vld [vmem:[#allocation2 + $0x138] sm:$0xff]  ;;  %2257 = vst.msk [vmem:[#allocation2 + $0x148] sm:$0xff] %vm305_vm3, %v2128_v53  ;;  %2321 = vst.msk [vmem:[#allocation2 + $0x348] sm:$0xff] %vm305_vm3, %v2192_v54  ;;  %v2783_v63 = vmax.f32 %v2655_v55, 0.0 }
 0x1b2   : > { %v2450_v58 = vld [vmem:[#allocation2 + $0x338] sm:$0xff]  ;;  %v2521_v59 = vmul.f32 %v5310_v6, %v2386_v57  ;;  %v2847_v0 = vmax.f32 %v2719_v56, 0.0  ;;  %v1744_v3 = vpop.f32.mrb[84].mxu0  ;;  %v2000_v21 = vpop.f32.mrb[84].mxu1 }
 0x1b3   : > { %v2585_v60 = vmul.f32 %v5310_v6, %v2450_v58  ;;  %v4040_v7 = vpack.c.bf16 %v2783_v63, %v2783_v63  ;;  %v2129_v9 = vadd.f32 %v1744_v3, %v476_v61  ;;  %v2193_v10 = vadd.f32 %v2000_v21, %v540_v62  ;;  %v1746_v11 = vpop.f32.mrb[85].mxu0  ;;  %v2002_v12 = vpop.f32.mrb[85].mxu1 }
 0x1b4   : > { %v2656_v1 = vadd.f32 %v5327_v15, %v2521_v59  ;;  %v4104_v8 = vpack.c.bf16 %v2847_v0, %v2847_v0  ;;  %v1747_v16 = vpop.f32.mrb[86].mxu0  ;;  %v2003_v17 = vpop.f32.mrb[86].mxu1  ;;  %v480_v11 = vld [vmem:[#allocation2 + $0x170] sm:$0xff] }
 0x1b5   : > { %v2720_v2 = vadd.f32 %v5327_v15, %v2585_v60  ;;  %3424 = vst.msk [vmem:[%s5094_s29 + $0x98] sm:$0xf] %vm3385_vm4, %v4040_v7  ;;  %v2130_v22 = vadd.f32 %v1747_v16, %v477_v4  ;;  %v2194_v23 = vadd.f32 %v2003_v17, %v541_v5  ;;  %v1749_v24 = vpop.f32.mrb[87].mxu0  ;;  %v2005_v25 = vpop.f32.mrb[87].mxu1  ;;  %v544_v12 = vld [vmem:[#allocation2 + $0x370] sm:$0xff] }
 0x1b6   : > { %v2784_v13 = vmax.f32 %v2656_v1, 0.0  ;;  %3488 = vst.msk [vmem:[%s5094_s29 + $0x198] sm:$0xf] %vm3385_vm4, %v4104_v8  ;;  %v2387_v18 = vld [vmem:[#allocation2 + $0x140] sm:$0xff]  ;;  %v481_v24 = vld [vmem:[#allocation2 + $0x178] sm:$0xff] }
 0x1b7   : > { %v2848_v14 = vmax.f32 %v2720_v2, 0.0  ;;  %v2451_v19 = vld [vmem:[#allocation2 + $0x340] sm:$0xff]  ;;  %2258 = vst.msk [vmem:[#allocation2 + $0x150] sm:$0xff] %vm305_vm3, %v2129_v9  ;;  %2322 = vst.msk [vmem:[#allocation2 + $0x350] sm:$0xff] %vm305_vm3, %v2193_v10  ;;  %v2522_v28 = vmul.f32 %v5310_v6, %v2387_v18  ;;  %v545_v25 = vld [vmem:[#allocation2 + $0x378] sm:$0xff] }
 0x1b8   : > { %v4041_v26 = vpack.c.bf16 %v2784_v13, %v2784_v13  ;;  %v2586_v29 = vmul.f32 %v5310_v6, %v2451_v19  ;;  %v2388_v30 = vld [vmem:[#allocation2 + $0x148] sm:$0xff]  ;;  %2259 = vst.msk [vmem:[#allocation2 + $0x158] sm:$0xff] %vm305_vm3, %v2130_v22  ;;  %2323 = vst.msk [vmem:[#allocation2 + $0x358] sm:$0xff] %vm305_vm3, %v2194_v23 }
 0x1b9   : > { %v4105_v27 = vpack.c.bf16 %v2848_v14, %v2848_v14  ;;  %v2452_v31 = vld [vmem:[#allocation2 + $0x348] sm:$0xff]  ;;  %v2657_v32 = vadd.f32 %v5327_v15, %v2522_v28  ;;  %v2523_v34 = vmul.f32 %v5310_v6, %v2388_v30 }
 0x1ba   : > { %3425 = vst.msk [vmem:[%s5094_s29 + $0x9c] sm:$0xf] %vm3385_vm4, %v4041_v26  ;;  %v2721_v33 = vadd.f32 %v5327_v15, %v2586_v29  ;;  %v2587_v35 = vmul.f32 %v5310_v6, %v2452_v31  ;;  %v1752_v42 = vpop.f32.mrb[88].mxu0  ;;  %v2008_v43 = vpop.f32.mrb[88].mxu1 }
 0x1bb   : > { %3489 = vst.msk [vmem:[%s5094_s29 + $0x19c] sm:$0xf] %vm3385_vm4, %v4105_v27  ;;  %v2785_v38 = vmax.f32 %v2657_v32, 0.0  ;;  %v2658_v40 = vadd.f32 %v5327_v15, %v2523_v34  ;;  %v2131_v46 = vadd.f32 %v1752_v42, %v478_v36  ;;  %v2195_v47 = vadd.f32 %v2008_v43, %v542_v37  ;;  %v1754_v48 = vpop.f32.mrb[89].mxu0  ;;  %v2010_v49 = vpop.f32.mrb[89].mxu1 }
 0x1bc   : > { %v2849_v39 = vmax.f32 %v2721_v33, 0.0  ;;  %v2722_v41 = vadd.f32 %v5327_v15, %v2587_v35  ;;  %v1755_v55 = vpop.f32.mrb[90].mxu0  ;;  %v2011_v56 = vpop.f32.mrb[90].mxu1 }
 0x1bd   : > { %v4042_v50 = vpack.c.bf16 %v2785_v38, %v2785_v38  ;;  %v2786_v52 = vmax.f32 %v2658_v40, 0.0  ;;  %2260 = vst.msk [vmem:[#allocation2 + $0x160] sm:$0xff] %vm305_vm3, %v2131_v46  ;;  %2324 = vst.msk [vmem:[#allocation2 + $0x360] sm:$0xff] %vm305_vm3, %v2195_v47  ;;  %v2132_v59 = vadd.f32 %v1755_v55, %v479_v44  ;;  %v2196_v60 = vadd.f32 %v2011_v56, %v543_v45  ;;  %v1757_v61 = vpop.f32.mrb[91].mxu0  ;;  %v2013_v62 = vpop.f32.mrb[91].mxu1 }
 0x1be   : > { %v4106_v51 = vpack.c.bf16 %v2849_v39, %v2849_v39  ;;  %v2850_v20 = vmax.f32 %v2722_v41, 0.0  ;;  %v2389_v53 = vld [vmem:[#allocation2 + $0x150] sm:$0xff] }
 0x1bf   : > { %v2453_v54 = vld [vmem:[#allocation2 + $0x350] sm:$0xff]  ;;  %v2524_v57 = vmul.f32 %v5310_v6, %v2389_v53  ;;  %3426 = vst.msk [vmem:[%s5094_s29 + $0xa0] sm:$0xf] %vm3385_vm4, %v4042_v50  ;;  %v4043_v63 = vpack.c.bf16 %v2786_v52, %v2786_v52  ;;  %v2390_v1 = vld [vmem:[#allocation2 + $0x158] sm:$0xff]  ;;  %v482_v50 = vld [vmem:[#allocation2 + $0x180] sm:$0xff] }
 0x1c0   : > { %v2588_v58 = vmul.f32 %v5310_v6, %v2453_v54  ;;  %3490 = vst.msk [vmem:[%s5094_s29 + $0x1a0] sm:$0xf] %vm3385_vm4, %v4106_v51  ;;  %v4107_v0 = vpack.c.bf16 %v2850_v20, %v2850_v20  ;;  %v2454_v2 = vld [vmem:[#allocation2 + $0x358] sm:$0xff]  ;;  %v2525_v4 = vmul.f32 %v5310_v6, %v2390_v1  ;;  %v546_v51 = vld [vmem:[#allocation2 + $0x380] sm:$0xff]  ;;  %v483_v53 = vld [vmem:[#allocation2 + $0x188] sm:$0xff] }
 0x1c1   : > { %v2659_v3 = vadd.f32 %v5327_v15, %v2524_v57  ;;  %v2589_v5 = vmul.f32 %v5310_v6, %v2454_v2  ;;  %2261 = vst.msk [vmem:[#allocation2 + $0x168] sm:$0xff] %vm305_vm3, %v2132_v59  ;;  %2325 = vst.msk [vmem:[#allocation2 + $0x368] sm:$0xff] %vm305_vm3, %v2196_v60  ;;  %v547_v54 = vld [vmem:[#allocation2 + $0x388] sm:$0xff] }
 0x1c2   : > { %v2723_v21 = vadd.f32 %v5327_v15, %v2588_v58  ;;  %3427 = vst.msk [vmem:[%s5094_s29 + $0xa4] sm:$0xf] %vm3385_vm4, %v4043_v63  ;;  %3491 = vst.msk [vmem:[%s5094_s29 + $0x1a4] sm:$0xf] %vm3385_vm4, %v4107_v0  ;;  %v2660_v9 = vadd.f32 %v5327_v15, %v2525_v4  ;;  %v1760_v13 = vpop.f32.mrb[92].mxu0  ;;  %v2016_v14 = vpop.f32.mrb[92].mxu1 }
 0x1c3   : > { %v2787_v7 = vmax.f32 %v2659_v3, 0.0  ;;  %v2724_v10 = vadd.f32 %v5327_v15, %v2589_v5  ;;  %v1762_v22 = vpop.f32.mrb[93].mxu0  ;;  %v2018_v23 = vpop.f32.mrb[93].mxu1  ;;  %v2133_v28 = vadd.f32 %v1760_v13, %v480_v11  ;;  %v2197_v29 = vadd.f32 %v2016_v14, %v544_v12  ;;  %v5579_v12 = vld [vmem:[%s5811_s3] ss:$0 sm:$0xff] }
 0x1c4   : > { %v2851_v8 = vmax.f32 %v2723_v21, 0.0  ;;  %v2788_v18 = vmax.f32 %v2660_v9, 0.0  ;;  %v2391_v26 = vld [vmem:[#allocation2 + $0x160] sm:$0xff]  ;;  %v1763_v30 = vpop.f32.mrb[94].mxu0  ;;  %v2019_v31 = vpop.f32.mrb[94].mxu1 }
 0x1c5   : > { %v4044_v16 = vpack.c.bf16 %v2787_v7, %v2787_v7  ;;  %v2852_v19 = vmax.f32 %v2724_v10, 0.0  ;;  %v2455_v27 = vld [vmem:[#allocation2 + $0x360] sm:$0xff]  ;;  %v2526_v34 = vmul.f32 %v5310_v6, %v2391_v26  ;;  %v1765_v36 = vpop.f32.mrb[95].mxu0  ;;  %v2021_v37 = vpop.f32.mrb[95].mxu1  ;;  %2262 = vst.msk [vmem:[#allocation2 + $0x170] sm:$0xff] %vm305_vm3, %v2133_v28  ;;  %2326 = vst.msk [vmem:[#allocation2 + $0x370] sm:$0xff] %vm305_vm3, %v2197_v29  ;;  %v2134_v40 = vadd.f32 %v1763_v30, %v481_v24 }
 0x1c6   : > { %v4108_v17 = vpack.c.bf16 %v2851_v8, %v2851_v8  ;;  %v4045_v32 = vpack.c.bf16 %v2788_v18, %v2788_v18  ;;  %v2590_v35 = vmul.f32 %v5310_v6, %v2455_v27  ;;  %v2198_v41 = vadd.f32 %v2019_v31, %v545_v25  ;;  %v5564_v7 = vld [vmem:[%s5810_s2] ss:$0 sm:$0xff]  ;;  %v484_v18 = vld [vmem:[#allocation2 + $0x190] sm:$0xff]  ;;  %v485_v28 = vld [vmem:[#allocation2 + $0x198] sm:$0xff] }
 0x1c7   : > { %3428 = vst.msk [vmem:[%s5094_s29 + $0xa8] sm:$0xf] %vm3385_vm4, %v4044_v16  ;;  %v4109_v33 = vpack.c.bf16 %v2852_v19, %v2852_v19  ;;  %v2661_v42 = vadd.f32 %v5327_v15, %v2526_v34  ;;  %v548_v19 = vld [vmem:[#allocation2 + $0x390] sm:$0xff]  ;;  %v549_v29 = vld [vmem:[#allocation2 + $0x398] sm:$0xff] }
 0x1c8   : > { %3492 = vst.msk [vmem:[%s5094_s29 + $0x1a8] sm:$0xf] %vm3385_vm4, %v4108_v17  ;;  %v2392_v38 = vld [vmem:[#allocation2 + $0x168] sm:$0xff]  ;;  %3429 = vst.msk [vmem:[%s5094_s29 + $0xac] sm:$0xf] %vm3385_vm4, %v4045_v32  ;;  %v2725_v43 = vadd.f32 %v5327_v15, %v2590_v35 }
 0x1c9   : > { %v2456_v39 = vld [vmem:[#allocation2 + $0x368] sm:$0xff]  ;;  %3493 = vst.msk [vmem:[%s5094_s29 + $0x1ac] sm:$0xf] %vm3385_vm4, %v4109_v33  ;;  %v2527_v44 = vmul.f32 %v5310_v6, %v2392_v38  ;;  %v2789_v46 = vmax.f32 %v2661_v42, 0.0 }
 0x1ca   : > { %v2591_v45 = vmul.f32 %v5310_v6, %v2456_v39  ;;  %2263 = vst.msk [vmem:[#allocation2 + $0x178] sm:$0xff] %vm305_vm3, %v2134_v40  ;;  %2327 = vst.msk [vmem:[#allocation2 + $0x378] sm:$0xff] %vm305_vm3, %v2198_v41  ;;  %v2853_v47 = vmax.f32 %v2725_v43, 0.0  ;;  %v1768_v52 = vpop.f32.mrb[96].mxu0  ;;  %v2024_v20 = vpop.f32.mrb[96].mxu1 }
 0x1cb   : > { %v2662_v48 = vadd.f32 %v5327_v15, %v2527_v44  ;;  %v4046_v55 = vpack.c.bf16 %v2789_v46, %v2789_v46  ;;  %v1770_v58 = vpop.f32.mrb[97].mxu0  ;;  %v2026_v59 = vpop.f32.mrb[97].mxu1  ;;  %v2135_v60 = vadd.f32 %v1768_v52, %v482_v50  ;;  %v2199_v61 = vadd.f32 %v2024_v20, %v546_v51 }
 0x1cc   : > { %v2726_v49 = vadd.f32 %v5327_v15, %v2591_v45  ;;  %v4110_v6 = vpack.c.bf16 %v2853_v47, %v2853_v47  ;;  %v1771_v62 = vpop.f32.mrb[98].mxu0  ;;  %v2027_v63 = vpop.f32.mrb[98].mxu1  ;;  %v2393_v1 = vld [vmem:[#allocation2 + $0x170] sm:$0xff] }
 0x1cd   : > { %v2790_v56 = vmax.f32 %v2662_v48, 0.0  ;;  %3430 = vst.msk [vmem:[%s5094_s29 + $0xb0] sm:$0xf] %vm3385_vm4, %v4046_v55  ;;  %v2457_v2 = vld [vmem:[#allocation2 + $0x370] sm:$0xff]  ;;  %v2136_v3 = vadd.f32 %v1771_v62, %v483_v53  ;;  %v2200_v21 = vadd.f32 %v2027_v63, %v547_v54  ;;  %v1773_v4 = vpop.f32.mrb[99].mxu0  ;;  %v2029_v5 = vpop.f32.mrb[99].mxu1  ;;  %v2528_v8 = vmul.f32 %v5564_v7, %v2393_v1 }
 0x1ce   : > { %v2854_v57 = vmax.f32 %v2726_v49, 0.0  ;;  %3494 = vst.msk [vmem:[%s5094_s29 + $0x1b0] sm:$0xf] %vm3385_vm4, %v4110_v6  ;;  %v2592_v9 = vmul.f32 %v5564_v7, %v2457_v2  ;;  %v486_v55 = vld [vmem:[#allocation2 + $0x1a0] sm:$0xff] }
 0x1cf   : > { %v4047_v15 = vpack.c.bf16 %v2790_v56, %v2790_v56  ;;  %2264 = vst.msk [vmem:[#allocation2 + $0x180] sm:$0xff] %vm305_vm3, %v2135_v60  ;;  %2328 = vst.msk [vmem:[#allocation2 + $0x380] sm:$0xff] %vm305_vm3, %v2199_v61  ;;  %v2663_v13 = vadd.f32 %v5579_v12, %v2528_v8  ;;  %v550_v6 = vld [vmem:[#allocation2 + $0x3a0] sm:$0xff] }
 0x1d0   : > { %v4111_v0 = vpack.c.bf16 %v2854_v57, %v2854_v57  ;;  %2265 = vst.msk [vmem:[#allocation2 + $0x188] sm:$0xff] %vm305_vm3, %v2136_v3  ;;  %2329 = vst.msk [vmem:[#allocation2 + $0x388] sm:$0xff] %vm305_vm3, %v2200_v21  ;;  %v2727_v14 = vadd.f32 %v5579_v12, %v2592_v9  ;;  %v487_v3 = vld [vmem:[#allocation2 + $0x1a8] sm:$0xff] }
 0x1d1   : > { %3431 = vst.msk [vmem:[%s5094_s29 + $0xb4] sm:$0xf] %vm3385_vm4, %v4047_v15  ;;  %v2394_v10 = vld [vmem:[#allocation2 + $0x178] sm:$0xff]  ;;  %v2791_v22 = vmax.f32 %v2663_v13, 0.0  ;;  %v551_v21 = vld [vmem:[#allocation2 + $0x3a8] sm:$0xff] }
 0x1d2   : > { %3495 = vst.msk [vmem:[%s5094_s29 + $0x1b4] sm:$0xf] %vm3385_vm4, %v4111_v0  ;;  %v2458_v11 = vld [vmem:[#allocation2 + $0x378] sm:$0xff]  ;;  %v2529_v16 = vmul.f32 %v5564_v7, %v2394_v10  ;;  %v2855_v23 = vmax.f32 %v2727_v14, 0.0  ;;  %v1776_v26 = vpop.f32.mrb[100].mxu0  ;;  %v2032_v27 = vpop.f32.mrb[100].mxu1 }
 0x1d3   : > { %v2593_v17 = vmul.f32 %v5564_v7, %v2458_v11  ;;  %v2137_v30 = vadd.f32 %v1776_v26, %v484_v18  ;;  %v2201_v31 = vadd.f32 %v2032_v27, %v548_v19  ;;  %v1778_v32 = vpop.f32.mrb[101].mxu0  ;;  %v2034_v33 = vpop.f32.mrb[101].mxu1  ;;  %v4048_v34 = vpack.c.bf16 %v2791_v22, %v2791_v22 }
 0x1d4   : > { %v2664_v24 = vadd.f32 %v5579_v12, %v2529_v16  ;;  %v4112_v35 = vpack.c.bf16 %v2855_v23, %v2855_v23  ;;  %v1779_v38 = vpop.f32.mrb[102].mxu0  ;;  %v2035_v39 = vpop.f32.mrb[102].mxu1 }
 0x1d5   : > { %v2728_v25 = vadd.f32 %v5579_v12, %v2593_v17  ;;  %2266 = vst.msk [vmem:[#allocation2 + $0x190] sm:$0xff] %vm305_vm3, %v2137_v30  ;;  %2330 = vst.msk [vmem:[#allocation2 + $0x390] sm:$0xff] %vm305_vm3, %v2201_v31  ;;  %v2138_v42 = vadd.f32 %v1779_v38, %v485_v28  ;;  %v2202_v43 = vadd.f32 %v2035_v39, %v549_v29  ;;  %v1781_v44 = vpop.f32.mrb[103].mxu0  ;;  %v2037_v45 = vpop.f32.mrb[103].mxu1 }
 0x1d6   : > { %v2792_v36 = vmax.f32 %v2664_v24, 0.0  ;;  %v2395_v40 = vld [vmem:[#allocation2 + $0x180] sm:$0xff]  ;;  %3432 = vst.msk [vmem:[%s5094_s29 + $0xb8] sm:$0xf] %vm3385_vm4, %v4048_v34  ;;  %3496 = vst.msk [vmem:[%s5094_s29 + $0x1b8] sm:$0xf] %vm3385_vm4, %v4112_v35 }
 0x1d7   : > { %v2856_v37 = vmax.f32 %v2728_v25, 0.0  ;;  %v2459_v41 = vld [vmem:[#allocation2 + $0x380] sm:$0xff]  ;;  %v2530_v48 = vmul.f32 %v5564_v7, %v2395_v40  ;;  %v2396_v50 = vld [vmem:[#allocation2 + $0x188] sm:$0xff]  ;;  %2267 = vst.msk [vmem:[#allocation2 + $0x198] sm:$0xff] %vm305_vm3, %v2138_v42  ;;  %2331 = vst.msk [vmem:[#allocation2 + $0x398] sm:$0xff] %vm305_vm3, %v2202_v43 }
 0x1d8   : > { %v4049_v46 = vpack.c.bf16 %v2792_v36, %v2792_v36  ;;  %v2594_v49 = vmul.f32 %v5564_v7, %v2459_v41  ;;  %v2460_v51 = vld [vmem:[#allocation2 + $0x388] sm:$0xff]  ;;  %v2531_v52 = vmul.f32 %v5564_v7, %v2396_v50  ;;  %v488_v34 = vld [vmem:[#allocation2 + $0x1b0] sm:$0xff]  ;;  %v489_v44 = vld [vmem:[#allocation2 + $0x1b8] sm:$0xff] }
 0x1d9   : > { %v4113_v47 = vpack.c.bf16 %v2856_v37, %v2856_v37  ;;  %v2595_v20 = vmul.f32 %v5564_v7, %v2460_v51  ;;  %v2665_v53 = vadd.f32 %v5579_v12, %v2530_v48  ;;  %v552_v35 = vld [vmem:[#allocation2 + $0x3b0] sm:$0xff]  ;;  %v553_v45 = vld [vmem:[#allocation2 + $0x3b8] sm:$0xff] }
 0x1da   : > { %3433 = vst.msk [vmem:[%s5094_s29 + $0xbc] sm:$0xf] %vm3385_vm4, %v4049_v46  ;;  %v2729_v54 = vadd.f32 %v5579_v12, %v2594_v49  ;;  %v2666_v56 = vadd.f32 %v5579_v12, %v2531_v52  ;;  %v1784_v60 = vpop.f32.mrb[104].mxu0  ;;  %v2040_v61 = vpop.f32.mrb[104].mxu1 }
 0x1db   : > { %3497 = vst.msk [vmem:[%s5094_s29 + $0x1bc] sm:$0xf] %vm3385_vm4, %v4113_v47  ;;  %v2730_v57 = vadd.f32 %v5579_v12, %v2595_v20  ;;  %v2793_v58 = vmax.f32 %v2665_v53, 0.0  ;;  %v2139_v15 = vadd.f32 %v1784_v60, %v486_v55  ;;  %v2203_v0 = vadd.f32 %v2040_v61, %v550_v6  ;;  %v1786_v1 = vpop.f32.mrb[105].mxu0  ;;  %v2042_v2 = vpop.f32.mrb[105].mxu1 }
 0x1dc   : > { %v2857_v59 = vmax.f32 %v2729_v54, 0.0  ;;  %v2794_v62 = vmax.f32 %v2666_v56, 0.0  ;;  %v2397_v8 = vld [vmem:[#allocation2 + $0x190] sm:$0xff]  ;;  %v1787_v10 = vpop.f32.mrb[106].mxu0  ;;  %v2043_v11 = vpop.f32.mrb[106].mxu1  ;;  %v554_v2 = vld [vmem:[#allocation2 + $0x3c0] sm:$0xff] }
 0x1dd   : > { %v2858_v63 = vmax.f32 %v2730_v57, 0.0  ;;  %v4050_v4 = vpack.c.bf16 %v2793_v58, %v2793_v58  ;;  %v2461_v9 = vld [vmem:[#allocation2 + $0x390] sm:$0xff]  ;;  %v2532_v16 = vmul.f32 %v5564_v7, %v2397_v8  ;;  %2268 = vst.msk [vmem:[#allocation2 + $0x1a0] sm:$0xff] %vm305_vm3, %v2139_v15  ;;  %2332 = vst.msk [vmem:[#allocation2 + $0x3a0] sm:$0xff] %vm305_vm3, %v2203_v0  ;;  %v1789_v18 = vpop.f32.mrb[107].mxu0  ;;  %v2045_v19 = vpop.f32.mrb[107].mxu1  ;;  %v2140_v24 = vadd.f32 %v1787_v10, %v487_v3 }
 0x1de   : > { %v4114_v5 = vpack.c.bf16 %v2857_v59, %v2857_v59  ;;  %v4051_v13 = vpack.c.bf16 %v2794_v62, %v2794_v62  ;;  %v2596_v17 = vmul.f32 %v5564_v7, %v2461_v9  ;;  %v2398_v22 = vld [vmem:[#allocation2 + $0x198] sm:$0xff]  ;;  %v2204_v25 = vadd.f32 %v2043_v11, %v551_v21  ;;  %v490_v15 = vld [vmem:[#allocation2 + $0x1c0] sm:$0xff] }
 0x1df   : > { %v4115_v14 = vpack.c.bf16 %v2858_v63, %v2858_v63  ;;  %3434 = vst.msk [vmem:[%s5094_s29 + $0xc0] sm:$0xf] %vm3385_vm4, %v4050_v4  ;;  %v2462_v23 = vld [vmem:[#allocation2 + $0x398] sm:$0xff]  ;;  %v2667_v26 = vadd.f32 %v5579_v12, %v2532_v16  ;;  %v2533_v28 = vmul.f32 %v5564_v7, %v2398_v22  ;;  %v555_v22 = vld [vmem:[#allocation2 + $0x3c8] sm:$0xff] }
 0x1e0   : > { %3498 = vst.msk [vmem:[%s5094_s29 + $0x1c0] sm:$0xf] %vm3385_vm4, %v4114_v5  ;;  %3435 = vst.msk [vmem:[%s5094_s29 + $0xc4] sm:$0xf] %vm3385_vm4, %v4051_v13  ;;  %v2731_v27 = vadd.f32 %v5579_v12, %v2596_v17  ;;  %v2597_v29 = vmul.f32 %v5564_v7, %v2462_v23  ;;  %v491_v5 = vld [vmem:[#allocation2 + $0x1c8] sm:$0xff] }
 0x1e1   : > { %3499 = vst.msk [vmem:[%s5094_s29 + $0x1c4] sm:$0xf] %vm3385_vm4, %v4115_v14  ;;  %v2795_v30 = vmax.f32 %v2667_v26, 0.0  ;;  %v2668_v32 = vadd.f32 %v5579_v12, %v2533_v28 }
 0x1e2   : > { %2269 = vst.msk [vmem:[#allocation2 + $0x1a8] sm:$0xff] %vm305_vm3, %v2140_v24  ;;  %2333 = vst.msk [vmem:[#allocation2 + $0x3a8] sm:$0xff] %vm305_vm3, %v2204_v25  ;;  %v2859_v31 = vmax.f32 %v2731_v27, 0.0  ;;  %v2732_v33 = vadd.f32 %v5579_v12, %v2597_v29  ;;  %v1792_v36 = vpop.f32.mrb[108].mxu0  ;;  %v2048_v37 = vpop.f32.mrb[108].mxu1 }
 0x1e3   : > { %v4052_v38 = vpack.c.bf16 %v2795_v30, %v2795_v30  ;;  %v2796_v40 = vmax.f32 %v2668_v32, 0.0  ;;  %v1794_v42 = vpop.f32.mrb[109].mxu0  ;;  %v2050_v43 = vpop.f32.mrb[109].mxu1  ;;  %v2141_v48 = vadd.f32 %v1792_v36, %v488_v34  ;;  %v2205_v49 = vadd.f32 %v2048_v37, %v552_v35 }
 0x1e4   : > { %v4116_v39 = vpack.c.bf16 %v2859_v31, %v2859_v31  ;;  %v2860_v41 = vmax.f32 %v2732_v33, 0.0  ;;  %v2399_v46 = vld [vmem:[#allocation2 + $0x1a0] sm:$0xff]  ;;  %v1795_v50 = vpop.f32.mrb[110].mxu0  ;;  %v2051_v51 = vpop.f32.mrb[110].mxu1 }
 0x1e5   : > { %v2463_v47 = vld [vmem:[#allocation2 + $0x3a0] sm:$0xff]  ;;  %3436 = vst.msk [vmem:[%s5094_s29 + $0xc8] sm:$0xf] %vm3385_vm4, %v4052_v38  ;;  %v4053_v52 = vpack.c.bf16 %v2796_v40, %v2796_v40  ;;  %v2534_v53 = vmul.f32 %v5564_v7, %v2399_v46  ;;  %v1797_v55 = vpop.f32.mrb[111].mxu0  ;;  %v2053_v6 = vpop.f32.mrb[111].mxu1  ;;  %v2142_v56 = vadd.f32 %v1795_v50, %v489_v44  ;;  %v2206_v57 = vadd.f32 %v2051_v51, %v553_v45  ;;  %v492_v40 = vld [vmem:[#allocation2 + $0x1d0] sm:$0xff] }
 0x1e6   : > { %3500 = vst.msk [vmem:[%s5094_s29 + $0x1c8] sm:$0xf] %vm3385_vm4, %v4116_v39  ;;  %v4117_v20 = vpack.c.bf16 %v2860_v41, %v2860_v41  ;;  %v2598_v54 = vmul.f32 %v5564_v7, %v2463_v47  ;;  %v556_v46 = vld [vmem:[#allocation2 + $0x3d0] sm:$0xff]  ;;  %v493_v47 = vld [vmem:[#allocation2 + $0x1d8] sm:$0xff] }
 0x1e7   : > { %2270 = vst.msk [vmem:[#allocation2 + $0x1b0] sm:$0xff] %vm305_vm3, %v2141_v48  ;;  %2334 = vst.msk [vmem:[#allocation2 + $0x3b0] sm:$0xff] %vm305_vm3, %v2205_v49  ;;  %v2669_v58 = vadd.f32 %v5579_v12, %v2534_v53  ;;  %v557_v51 = vld [vmem:[#allocation2 + $0x3d8] sm:$0xff] }
 0x1e8   : > { %3437 = vst.msk [vmem:[%s5094_s29 + $0xcc] sm:$0xf] %vm3385_vm4, %v4053_v52  ;;  %3501 = vst.msk [vmem:[%s5094_s29 + $0x1cc] sm:$0xf] %vm3385_vm4, %v4117_v20  ;;  %v2733_v59 = vadd.f32 %v5579_v12, %v2598_v54 }
 0x1e9   : > { %v2400_v60 = vld [vmem:[#allocation2 + $0x1a8] sm:$0xff]  ;;  %2271 = vst.msk [vmem:[#allocation2 + $0x1b8] sm:$0xff] %vm305_vm3, %v2142_v56  ;;  %2335 = vst.msk [vmem:[#allocation2 + $0x3b8] sm:$0xff] %vm305_vm3, %v2206_v57  ;;  %v2797_v0 = vmax.f32 %v2669_v58, 0.0 }
 0x1ea   : > { %v2464_v61 = vld [vmem:[#allocation2 + $0x3a8] sm:$0xff]  ;;  %v2535_v62 = vmul.f32 %v5564_v7, %v2400_v60  ;;  %v2861_v1 = vmax.f32 %v2733_v59, 0.0  ;;  %v1800_v4 = vpop.f32.mrb[112].mxu0  ;;  %v2056_v11 = vpop.f32.mrb[112].mxu1 }
 0x1eb   : > { %v2599_v63 = vmul.f32 %v5564_v7, %v2464_v61  ;;  %v4054_v8 = vpack.c.bf16 %v2797_v0, %v2797_v0  ;;  %v2143_v10 = vadd.f32 %v1800_v4, %v490_v15  ;;  %v1802_v13 = vpop.f32.mrb[113].mxu0  ;;  %v2207_v17 = vadd.f32 %v2056_v11, %v554_v2  ;;  %v2058_v18 = vpop.f32.mrb[113].mxu1 }
 0x1ec   : > { %v2670_v3 = vadd.f32 %v5579_v12, %v2535_v62  ;;  %v4118_v9 = vpack.c.bf16 %v2861_v1, %v2861_v1  ;;  %v1803_v19 = vpop.f32.mrb[114].mxu0  ;;  %v2059_v26 = vpop.f32.mrb[114].mxu1  ;;  %v495_v18 = vld [vmem:[#allocation2 + $0x1e8] sm:$0xff] }
 0x1ed   : > { %v2734_v21 = vadd.f32 %v5579_v12, %v2599_v63  ;;  %3438 = vst.msk [vmem:[%s5094_s29 + $0xd0] sm:$0xf] %vm3385_vm4, %v4054_v8  ;;  %v2144_v25 = vadd.f32 %v1803_v19, %v491_v5  ;;  %v1805_v27 = vpop.f32.mrb[115].mxu0  ;;  %v2061_v32 = vpop.f32.mrb[115].mxu1  ;;  %v2208_v35 = vadd.f32 %v2059_v26, %v555_v22 }
 0x1ee   : > { %v2798_v14 = vmax.f32 %v2670_v3, 0.0  ;;  %3502 = vst.msk [vmem:[%s5094_s29 + $0x1d0] sm:$0xf] %vm3385_vm4, %v4118_v9  ;;  %v2401_v23 = vld [vmem:[#allocation2 + $0x1b0] sm:$0xff]  ;;  %v494_v9 = vld [vmem:[#allocation2 + $0x1e0] sm:$0xff]  ;;  %v559_v27 = vld [vmem:[#allocation2 + $0x3e8] sm:$0xff] }
 0x1ef   : > { %v2862_v16 = vmax.f32 %v2734_v21, 0.0  ;;  %v2465_v24 = vld [vmem:[#allocation2 + $0x3b0] sm:$0xff]  ;;  %2272 = vst.msk [vmem:[#allocation2 + $0x1c0] sm:$0xff] %vm305_vm3, %v2143_v10  ;;  %v2536_v30 = vmul.f32 %v5564_v7, %v2401_v23  ;;  %2336 = vst.msk [vmem:[#allocation2 + $0x3c0] sm:$0xff] %vm305_vm3, %v2207_v17 }
 0x1f0   : > { %v4055_v28 = vpack.c.bf16 %v2798_v14, %v2798_v14  ;;  %v2600_v31 = vmul.f32 %v5564_v7, %v2465_v24  ;;  %v2402_v33 = vld [vmem:[#allocation2 + $0x1b8] sm:$0xff]  ;;  %2273 = vst.msk [vmem:[#allocation2 + $0x1c8] sm:$0xff] %vm305_vm3, %v2144_v25  ;;  %2337 = vst.msk [vmem:[#allocation2 + $0x3c8] sm:$0xff] %vm305_vm3, %v2208_v35  ;;  %v558_v14 = vld [vmem:[#allocation2 + $0x3e0] sm:$0xff] }
 0x1f1   : > { %v4119_v29 = vpack.c.bf16 %v2862_v16, %v2862_v16  ;;  %v2466_v34 = vld [vmem:[#allocation2 + $0x3b8] sm:$0xff]  ;;  %v2671_v36 = vadd.f32 %v5579_v12, %v2536_v30  ;;  %v2537_v38 = vmul.f32 %v5564_v7, %v2402_v33 }
 0x1f2   : > { %3439 = vst.msk [vmem:[%s5094_s29 + $0xd4] sm:$0xf] %vm3385_vm4, %v4055_v28  ;;  %v2735_v37 = vadd.f32 %v5579_v12, %v2600_v31  ;;  %v2601_v39 = vmul.f32 %v5564_v7, %v2466_v34  ;;  %v1808_v45 = vpop.f32.mrb[116].mxu0  ;;  %v2064_v49 = vpop.f32.mrb[116].mxu1 }
 0x1f3   : > { %3503 = vst.msk [vmem:[%s5094_s29 + $0x1d4] sm:$0xf] %vm3385_vm4, %v4119_v29  ;;  %v2799_v41 = vmax.f32 %v2671_v36, 0.0  ;;  %v2672_v43 = vadd.f32 %v5579_v12, %v2537_v38  ;;  %v2145_v48 = vadd.f32 %v1808_v45, %v492_v40  ;;  %v1810_v50 = vpop.f32.mrb[117].mxu0  ;;  %v2066_v6 = vpop.f32.mrb[117].mxu1  ;;  %v2209_v59 = vadd.f32 %v2064_v49, %v556_v46  ;;  %v496_v49 = vld [vmem:[#allocation2 + $0x1f0] sm:$0xff] }
 0x1f4   : > { %v2863_v42 = vmax.f32 %v2735_v37, 0.0  ;;  %v2736_v44 = vadd.f32 %v5579_v12, %v2601_v39  ;;  %v1811_v56 = vpop.f32.mrb[118].mxu0  ;;  %v2067_v61 = vpop.f32.mrb[118].mxu1 }
 0x1f5   : > { %v4056_v52 = vpack.c.bf16 %v2799_v41, %v2799_v41  ;;  %v2800_v53 = vmax.f32 %v2672_v43, 0.0  ;;  %2274 = vst.msk [vmem:[#allocation2 + $0x1d0] sm:$0xff] %vm305_vm3, %v2145_v48  ;;  %v2146_v60 = vadd.f32 %v1811_v56, %v493_v47  ;;  %v1813_v62 = vpop.f32.mrb[119].mxu0  ;;  %v2210_v2 = vadd.f32 %v2067_v61, %v557_v51  ;;  %v2069_v3 = vpop.f32.mrb[119].mxu1  ;;  %2338 = vst.msk [vmem:[#allocation2 + $0x3d0] sm:$0xff] %vm305_vm3, %v2209_v59  ;;  %v561_v61 = vld [vmem:[#allocation2 + $0x3f8] sm:$0xff] }
 0x1f6   : > { %v4120_v20 = vpack.c.bf16 %v2863_v42, %v2863_v42  ;;  %v2864_v54 = vmax.f32 %v2736_v44, 0.0  ;;  %v2403_v55 = vld [vmem:[#allocation2 + $0x1c0] sm:$0xff] }
 0x1f7   : > { %v2538_v57 = vmul.f32 %v5564_v7, %v2403_v55  ;;  %v2467_v58 = vld [vmem:[#allocation2 + $0x3c0] sm:$0xff]  ;;  %3440 = vst.msk [vmem:[%s5094_s29 + $0xd8] sm:$0xf] %vm3385_vm4, %v4056_v52  ;;  %v4057_v63 = vpack.c.bf16 %v2800_v53, %v2800_v53  ;;  %v2404_v1 = vld [vmem:[#allocation2 + $0x1c8] sm:$0xff]  ;;  %v497_v55 = vld [vmem:[#allocation2 + $0x1f8] sm:$0xff] }
 0x1f8   : > { %3504 = vst.msk [vmem:[%s5094_s29 + $0x1d8] sm:$0xf] %vm3385_vm4, %v4120_v20  ;;  %v4121_v15 = vpack.c.bf16 %v2864_v54, %v2864_v54  ;;  %v2602_v0 = vmul.f32 %v5564_v7, %v2467_v58  ;;  %v2539_v4 = vmul.f32 %v5564_v7, %v2404_v1  ;;  %v2468_v8 = vld [vmem:[#allocation2 + $0x3c8] sm:$0xff]  ;;  %v560_v20 = vld [vmem:[#allocation2 + $0x3f0] sm:$0xff] }
 0x1f9   : > { %v2673_v21 = vadd.f32 %v5579_v12, %v2538_v57  ;;  %2275 = vst.msk [vmem:[#allocation2 + $0x1d8] sm:$0xff] %vm305_vm3, %v2146_v60  ;;  %2339 = vst.msk [vmem:[#allocation2 + $0x3d8] sm:$0xff] %vm305_vm3, %v2210_v2  ;;  %v2603_v13 = vmul.f32 %v5564_v7, %v2468_v8 }
 0x1fa   : > { %3441 = vst.msk [vmem:[%s5094_s29 + $0xdc] sm:$0xf] %vm3385_vm4, %v4057_v63  ;;  %3505 = vst.msk [vmem:[%s5094_s29 + $0x1dc] sm:$0xf] %vm3385_vm4, %v4121_v15  ;;  %v2737_v5 = vadd.f32 %v5579_v12, %v2602_v0  ;;  %v2674_v11 = vadd.f32 %v5579_v12, %v2539_v4  ;;  %v1816_v17 = vpop.f32.mrb[120].mxu0  ;;  %v2072_v25 = vpop.f32.mrb[120].mxu1 }
 0x1fb   : > { %v2801_v10 = vmax.f32 %v2673_v21, 0.0  ;;  %v2738_v23 = vadd.f32 %v5579_v12, %v2603_v13  ;;  %v2147_v24 = vadd.f32 %v1816_v17, %v494_v9  ;;  %v1818_v26 = vpop.f32.mrb[121].mxu0  ;;  %v2211_v30 = vadd.f32 %v2072_v25, %v558_v14  ;;  %v2074_v31 = vpop.f32.mrb[121].mxu1 }
 0x1fc   : > { %v2865_v16 = vmax.f32 %v2737_v5, 0.0  ;;  %v2802_v22 = vmax.f32 %v2674_v11, 0.0  ;;  %v2405_v29 = vld [vmem:[#allocation2 + $0x1d0] sm:$0xff]  ;;  %v1819_v32 = vpop.f32.mrb[122].mxu0  ;;  %v2075_v37 = vpop.f32.mrb[122].mxu1 }
 0x1fd   : > { %v4058_v19 = vpack.c.bf16 %v2801_v10, %v2801_v10  ;;  %v2866_v34 = vmax.f32 %v2738_v23, 0.0  ;;  %v2540_v35 = vmul.f32 %v5564_v7, %v2405_v29  ;;  %2276 = vst.msk [vmem:[#allocation2 + $0x1e0] sm:$0xff] %vm305_vm3, %v2147_v24  ;;  %v2148_v36 = vadd.f32 %v1819_v32, %v495_v18  ;;  %v1821_v38 = vpop.f32.mrb[123].mxu0  ;;  %v2469_v39 = vld [vmem:[#allocation2 + $0x3d0] sm:$0xff]  ;;  %2340 = vst.msk [vmem:[#allocation2 + $0x3e0] sm:$0xff] %vm305_vm3, %v2211_v30  ;;  %v2077_v42 = vpop.f32.mrb[123].mxu1 }
 0x1fe   : > { %v4122_v28 = vpack.c.bf16 %v2865_v16, %v2865_v16  ;;  %v4059_v33 = vpack.c.bf16 %v2802_v22, %v2802_v22  ;;  %v2212_v41 = vadd.f32 %v2075_v37, %v559_v27  ;;  %v2604_v45 = vmul.f32 %v5564_v7, %v2469_v39 }
 0x1ff   : > { %3442 = vst.msk [vmem:[%s5094_s29 + $0xe0] sm:$0xf] %vm3385_vm4, %v4058_v19  ;;  %v4123_v43 = vpack.c.bf16 %v2866_v34, %v2866_v34  ;;  %v2675_v44 = vadd.f32 %v5579_v12, %v2540_v35 }
 0x200   : > { %3506 = vst.msk [vmem:[%s5094_s29 + $0x1e0] sm:$0xf] %vm3385_vm4, %v4122_v28  ;;  %v2406_v40 = vld [vmem:[#allocation2 + $0x1d8] sm:$0xff]  ;;  %3443 = vst.msk [vmem:[%s5094_s29 + $0xe4] sm:$0xf] %vm3385_vm4, %v4059_v33  ;;  %v2739_v51 = vadd.f32 %v5579_v12, %v2604_v45 }
 0x201   : > { %v2541_v46 = vmul.f32 %v5564_v7, %v2406_v40  ;;  %v2470_v47 = vld [vmem:[#allocation2 + $0x3d8] sm:$0xff]  ;;  %2277 = vst.msk [vmem:[#allocation2 + $0x1e8] sm:$0xff] %vm305_vm3, %v2148_v36  ;;  %2341 = vst.msk [vmem:[#allocation2 + $0x3e8] sm:$0xff] %vm305_vm3, %v2212_v41  ;;  %v2803_v50 = vmax.f32 %v2675_v44, 0.0 }
 0x202   : > { %v2605_v48 = vmul.f32 %v5564_v7, %v2470_v47  ;;  %3507 = vst.msk [vmem:[%s5094_s29 + $0x1e4] sm:$0xf] %vm3385_vm4, %v4123_v43  ;;  %v1824_v54 = vpop.f32.mrb[124].mxu0  ;;  %v2867_v56 = vmax.f32 %v2739_v51, 0.0  ;;  %v2080_v59 = vpop.f32.mrb[124].mxu1 }
 0x203   : > { %v2676_v52 = vadd.f32 %v5579_v12, %v2541_v46  ;;  %v4060_v6 = vpack.c.bf16 %v2803_v50, %v2803_v50  ;;  %v2149_v58 = vadd.f32 %v1824_v54, %v496_v49  ;;  %v1826_v60 = vpop.f32.mrb[125].mxu0  ;;  %v2213_v15 = vadd.f32 %v2080_v59, %v560_v20  ;;  %v2082_v0 = vpop.f32.mrb[125].mxu1 }
 0x204   : > { %v2740_v53 = vadd.f32 %v5579_v12, %v2605_v48  ;;  %v2407_v63 = vld [vmem:[#allocation2 + $0x1e0] sm:$0xff]  ;;  %v1827_v1 = vpop.f32.mrb[126].mxu0  ;;  %v4124_v2 = vpack.c.bf16 %v2867_v56, %v2867_v56  ;;  %v2083_v8 = vpop.f32.mrb[126].mxu1 }
 0x205   : > { %v2804_v57 = vmax.f32 %v2676_v52, 0.0  ;;  %3444 = vst.msk [vmem:[%s5094_s29 + $0xe8] sm:$0xf] %vm3385_vm4, %v4060_v6  ;;  %v2542_v21 = vmul.f32 %v5564_v7, %v2407_v63  ;;  %v2471_v4 = vld [vmem:[#allocation2 + $0x3e0] sm:$0xff]  ;;  %v2150_v5 = vadd.f32 %v1827_v1, %v497_v55  ;;  %v1829_v9 = vpop.f32.mrb[127].mxu0  ;;  %v2214_v14 = vadd.f32 %v2083_v8, %v561_v61  ;;  %v2085_v16 = vpop.f32.mrb[127].mxu1 }
 0x206   : > { %v2868_v62 = vmax.f32 %v2740_v53, 0.0  ;;  %2278 = vst.msk [vmem:[#allocation2 + $0x1f0] sm:$0xff] %vm305_vm3, %v2149_v58  ;;  %v2606_v11 = vmul.f32 %v5564_v7, %v2471_v4  ;;  %2342 = vst.msk [vmem:[#allocation2 + $0x3f0] sm:$0xff] %vm305_vm3, %v2213_v15 }
 0x207   : > { %v4061_v3 = vpack.c.bf16 %v2804_v57, %v2804_v57  ;;  %3508 = vst.msk [vmem:[%s5094_s29 + $0x1e8] sm:$0xf] %vm3385_vm4, %v4124_v2  ;;  %v2677_v17 = vadd.f32 %v5579_v12, %v2542_v21 }
 0x208   : > { %v4125_v10 = vpack.c.bf16 %v2868_v62, %v2868_v62  ;;  %v2408_v13 = vld [vmem:[#allocation2 + $0x1e8] sm:$0xff]  ;;  %2279 = vst.msk [vmem:[#allocation2 + $0x1f8] sm:$0xff] %vm305_vm3, %v2150_v5  ;;  %v2741_v22 = vadd.f32 %v5579_v12, %v2606_v11  ;;  %2343 = vst.msk [vmem:[#allocation2 + $0x3f8] sm:$0xff] %vm305_vm3, %v2214_v14 }
 0x209   : > { %3445 = vst.msk [vmem:[%s5094_s29 + $0xec] sm:$0xf] %vm3385_vm4, %v4061_v3  ;;  %v2543_v18 = vmul.f32 %v5564_v7, %v2408_v13  ;;  %v2472_v19 = vld [vmem:[#allocation2 + $0x3e8] sm:$0xff]  ;;  %v2805_v24 = vmax.f32 %v2677_v17, 0.0 }
 0x20a   : > { %3509 = vst.msk [vmem:[%s5094_s29 + $0x1ec] sm:$0xf] %vm3385_vm4, %v4125_v10  ;;  %v2607_v23 = vmul.f32 %v5564_v7, %v2472_v19  ;;  %v2869_v26 = vmax.f32 %v2741_v22, 0.0 }
 0x20b   : > { %v2678_v25 = vadd.f32 %v5579_v12, %v2543_v18  ;;  %v4062_v28 = vpack.c.bf16 %v2805_v24, %v2805_v24 }
 0x20c   : > { %v2742_v27 = vadd.f32 %v5579_v12, %v2607_v23  ;;  %v4126_v30 = vpack.c.bf16 %v2869_v26, %v2869_v26 }
 0x20d   : > { %v2806_v29 = vmax.f32 %v2678_v25, 0.0  ;;  %v2409_v32 = vld [vmem:[#allocation2 + $0x1f0] sm:$0xff]  ;;  %3446 = vst.msk [vmem:[%s5094_s29 + $0xf0] sm:$0xf] %vm3385_vm4, %v4062_v28 }
 0x20e   : > { %v2870_v31 = vmax.f32 %v2742_v27, 0.0  ;;  %v2544_v34 = vmul.f32 %v5564_v7, %v2409_v32  ;;  %v2473_v35 = vld [vmem:[#allocation2 + $0x3f0] sm:$0xff]  ;;  %3510 = vst.msk [vmem:[%s5094_s29 + $0x1f0] sm:$0xf] %vm3385_vm4, %v4126_v30 }
 0x20f   : > { %v4063_v33 = vpack.c.bf16 %v2806_v29, %v2806_v29  ;;  %v2608_v37 = vmul.f32 %v5564_v7, %v2473_v35  ;;  %v2410_v38 = vld [vmem:[#allocation2 + $0x1f8] sm:$0xff] }
 0x210   : > { %v4127_v36 = vpack.c.bf16 %v2870_v31, %v2870_v31  ;;  %v2679_v39 = vadd.f32 %v5579_v12, %v2544_v34  ;;  %v2545_v40 = vmul.f32 %v5564_v7, %v2410_v38  ;;  %v2474_v41 = vld [vmem:[#allocation2 + $0x3f8] sm:$0xff] }
 0x211   : > { %3447 = vst.msk [vmem:[%s5094_s29 + $0xf4] sm:$0xf] %vm3385_vm4, %v4063_v33  ;;  %v2743_v42 = vadd.f32 %v5579_v12, %v2608_v37  ;;  %v2609_v43 = vmul.f32 %v5564_v7, %v2474_v41 }
 0x212   : > { %3511 = vst.msk [vmem:[%s5094_s29 + $0x1f4] sm:$0xf] %vm3385_vm4, %v4127_v36  ;;  %v2807_v44 = vmax.f32 %v2679_v39, 0.0  ;;  %v2680_v45 = vadd.f32 %v5579_v12, %v2545_v40 }
 0x213   : > { %v2871_v46 = vmax.f32 %v2743_v42, 0.0  ;;  %v2744_v47 = vadd.f32 %v5579_v12, %v2609_v43 }
 0x214   : > { %v4064_v48 = vpack.c.bf16 %v2807_v44, %v2807_v44  ;;  %v2808_v49 = vmax.f32 %v2680_v45, 0.0 }
 0x215   : > { %v4128_v50 = vpack.c.bf16 %v2871_v46, %v2871_v46  ;;  %v2872_v51 = vmax.f32 %v2744_v47, 0.0 }
 0x216   : > { %3448 = vst.msk [vmem:[%s5094_s29 + $0xf8] sm:$0xf] %vm3385_vm4, %v4064_v48  ;;  %v4065_v52 = vpack.c.bf16 %v2808_v49, %v2808_v49 }
 0x217   : > { %3512 = vst.msk [vmem:[%s5094_s29 + $0x1f8] sm:$0xf] %vm3385_vm4, %v4128_v50  ;;  %v4129_v7 = vpack.c.bf16 %v2872_v51, %v2872_v51 }
 0x218   : > { %3449 = vst.msk [vmem:[%s5094_s29 + $0xfc] sm:$0xf] %vm3385_vm4, %v4065_v52 }
 0x219   : > { %3513 = vst.msk [vmem:[%s5094_s29 + $0x1fc] sm:$0xf] %vm3385_vm4, %v4129_v7 }
 0x21a   : > { %4430 = shalt.err (!%p4427_p5)
}
 0x21b   : > { %s4431_s12 = scalar_lea.hbm %s5750_s24, 8192  ;;  %s4435_s7 = scalar_lea.hbm %s5812_s4, 16384 }
 0x21c   : > { %p4432_p6 = scmp.ne.s32.totalorder %s5750_s24, %s4431_s12  ;;  %p4436_p10 = scmp.lt.u32.totalorder %s5750_s24, %s5812_s4 }
 0x21d   : > { %p4437_p11 = scmp.lt.u32.totalorder %s4435_s7, %s4431_s12  ;;  %p4439_p13 = scmp.lt.u32.totalorder %s4431_s12, %s5750_s24 }
 0x21e   : > { %p4433_p7 = pnand %p4432_p6, %p4568_p4 }
 0x21f   : > { %p4438_p12 = por %p4437_p11, %p4436_p10 }
 0x220   : > { %p4434_p9 = pneg %p4433_p7 }
 0x221   : > { %p4440_p0 = por %p4439_p13, %p4438_p12 }
 0x223   : > { %p4441_p1 = pnand %p4440_p0, %p4434_p9 }
 0x225   : > { %4444 = shalt.err (!%p4441_p1)
}
 0x226   : > { %s4501_s10 = smov 64   ;;  %s4502_s11 = smov 4  }
 0x227   : > { %4151 = dma.vmem_to_hbm [thread:$0]  (%p4568_p4), %s5752_s13, 8192, %s5750_s24, %s5762_s18, %s4501_s10, %s4501_s10, %s4502_s11  }
 0x228 PF: > { %p4157_p2 = scmp.ge.s32.totalorder %s4495_s20, 2  ;;  %s3544_s14 = sand.u32 1, %s4475_s15  }
 0x229   : > { %s3545_s22 = scalar_lea.sflag [#allocation4], %s3544_s14 }
 0x22a   : > { %p4154_p3 = pnand %p4157_p2, %p4575_p8 }
 0x22c   : > { %4470 = dma.done.wait (!%p4154_p3), %s3545_s22, 8192  }
 0x22d   : > { %4472 = vsyncadd (!%p4154_p3), %s3545_s22, 4294959104  ;;  %s17_s20 = sadd.s32 1, %s4495_s20   ;;  %s5815_s15 = smov %s4479_s16 }
 0x22e   : > { %p14_p5 = scmp.ge.s32.totalorder %s17_s20, 4   ;;  %s5816_s16 = smov %s4483_s17 }
 0x22f   : > { %s5817_s17 = smov %s4581_s28  ;;  %s5818_s18 = smov %s4491_s19 }
 0x230   : > { %s5819_s19 = smov %s5821_s23  ;;  %16 = sbr.rel (!%p14_p5) target bundleno = 4 (0x4), region = 88 }
 0x237   :  { %3550 = vsyncpa [#allocation4], 1 }
 0x238   :  { %3552 = vsyncpa [#allocation4 + $0x1], 1 }

</bundles_post_ra>
